<compile_context>
chip_gen: v5e
topology: v5e:2x2
jax: 0.10.0
libtpu: 0.0.40
codegen_flags: <defaults>
</compile_context>

<pallas_src>
import jax
import jax.numpy as jnp
from jax.experimental import pallas as pl
from jax.experimental.pallas import tpu as pltpu


_EPS = 1e-5
# (parity plane index r|s, start offset in the halo-padded parity plane)
# for conv tap offsets dy|dx = 0, 1, 2 of the stride-2 convolution.
_TAP_OFF = ((1, 0), (0, 1), (1, 1))


# -----------------------------------------------------------------------------
# Fused DownSamplingBlock kernel
# -----------------------------------------------------------------------------
def _make_down_block_kernel(N, Ho, Wo, Cin, Cout, pad_ch):
    rows = N * Ho * Wo
    inv_rows = 1.0 / rows

    def conv_matmul(taps, w_ref, cin):
        # Nine per-tap MXU matmuls, bf16 operands / f32 accumulation.  Chosen over
        # a big-K lane-concat im2col: the MXU is nowhere near the bottleneck at
        # Cout=32, and concatenating nine sub-128-lane pieces is pure XLU packing.
        def as_bf16(t):
            return t if t.dtype == jnp.bfloat16 else t.astype(jnp.bfloat16)
        acc = jnp.dot(as_bf16(taps[0]), w_ref[0:cin, :],
                      preferred_element_type=jnp.float32)
        for t in range(1, 9):
            acc = acc + jnp.dot(as_bf16(taps[t]), w_ref[t * cin:(t + 1) * cin, :],
                                preferred_element_type=jnp.float32)
        return acc

    def batchnorm(acc, g_ref, be_ref):
        # Training-mode BatchNorm2d (biased variance) as a single fused scale/shift:
        # var = E[x^2] - mean^2; out = acc*scale + shift.  rsqrt -> EUP (free slot).
        # (One-pass variance cancellation is benign at these unit-scale activations.)
        s1 = jnp.sum(acc, axis=0, keepdims=True)
        s2 = jnp.sum(acc * acc, axis=0, keepdims=True)
        mean = s1 * inv_rows
        var = s2 * inv_rows - mean * mean
        scale = g_ref[...] * jax.lax.rsqrt(var + _EPS)
        shift = be_ref[...] - mean * scale
        return acc * scale + shift

    def kernel(xsp_ref, sc_ref, w1_ref, g1_ref, be1_ref,
               w2_ref, g2_ref, be2_ref, out_ref, h1p_ref):
        # ---- Conv1: 3x3 / stride 2, evaluated only at the output positions -------
        # xsp_ref holds the four 2x2 space-to-depth parity planes (bf16) of the
        # input with the stride-2 conv's top/left halo baked in, so every tap is a
        # contiguous slice (no strided access, no masks, no wasted compute).
        # Conv bias omitted: it cancels exactly in the training-mode BN that follows.
        taps1 = []
        for dy in range(3):
            r, i0 = _TAP_OFF[dy]
            for dx in range(3):
                s, j0 = _TAP_OFF[dx]
                p = r * 2 + s
                tap = xsp_ref[p * N:(p + 1) * N, i0:i0 + Ho, j0:j0 + Wo, :]
                taps1.append(tap.reshape(rows, Cin))
        h1 = jnp.maximum(batchnorm(conv_matmul(taps1, w1_ref, Cin),
                                   g1_ref, be1_ref), 0.0)

        # ---- Conv2: 3x3 / stride 1 on h1; halo padded in a VMEM scratch ----------
        # h1 never leaves VMEM.  (Scratch kept f32: packed-dtype masked interior
        # writes buy nothing at 25 KiB; taps are cast to bf16 at the matmul.)
        h1p_ref[...] = jnp.zeros_like(h1p_ref)
        h1p_ref[:, 1:Ho + 1, 1:Wo + 1, :] = h1.reshape(N, Ho, Wo, Cout)
        taps2 = [h1p_ref[:, dy:dy + Ho, dx:dx + Wo, :].reshape(rows, Cout)
                 for dy in range(3) for dx in range(3)]
        fx = batchnorm(conv_matmul(taps2, w2_ref, Cout), g2_ref, be2_ref)

        # ---- Residual: channel-zero-padded x[:, :, ::2, ::2] shortcut + ReLU -----
        # Shortcut arrives un-padded as (rows, Cin) f32; its zero channel padding is
        # realised by overwriting only the middle channel slice of the output.
        mid = fx[:, pad_ch:pad_ch + Cin] + sc_ref[...]
        out_ref[...] = jnp.maximum(fx, 0.0)                       # side channels (sc == 0 there)
        out_ref[:, pad_ch:pad_ch + Cin] = jnp.maximum(mid, 0.0)   # middle channels

    return kernel


# -----------------------------------------------------------------------------
# Wrapper (NCHW in / NCHW out, like the PyTorch module) — jit it so the few
# remaining layout HLOs fuse around the pallas_call.
# -----------------------------------------------------------------------------
def down_sampling_block(x_nchw, params):
    """Forward pass of DownSamplingBlock.  x_nchw: (N, Cin, H, W) float32."""
    N, Cin, H, W = x_nchw.shape
    Cout = params["w1"].shape[-1]
    assert H % 2 == 0 and W % 2 == 0 and (Cout - Cin) % 2 == 0
    Ho, Wo = H // 2, W // 2
    rows = N * Ho * Wo
    pad_ch = (Cout - Cin) // 2

    # ----- single layout-only preprocessing step --------------------------------
    # NCHW -> 2x2 space-to-depth NHWC parity planes: xs[r,s,n,i,j,c] = x[n,c,2i+r,2j+s]
    xs = x_nchw.reshape(N, Cin, Ho, 2, Wo, 2).transpose(3, 5, 0, 2, 4, 1)
    # bake in the stride-2 conv's top/left halo (the only padding it ever touches)
    # and cast the conv input (largest DMA) to bf16 for the MXU.
    xsp = jnp.pad(xs, ((0, 0), (0, 0), (0, 0), (1, 0), (1, 0), (0, 0)))
    xsp = xsp.reshape(4 * N, Ho + 1, Wo + 1, Cin).astype(jnp.bfloat16)
    # shortcut x[:, :, ::2, ::2] is exactly parity plane (0, 0); stays f32, un-padded.
    sc = xs[0, 0].reshape(rows, Cin)

    # im2col weight matrices, bf16 for the MXU.  Biases intentionally not passed:
    # they cancel in the training-mode BN that immediately follows each conv.
    w1m = params["w1"].reshape(9 * Cin, Cout).astype(jnp.bfloat16)
    w2m = params["w2"].reshape(9 * Cout, Cout).astype(jnp.bfloat16)

    args = (xsp, sc, w1m, params["g1"], params["be1"],
            w2m, params["g2"], params["be2"])

    kernel = _make_down_block_kernel(N, Ho, Wo, Cin, Cout, pad_ch)
    out2d = pl.pallas_call(
        kernel,
        out_shape=jax.ShapeDtypeStruct((rows, Cout), jnp.float32),
        in_specs=[pl.BlockSpec(memory_space=pltpu.MemorySpace.VMEM)] * len(args),
        out_specs=pl.BlockSpec(memory_space=pltpu.MemorySpace.VMEM),
        scratch_shapes=[pltpu.VMEM((N, Ho + 2, Wo + 2, Cout), jnp.float32)],
        compiler_params=pltpu.CompilerParams(vmem_limit_bytes=32 * 1024 * 1024),
    )(*args)

    # (rows, Cout) is memory-identical to NHWC: reshape is free, one transpose back.
    return jnp.transpose(out2d.reshape(N, Ho, Wo, Cout), (0, 3, 1, 2))


# -----------------------------------------------------------------------------
# Deterministic parameters and a pure-JAX f32 reference (for verification)
# -----------------------------------------------------------------------------
def build_params(key, in_ch, out_ch):
    ks = jax.random.split(key, 8)

    def conv_w(k, cin, cout):
        return jax.random.normal(k, (3, 3, cin, cout), jnp.float32) / jnp.sqrt(9.0 * cin)

    return dict(
        w1=conv_w(ks[0], in_ch, out_ch),
        b1=0.05 * jax.random.normal(ks[1], (1, out_ch), jnp.float32),
        g1=1.0 + 0.1 * jax.random.normal(ks[2], (1, out_ch), jnp.float32),
        be1=0.1 * jax.random.normal(ks[3], (1, out_ch), jnp.float32),
        w2=conv_w(ks[4], out_ch, out_ch),
        b2=0.05 * jax.random.normal(ks[5], (1, out_ch), jnp.float32),
        g2=1.0 + 0.1 * jax.random.normal(ks[6], (1, out_ch), jnp.float32),
        be2=0.1 * jax.random.normal(ks[7], (1, out_ch), jnp.float32),
    )


def _reference(x_nchw, params):
    """Pure-JAX f32 reference of DownSamplingBlock.forward (training-mode BN).

    Note: this reference DOES apply the conv biases; the kernel omits them because
    they cancel exactly in the batch-mean subtraction of training-mode BN.
    """
    Cin = x_nchw.shape[1]
    Cout = params["w1"].shape[-1]
    pad_ch = (Cout - Cin) // 2
    x = jnp.transpose(x_nchw, (0, 2, 3, 1))

    def conv(h, w, stride):
        return jax.lax.conv_general_dilated(
            h, w, window_strides=(stride, stride), padding=((1, 1), (1, 1)),
            dimension_numbers=("NHWC", "HWIO", "NHWC"),
            precision=jax.lax.Precision.HIGHEST)

    def bn(h, g, b):
        mean = jnp.mean(h, axis=(0, 1, 2), keepdims=True)
        var = jnp.mean((h - mean) ** 2, axis=(0, 1, 2), keepdims=True)
        return ((h - mean) * jax.lax.rsqrt(var + _EPS)
                * g.reshape(1, 1, 1, -1) + b.reshape(1, 1, 1, -1))

    h = conv(x, params["w1"], 2) + params["b1"].reshape(1, 1, 1, -1)
    h = jnp.maximum(bn(h, params["g1"], params["be1"]), 0.0)
    fx = conv(h, params["w2"], 1) + params["b2"].reshape(1, 1, 1, -1)
    fx = bn(fx, params["g2"], params["be2"])
    scd = jnp.pad(x[:, ::2, ::2, :], ((0, 0), (0, 0), (0, 0), (pad_ch, pad_ch)))
    out = jnp.maximum(fx + scd, 0.0)
    return jnp.transpose(out, (0, 3, 1, 2))


if __name__ == "__main__":
    key = jax.random.PRNGKey(0)
    kx, kp = jax.random.split(key)

    N, IN_CH, OUT_CH, H, W = 2, 16, 32, 16, 16               # ResNet "ds1"-style shapes
    x = jax.random.normal(kx, (N, IN_CH, H, W), jnp.float32)  # NCHW like PyTorch
    params = build_params(kp, IN_CH, OUT_CH)

    fwd = jax.jit(down_sampling_block)
    out = jax.block_until_ready(fwd(x, params))
    assert out.shape == (N, OUT_CH, H // 2, W // 2), out.shape

    ref = jax.block_until_ready(_reference(x, params))
    err = float(jnp.max(jnp.abs(out - ref)))
    # bf16 MXU operands with f32 accumulation vs. an f32 HIGHEST-precision reference:
    # typical max-abs error ~1e-2; 5e-2 is a tight-but-safe regression guard.
    assert err < 5e-2, f"max abs error {err}"
    print("KERNEL_OK")
</pallas_src>

<mosaic_0001>
module attributes {stable_mosaic.version = 11 : i64} {
  func.func @kernel(%arg0: memref<8x9x9x16xbf16, #tpu.memory_space<vmem>>, %arg1: memref<128x16xf32, #tpu.memory_space<vmem>>, %arg2: memref<144x32xbf16, #tpu.memory_space<vmem>>, %arg3: memref<1x32xf32, #tpu.memory_space<vmem>>, %arg4: memref<1x32xf32, #tpu.memory_space<vmem>>, %arg5: memref<288x32xbf16, #tpu.memory_space<vmem>>, %arg6: memref<1x32xf32, #tpu.memory_space<vmem>>, %arg7: memref<1x32xf32, #tpu.memory_space<vmem>>, %arg8: memref<128x32xf32, #tpu.memory_space<vmem>>, %arg9: memref<2x10x10x32xf32, #tpu.memory_space<vmem>>) attributes {dimension_semantics = [], scalar_prefetch = 0 : i64, scratch_operands = 1 : i64, tpu.core_type = #tpu.core_type<tc>} {
    %c6 = arith.constant 6 : index
    %c0 = arith.constant 0 : index
    %c0_0 = arith.constant 0 : index
    %c0_1 = arith.constant 0 : index
    %0 = vector.load %arg0[%c6, %c0, %c0_0, %c0_1] : memref<8x9x9x16xbf16, #tpu.memory_space<vmem>>, vector<2x8x8x16xbf16>
    %1 = vector.shape_cast %0 : vector<2x8x8x16xbf16> to vector<128x16xbf16>
    %c4 = arith.constant 4 : index
    %c0_2 = arith.constant 0 : index
    %c1 = arith.constant 1 : index
    %c0_3 = arith.constant 0 : index
    %2 = vector.load %arg0[%c4, %c0_2, %c1, %c0_3] : memref<8x9x9x16xbf16, #tpu.memory_space<vmem>>, vector<2x8x8x16xbf16>
    %3 = vector.shape_cast %2 : vector<2x8x8x16xbf16> to vector<128x16xbf16>
    %c6_4 = arith.constant 6 : index
    %c0_5 = arith.constant 0 : index
    %c1_6 = arith.constant 1 : index
    %c0_7 = arith.constant 0 : index
    %4 = vector.load %arg0[%c6_4, %c0_5, %c1_6, %c0_7] : memref<8x9x9x16xbf16, #tpu.memory_space<vmem>>, vector<2x8x8x16xbf16>
    %5 = vector.shape_cast %4 : vector<2x8x8x16xbf16> to vector<128x16xbf16>
    %c2 = arith.constant 2 : index
    %c1_8 = arith.constant 1 : index
    %c0_9 = arith.constant 0 : index
    %c0_10 = arith.constant 0 : index
    %6 = vector.load %arg0[%c2, %c1_8, %c0_9, %c0_10] : memref<8x9x9x16xbf16, #tpu.memory_space<vmem>>, vector<2x8x8x16xbf16>
    %7 = vector.shape_cast %6 : vector<2x8x8x16xbf16> to vector<128x16xbf16>
    %c0_11 = arith.constant 0 : index
    %c1_12 = arith.constant 1 : index
    %c1_13 = arith.constant 1 : index
    %c0_14 = arith.constant 0 : index
    %8 = vector.load %arg0[%c0_11, %c1_12, %c1_13, %c0_14] : memref<8x9x9x16xbf16, #tpu.memory_space<vmem>>, vector<2x8x8x16xbf16>
    %9 = vector.shape_cast %8 : vector<2x8x8x16xbf16> to vector<128x16xbf16>
    %c2_15 = arith.constant 2 : index
    %c1_16 = arith.constant 1 : index
    %c1_17 = arith.constant 1 : index
    %c0_18 = arith.constant 0 : index
    %10 = vector.load %arg0[%c2_15, %c1_16, %c1_17, %c0_18] : memref<8x9x9x16xbf16, #tpu.memory_space<vmem>>, vector<2x8x8x16xbf16>
    %11 = vector.shape_cast %10 : vector<2x8x8x16xbf16> to vector<128x16xbf16>
    %c6_19 = arith.constant 6 : index
    %c1_20 = arith.constant 1 : index
    %c0_21 = arith.constant 0 : index
    %c0_22 = arith.constant 0 : index
    %12 = vector.load %arg0[%c6_19, %c1_20, %c0_21, %c0_22] : memref<8x9x9x16xbf16, #tpu.memory_space<vmem>>, vector<2x8x8x16xbf16>
    %13 = vector.shape_cast %12 : vector<2x8x8x16xbf16> to vector<128x16xbf16>
    %c4_23 = arith.constant 4 : index
    %c1_24 = arith.constant 1 : index
    %c1_25 = arith.constant 1 : index
    %c0_26 = arith.constant 0 : index
    %14 = vector.load %arg0[%c4_23, %c1_24, %c1_25, %c0_26] : memref<8x9x9x16xbf16, #tpu.memory_space<vmem>>, vector<2x8x8x16xbf16>
    %15 = vector.shape_cast %14 : vector<2x8x8x16xbf16> to vector<128x16xbf16>
    %c6_27 = arith.constant 6 : index
    %c1_28 = arith.constant 1 : index
    %c1_29 = arith.constant 1 : index
    %c0_30 = arith.constant 0 : index
    %16 = vector.load %arg0[%c6_27, %c1_28, %c1_29, %c0_30] : memref<8x9x9x16xbf16, #tpu.memory_space<vmem>>, vector<2x8x8x16xbf16>
    %17 = vector.shape_cast %16 : vector<2x8x8x16xbf16> to vector<128x16xbf16>
    %c0_31 = arith.constant 0 : index
    %c0_32 = arith.constant 0 : index
    %18 = vector.load %arg2[%c0_31, %c0_32] : memref<144x32xbf16, #tpu.memory_space<vmem>>, vector<16x32xbf16>
    %cst = arith.constant dense<0.000000e+00> : vector<128x32xf32>
    %19 = tpu.matmul %1, %18, %cst {dimension_numbers = #tpu.dot_dimension_numbers<[1], [0], [0], [1], [0, 0, 1, 1], [], []>} : vector<128x16xbf16>, vector<16x32xbf16>, vector<128x32xf32> -> vector<128x32xf32>
    %c16 = arith.constant 16 : index
    %c0_33 = arith.constant 0 : index
    %20 = vector.load %arg2[%c16, %c0_33] : memref<144x32xbf16, #tpu.memory_space<vmem>>, vector<16x32xbf16>
    %cst_34 = arith.constant dense<0.000000e+00> : vector<128x32xf32>
    %21 = tpu.matmul %3, %20, %cst_34 {dimension_numbers = #tpu.dot_dimension_numbers<[1], [0], [0], [1], [0, 0, 1, 1], [], []>} : vector<128x16xbf16>, vector<16x32xbf16>, vector<128x32xf32> -> vector<128x32xf32>
    %22 = arith.addf %19, %21 : vector<128x32xf32>
    %c32 = arith.constant 32 : index
    %c0_35 = arith.constant 0 : index
    %23 = vector.load %arg2[%c32, %c0_35] : memref<144x32xbf16, #tpu.memory_space<vmem>>, vector<16x32xbf16>
    %cst_36 = arith.constant dense<0.000000e+00> : vector<128x32xf32>
    %24 = tpu.matmul %5, %23, %cst_36 {dimension_numbers = #tpu.dot_dimension_numbers<[1], [0], [0], [1], [0, 0, 1, 1], [], []>} : vector<128x16xbf16>, vector<16x32xbf16>, vector<128x32xf32> -> vector<128x32xf32>
    %25 = arith.addf %22, %24 : vector<128x32xf32>
    %c48 = arith.constant 48 : index
    %c0_37 = arith.constant 0 : index
    %26 = vector.load %arg2[%c48, %c0_37] : memref<144x32xbf16, #tpu.memory_space<vmem>>, vector<16x32xbf16>
    %cst_38 = arith.constant dense<0.000000e+00> : vector<128x32xf32>
    %27 = tpu.matmul %7, %26, %cst_38 {dimension_numbers = #tpu.dot_dimension_numbers<[1], [0], [0], [1], [0, 0, 1, 1], [], []>} : vector<128x16xbf16>, vector<16x32xbf16>, vector<128x32xf32> -> vector<128x32xf32>
    %28 = arith.addf %25, %27 : vector<128x32xf32>
    %c64 = arith.constant 64 : index
    %c0_39 = arith.constant 0 : index
    %29 = vector.load %arg2[%c64, %c0_39] : memref<144x32xbf16, #tpu.memory_space<vmem>>, vector<16x32xbf16>
    %cst_40 = arith.constant dense<0.000000e+00> : vector<128x32xf32>
    %30 = tpu.matmul %9, %29, %cst_40 {dimension_numbers = #tpu.dot_dimension_numbers<[1], [0], [0], [1], [0, 0, 1, 1], [], []>} : vector<128x16xbf16>, vector<16x32xbf16>, vector<128x32xf32> -> vector<128x32xf32>
    %31 = arith.addf %28, %30 : vector<128x32xf32>
    %c80 = arith.constant 80 : index
    %c0_41 = arith.constant 0 : index
    %32 = vector.load %arg2[%c80, %c0_41] : memref<144x32xbf16, #tpu.memory_space<vmem>>, vector<16x32xbf16>
    %cst_42 = arith.constant dense<0.000000e+00> : vector<128x32xf32>
    %33 = tpu.matmul %11, %32, %cst_42 {dimension_numbers = #tpu.dot_dimension_numbers<[1], [0], [0], [1], [0, 0, 1, 1], [], []>} : vector<128x16xbf16>, vector<16x32xbf16>, vector<128x32xf32> -> vector<128x32xf32>
    %34 = arith.addf %31, %33 : vector<128x32xf32>
    %c96 = arith.constant 96 : index
    %c0_43 = arith.constant 0 : index
    %35 = vector.load %arg2[%c96, %c0_43] : memref<144x32xbf16, #tpu.memory_space<vmem>>, vector<16x32xbf16>
    %cst_44 = arith.constant dense<0.000000e+00> : vector<128x32xf32>
    %36 = tpu.matmul %13, %35, %cst_44 {dimension_numbers = #tpu.dot_dimension_numbers<[1], [0], [0], [1], [0, 0, 1, 1], [], []>} : vector<128x16xbf16>, vector<16x32xbf16>, vector<128x32xf32> -> vector<128x32xf32>
    %37 = arith.addf %34, %36 : vector<128x32xf32>
    %c112 = arith.constant 112 : index
    %c0_45 = arith.constant 0 : index
    %38 = vector.load %arg2[%c112, %c0_45] : memref<144x32xbf16, #tpu.memory_space<vmem>>, vector<16x32xbf16>
    %cst_46 = arith.constant dense<0.000000e+00> : vector<128x32xf32>
    %39 = tpu.matmul %15, %38, %cst_46 {dimension_numbers = #tpu.dot_dimension_numbers<[1], [0], [0], [1], [0, 0, 1, 1], [], []>} : vector<128x16xbf16>, vector<16x32xbf16>, vector<128x32xf32> -> vector<128x32xf32>
    %40 = arith.addf %37, %39 : vector<128x32xf32>
    %c128 = arith.constant 128 : index
    %c0_47 = arith.constant 0 : index
    %41 = vector.load %arg2[%c128, %c0_47] : memref<144x32xbf16, #tpu.memory_space<vmem>>, vector<16x32xbf16>
    %cst_48 = arith.constant dense<0.000000e+00> : vector<128x32xf32>
    %42 = tpu.matmul %17, %41, %cst_48 {dimension_numbers = #tpu.dot_dimension_numbers<[1], [0], [0], [1], [0, 0, 1, 1], [], []>} : vector<128x16xbf16>, vector<16x32xbf16>, vector<128x32xf32> -> vector<128x32xf32>
    %43 = arith.addf %40, %42 : vector<128x32xf32>
    %cst_49 = arith.constant dense<0.000000e+00> : vector<32xf32>
    %44 = vector.multi_reduction <add>, %43, %cst_49 [0] : vector<128x32xf32> to vector<32xf32>
    %45 = vector.shape_cast %44 : vector<32xf32> to vector<1x32xf32>
    %46 = arith.mulf %43, %43 : vector<128x32xf32>
    %cst_50 = arith.constant dense<0.000000e+00> : vector<32xf32>
    %47 = vector.multi_reduction <add>, %46, %cst_50 [0] : vector<128x32xf32> to vector<32xf32>
    %48 = vector.shape_cast %47 : vector<32xf32> to vector<1x32xf32>
    %cst_51 = arith.constant 7.812500e-03 : f32
    %49 = vector.broadcast %cst_51 : f32 to vector<1x32xf32>
    %50 = arith.mulf %45, %49 : vector<1x32xf32>
    %cst_52 = arith.constant 7.812500e-03 : f32
    %51 = vector.broadcast %cst_52 : f32 to vector<1x32xf32>
    %52 = arith.mulf %48, %51 : vector<1x32xf32>
    %53 = arith.mulf %50, %50 : vector<1x32xf32>
    %54 = arith.subf %52, %53 : vector<1x32xf32>
    %c0_53 = arith.constant 0 : index
    %c0_54 = arith.constant 0 : index
    %55 = vector.load %arg3[%c0_53, %c0_54] : memref<1x32xf32, #tpu.memory_space<vmem>>, vector<1x32xf32>
    %cst_55 = arith.constant 9.99999974E-6 : f32
    %56 = vector.broadcast %cst_55 : f32 to vector<1x32xf32>
    %57 = arith.addf %54, %56 : vector<1x32xf32>
    %58 = math.rsqrt %57 : vector<1x32xf32>
    %59 = arith.mulf %55, %58 : vector<1x32xf32>
    %c0_56 = arith.constant 0 : index
    %c0_57 = arith.constant 0 : index
    %60 = vector.load %arg4[%c0_56, %c0_57] : memref<1x32xf32, #tpu.memory_space<vmem>>, vector<1x32xf32>
    %61 = arith.mulf %50, %59 : vector<1x32xf32>
    %62 = arith.subf %60, %61 : vector<1x32xf32>
    %63 = vector.broadcast %59 : vector<1x32xf32> to vector<128x32xf32>
    %64 = arith.mulf %43, %63 : vector<128x32xf32>
    %65 = vector.broadcast %62 : vector<1x32xf32> to vector<128x32xf32>
    %66 = arith.addf %64, %65 : vector<128x32xf32>
    %cst_58 = arith.constant 0.000000e+00 : f32
    %67 = vector.broadcast %cst_58 : f32 to vector<128x32xf32>
    %68 = arith.maximumf %66, %67 : vector<128x32xf32>
    %cst_59 = arith.constant 0.000000e+00 : f32
    %69 = vector.broadcast %cst_59 : f32 to vector<2x10x10x32xf32>
    %c0_60 = arith.constant 0 : index
    %c0_61 = arith.constant 0 : index
    %c0_62 = arith.constant 0 : index
    %c0_63 = arith.constant 0 : index
    %70 = vector.load %arg9[%c0_60, %c0_61, %c0_62, %c0_63] : memref<2x10x10x32xf32, #tpu.memory_space<vmem>>, vector<2x10x10x32xf32>
    tpu.vector_store %arg9[%c0_60, %c0_61, %c0_62, %c0_63], %69 {strides = array<i32>} : memref<2x10x10x32xf32, #tpu.memory_space<vmem>>, vector<2x10x10x32xf32>,
    %71 = vector.shape_cast %68 : vector<128x32xf32> to vector<2x8x8x32xf32>
    %c0_64 = arith.constant 0 : index
    %c1_65 = arith.constant 1 : index
    %c1_66 = arith.constant 1 : index
    %c0_67 = arith.constant 0 : index
    %72 = vector.load %arg9[%c0_64, %c1_65, %c1_66, %c0_67] : memref<2x10x10x32xf32, #tpu.memory_space<vmem>>, vector<2x8x8x32xf32>
    tpu.vector_store %arg9[%c0_64, %c1_65, %c1_66, %c0_67], %71 {strides = array<i32>} : memref<2x10x10x32xf32, #tpu.memory_space<vmem>>, vector<2x8x8x32xf32>,
    %c0_68 = arith.constant 0 : index
    %c0_69 = arith.constant 0 : index
    %c0_70 = arith.constant 0 : index
    %c0_71 = arith.constant 0 : index
    %73 = vector.load %arg9[%c0_68, %c0_69, %c0_70, %c0_71] : memref<2x10x10x32xf32, #tpu.memory_space<vmem>>, vector<2x8x8x32xf32>
    %74 = vector.shape_cast %73 : vector<2x8x8x32xf32> to vector<128x32xf32>
    %c0_72 = arith.constant 0 : index
    %c0_73 = arith.constant 0 : index
    %c1_74 = arith.constant 1 : index
    %c0_75 = arith.constant 0 : index
    %75 = vector.load %arg9[%c0_72, %c0_73, %c1_74, %c0_75] : memref<2x10x10x32xf32, #tpu.memory_space<vmem>>, vector<2x8x8x32xf32>
    %76 = vector.shape_cast %75 : vector<2x8x8x32xf32> to vector<128x32xf32>
    %c0_76 = arith.constant 0 : index
    %c0_77 = arith.constant 0 : index
    %c2_78 = arith.constant 2 : index
    %c0_79 = arith.constant 0 : index
    %77 = vector.load %arg9[%c0_76, %c0_77, %c2_78, %c0_79] : memref<2x10x10x32xf32, #tpu.memory_space<vmem>>, vector<2x8x8x32xf32>
    %78 = vector.shape_cast %77 : vector<2x8x8x32xf32> to vector<128x32xf32>
    %c0_80 = arith.constant 0 : index
    %c1_81 = arith.constant 1 : index
    %c0_82 = arith.constant 0 : index
    %c0_83 = arith.constant 0 : index
    %79 = vector.load %arg9[%c0_80, %c1_81, %c0_82, %c0_83] : memref<2x10x10x32xf32, #tpu.memory_space<vmem>>, vector<2x8x8x32xf32>
    %80 = vector.shape_cast %79 : vector<2x8x8x32xf32> to vector<128x32xf32>
    %c0_84 = arith.constant 0 : index
    %c1_85 = arith.constant 1 : index
    %c1_86 = arith.constant 1 : index
    %c0_87 = arith.constant 0 : index
    %81 = vector.load %arg9[%c0_84, %c1_85, %c1_86, %c0_87] : memref<2x10x10x32xf32, #tpu.memory_space<vmem>>, vector<2x8x8x32xf32>
    %82 = vector.shape_cast %81 : vector<2x8x8x32xf32> to vector<128x32xf32>
    %c0_88 = arith.constant 0 : index
    %c1_89 = arith.constant 1 : index
    %c2_90 = arith.constant 2 : index
    %c0_91 = arith.constant 0 : index
    %83 = vector.load %arg9[%c0_88, %c1_89, %c2_90, %c0_91] : memref<2x10x10x32xf32, #tpu.memory_space<vmem>>, vector<2x8x8x32xf32>
    %84 = vector.shape_cast %83 : vector<2x8x8x32xf32> to vector<128x32xf32>
    %c0_92 = arith.constant 0 : index
    %c2_93 = arith.constant 2 : index
    %c0_94 = arith.constant 0 : index
    %c0_95 = arith.constant 0 : index
    %85 = vector.load %arg9[%c0_92, %c2_93, %c0_94, %c0_95] : memref<2x10x10x32xf32, #tpu.memory_space<vmem>>, vector<2x8x8x32xf32>
    %86 = vector.shape_cast %85 : vector<2x8x8x32xf32> to vector<128x32xf32>
    %c0_96 = arith.constant 0 : index
    %c2_97 = arith.constant 2 : index
    %c1_98 = arith.constant 1 : index
    %c0_99 = arith.constant 0 : index
    %87 = vector.load %arg9[%c0_96, %c2_97, %c1_98, %c0_99] : memref<2x10x10x32xf32, #tpu.memory_space<vmem>>, vector<2x8x8x32xf32>
    %88 = vector.shape_cast %87 : vector<2x8x8x32xf32> to vector<128x32xf32>
    %c0_100 = arith.constant 0 : index
    %c2_101 = arith.constant 2 : index
    %c2_102 = arith.constant 2 : index
    %c0_103 = arith.constant 0 : index
    %89 = vector.load %arg9[%c0_100, %c2_101, %c2_102, %c0_103] : memref<2x10x10x32xf32, #tpu.memory_space<vmem>>, vector<2x8x8x32xf32>
    %90 = vector.shape_cast %89 : vector<2x8x8x32xf32> to vector<128x32xf32>
    %91 = arith.truncf %74 : vector<128x32xf32> to vector<128x32xbf16>
    %c0_104 = arith.constant 0 : index
    %c0_105 = arith.constant 0 : index
    %92 = vector.load %arg5[%c0_104, %c0_105] : memref<288x32xbf16, #tpu.memory_space<vmem>>, vector<32x32xbf16>
    %cst_106 = arith.constant dense<0.000000e+00> : vector<128x32xf32>
    %93 = tpu.matmul %91, %92, %cst_106 {dimension_numbers = #tpu.dot_dimension_numbers<[1], [0], [0], [1], [0, 0, 1, 1], [], []>} : vector<128x32xbf16>, vector<32x32xbf16>, vector<128x32xf32> -> vector<128x32xf32>
    %94 = arith.truncf %76 : vector<128x32xf32> to vector<128x32xbf16>
    %c32_107 = arith.constant 32 : index
    %c0_108 = arith.constant 0 : index
    %95 = vector.load %arg5[%c32_107, %c0_108] : memref<288x32xbf16, #tpu.memory_space<vmem>>, vector<32x32xbf16>
    %cst_109 = arith.constant dense<0.000000e+00> : vector<128x32xf32>
    %96 = tpu.matmul %94, %95, %cst_109 {dimension_numbers = #tpu.dot_dimension_numbers<[1], [0], [0], [1], [0, 0, 1, 1], [], []>} : vector<128x32xbf16>, vector<32x32xbf16>, vector<128x32xf32> -> vector<128x32xf32>
    %97 = arith.addf %93, %96 : vector<128x32xf32>
    %98 = arith.truncf %78 : vector<128x32xf32> to vector<128x32xbf16>
    %c64_110 = arith.constant 64 : index
    %c0_111 = arith.constant 0 : index
    %99 = vector.load %arg5[%c64_110, %c0_111] : memref<288x32xbf16, #tpu.memory_space<vmem>>, vector<32x32xbf16>
    %cst_112 = arith.constant dense<0.000000e+00> : vector<128x32xf32>
    %100 = tpu.matmul %98, %99, %cst_112 {dimension_numbers = #tpu.dot_dimension_numbers<[1], [0], [0], [1], [0, 0, 1, 1], [], []>} : vector<128x32xbf16>, vector<32x32xbf16>, vector<128x32xf32> -> vector<128x32xf32>
    %101 = arith.addf %97, %100 : vector<128x32xf32>
    %102 = arith.truncf %80 : vector<128x32xf32> to vector<128x32xbf16>
    %c96_113 = arith.constant 96 : index
    %c0_114 = arith.constant 0 : index
    %103 = vector.load %arg5[%c96_113, %c0_114] : memref<288x32xbf16, #tpu.memory_space<vmem>>, vector<32x32xbf16>
    %cst_115 = arith.constant dense<0.000000e+00> : vector<128x32xf32>
    %104 = tpu.matmul %102, %103, %cst_115 {dimension_numbers = #tpu.dot_dimension_numbers<[1], [0], [0], [1], [0, 0, 1, 1], [], []>} : vector<128x32xbf16>, vector<32x32xbf16>, vector<128x32xf32> -> vector<128x32xf32>
    %105 = arith.addf %101, %104 : vector<128x32xf32>
    %106 = arith.truncf %82 : vector<128x32xf32> to vector<128x32xbf16>
    %c128_116 = arith.constant 128 : index
    %c0_117 = arith.constant 0 : index
    %107 = vector.load %arg5[%c128_116, %c0_117] : memref<288x32xbf16, #tpu.memory_space<vmem>>, vector<32x32xbf16>
    %cst_118 = arith.constant dense<0.000000e+00> : vector<128x32xf32>
    %108 = tpu.matmul %106, %107, %cst_118 {dimension_numbers = #tpu.dot_dimension_numbers<[1], [0], [0], [1], [0, 0, 1, 1], [], []>} : vector<128x32xbf16>, vector<32x32xbf16>, vector<128x32xf32> -> vector<128x32xf32>
    %109 = arith.addf %105, %108 : vector<128x32xf32>
    %110 = arith.truncf %84 : vector<128x32xf32> to vector<128x32xbf16>
    %c160 = arith.constant 160 : index
    %c0_119 = arith.constant 0 : index
    %111 = vector.load %arg5[%c160, %c0_119] : memref<288x32xbf16, #tpu.memory_space<vmem>>, vector<32x32xbf16>
    %cst_120 = arith.constant dense<0.000000e+00> : vector<128x32xf32>
    %112 = tpu.matmul %110, %111, %cst_120 {dimension_numbers = #tpu.dot_dimension_numbers<[1], [0], [0], [1], [0, 0, 1, 1], [], []>} : vector<128x32xbf16>, vector<32x32xbf16>, vector<128x32xf32> -> vector<128x32xf32>
    %113 = arith.addf %109, %112 : vector<128x32xf32>
    %114 = arith.truncf %86 : vector<128x32xf32> to vector<128x32xbf16>
    %c192 = arith.constant 192 : index
    %c0_121 = arith.constant 0 : index
    %115 = vector.load %arg5[%c192, %c0_121] : memref<288x32xbf16, #tpu.memory_space<vmem>>, vector<32x32xbf16>
    %cst_122 = arith.constant dense<0.000000e+00> : vector<128x32xf32>
    %116 = tpu.matmul %114, %115, %cst_122 {dimension_numbers = #tpu.dot_dimension_numbers<[1], [0], [0], [1], [0, 0, 1, 1], [], []>} : vector<128x32xbf16>, vector<32x32xbf16>, vector<128x32xf32> -> vector<128x32xf32>
    %117 = arith.addf %113, %116 : vector<128x32xf32>
    %118 = arith.truncf %88 : vector<128x32xf32> to vector<128x32xbf16>
    %c224 = arith.constant 224 : index
    %c0_123 = arith.constant 0 : index
    %119 = vector.load %arg5[%c224, %c0_123] : memref<288x32xbf16, #tpu.memory_space<vmem>>, vector<32x32xbf16>
    %cst_124 = arith.constant dense<0.000000e+00> : vector<128x32xf32>
    %120 = tpu.matmul %118, %119, %cst_124 {dimension_numbers = #tpu.dot_dimension_numbers<[1], [0], [0], [1], [0, 0, 1, 1], [], []>} : vector<128x32xbf16>, vector<32x32xbf16>, vector<128x32xf32> -> vector<128x32xf32>
    %121 = arith.addf %117, %120 : vector<128x32xf32>
    %122 = arith.truncf %90 : vector<128x32xf32> to vector<128x32xbf16>
    %c256 = arith.constant 256 : index
    %c0_125 = arith.constant 0 : index
    %123 = vector.load %arg5[%c256, %c0_125] : memref<288x32xbf16, #tpu.memory_space<vmem>>, vector<32x32xbf16>
    %cst_126 = arith.constant dense<0.000000e+00> : vector<128x32xf32>
    %124 = tpu.matmul %122, %123, %cst_126 {dimension_numbers = #tpu.dot_dimension_numbers<[1], [0], [0], [1], [0, 0, 1, 1], [], []>} : vector<128x32xbf16>, vector<32x32xbf16>, vector<128x32xf32> -> vector<128x32xf32>
    %125 = arith.addf %121, %124 : vector<128x32xf32>
    %cst_127 = arith.constant dense<0.000000e+00> : vector<32xf32>
    %126 = vector.multi_reduction <add>, %125, %cst_127 [0] : vector<128x32xf32> to vector<32xf32>
    %127 = vector.shape_cast %126 : vector<32xf32> to vector<1x32xf32>
    %128 = arith.mulf %125, %125 : vector<128x32xf32>
    %cst_128 = arith.constant dense<0.000000e+00> : vector<32xf32>
    %129 = vector.multi_reduction <add>, %128, %cst_128 [0] : vector<128x32xf32> to vector<32xf32>
    %130 = vector.shape_cast %129 : vector<32xf32> to vector<1x32xf32>
    %cst_129 = arith.constant 7.812500e-03 : f32
    %131 = vector.broadcast %cst_129 : f32 to vector<1x32xf32>
    %132 = arith.mulf %127, %131 : vector<1x32xf32>
    %cst_130 = arith.constant 7.812500e-03 : f32
    %133 = vector.broadcast %cst_130 : f32 to vector<1x32xf32>
    %134 = arith.mulf %130, %133 : vector<1x32xf32>
    %135 = arith.mulf %132, %132 : vector<1x32xf32>
    %136 = arith.subf %134, %135 : vector<1x32xf32>
    %c0_131 = arith.constant 0 : index
    %c0_132 = arith.constant 0 : index
    %137 = vector.load %arg6[%c0_131, %c0_132] : memref<1x32xf32, #tpu.memory_space<vmem>>, vector<1x32xf32>
    %cst_133 = arith.constant 9.99999974E-6 : f32
    %138 = vector.broadcast %cst_133 : f32 to vector<1x32xf32>
    %139 = arith.addf %136, %138 : vector<1x32xf32>
    %140 = math.rsqrt %139 : vector<1x32xf32>
    %141 = arith.mulf %137, %140 : vector<1x32xf32>
    %c0_134 = arith.constant 0 : index
    %c0_135 = arith.constant 0 : index
    %142 = vector.load %arg7[%c0_134, %c0_135] : memref<1x32xf32, #tpu.memory_space<vmem>>, vector<1x32xf32>
    %143 = arith.mulf %132, %141 : vector<1x32xf32>
    %144 = arith.subf %142, %143 : vector<1x32xf32>
    %145 = vector.broadcast %141 : vector<1x32xf32> to vector<128x32xf32>
    %146 = arith.mulf %125, %145 : vector<128x32xf32>
    %147 = vector.broadcast %144 : vector<1x32xf32> to vector<128x32xf32>
    %148 = arith.addf %146, %147 : vector<128x32xf32>
    %149 = vector.extract_strided_slice %148 {offsets = [0, 8], sizes = [128, 16], strides = [1, 1]} : vector<128x32xf32> to vector<128x16xf32>
    %c0_136 = arith.constant 0 : index
    %c0_137 = arith.constant 0 : index
    %150 = vector.load %arg1[%c0_136, %c0_137] : memref<128x16xf32, #tpu.memory_space<vmem>>, vector<128x16xf32>
    %151 = arith.addf %149, %150 : vector<128x16xf32>
    %cst_138 = arith.constant 0.000000e+00 : f32
    %152 = vector.broadcast %cst_138 : f32 to vector<128x32xf32>
    %153 = arith.maximumf %148, %152 : vector<128x32xf32>
    %c0_139 = arith.constant 0 : index
    %c0_140 = arith.constant 0 : index
    %154 = vector.load %arg8[%c0_139, %c0_140] : memref<128x32xf32, #tpu.memory_space<vmem>>, vector<128x32xf32>
    tpu.vector_store %arg8[%c0_139, %c0_140], %153 {strides = array<i32>} : memref<128x32xf32, #tpu.memory_space<vmem>>, vector<128x32xf32>,
    %cst_141 = arith.constant 0.000000e+00 : f32
    %155 = vector.broadcast %cst_141 : f32 to vector<128x16xf32>
    %156 = arith.maximumf %151, %155 : vector<128x16xf32>
    %c0_142 = arith.constant 0 : index
    %c8 = arith.constant 8 : index
    %157 = vector.load %arg8[%c0_142, %c8] : memref<128x32xf32, #tpu.memory_space<vmem>>, vector<128x16xf32>
    tpu.vector_store %arg8[%c0_142, %c8], %156 {strides = array<i32>} : memref<128x32xf32, #tpu.memory_space<vmem>>, vector<128x16xf32>,
    return
  }
}

</mosaic_0001>

<bundles_post_ra>
// kernel: down_sampling_block.1
= control target key start
LH: loop header
LB: loop body
LE: loop exit
PB: predicated region body
PF: predicated region fallthrough
CT: control target
= control target key end

     0   :  { %vm1610_vm0 = vcmask 130048   ;;  %vm81_vm1 = vsmask.f32 3328  ;;  %vm82_vm2 = vsmask.f32 7440  ;;  %s7464_s0 = inlined_call_operand.vmem [shape: bf16[8,9,9,16], index: 0, kind: input, shape index: {}]   ;;  %s7465_s1 = inlined_call_operand.vmem [shape: f32[128,16], index: 1, kind: input, shape index: {}]   ;;  %s7466_s2 = inlined_call_operand.vmem [shape: bf16[144,32], index: 2, kind: input, shape index: {}]   ;;  %s7467_s3 = inlined_call_operand.vmem [shape: f32[1,32], index: 3, kind: input, shape index: {}]   ;;  %s7468_s4 = inlined_call_operand.vmem [shape: f32[1,32], index: 4, kind: input, shape index: {}]   ;;  %s7469_s5 = inlined_call_operand.vmem [shape: bf16[288,32], index: 5, kind: input, shape index: {}]   ;;  %s7470_s6 = inlined_call_operand.vmem [shape: f32[1,32], index: 6, kind: input, shape index: {}]   ;;  %s7471_s7 = inlined_call_operand.vmem [shape: f32[1,32], index: 7, kind: input, shape index: {}]   ;;  %s7472_s8 = inlined_call_operand.hbm [shape: f32[128,32], index: 8, kind: output, shape index: {}]  }
   0x1   :  { %v4926_v0 = vld [vmem:[%s7466_s2] sm:$0xff]  ;;  %v4584_v1 = vld [vmem:[%s7464_s0 + $0x1f8] sm:$0xf]  ;;  %v4927_v4 = vld [vmem:[%s7466_s2 + $0x8] sm:$0xff] }
   0x2   :  { %v4906_v2 = vld [vmem:[%s7464_s0 + $0x1fc] sm:$0xf0]  ;;  %v4394_v5 = vld [vmem:[%s7464_s0 + $0x168] sm:$0xf]  ;;  %v4395_v6 = vld [vmem:[%s7464_s0 + $0x16c] sm:$0x1]  ;;  %4954 = vmatpush.bf16.msra.mxu3 %v4926_v0  ;;  %1761 = vmatpush.bf16.msra.mxu1 %v4926_v0 }
   0x3   :  { %v4585_v3 = vor.u32 %v4906_v2, %v4584_v1  ;;  %v4396_v7 = vld [vmem:[%s7464_s0 + $0x170] sm:$0xf]  ;;  %v4397_v8 = vld [vmem:[%s7464_s0 + $0x174] sm:$0x1]  ;;  %4953 = vmatpush.bf16.msra.mxu2 %v4927_v4  ;;  %1642 = vmatpush.bf16.msra.mxu0 %v4927_v4  ;;  %v197_v9 = vshrl.u32 %v4394_v5, 16  ;;  %v200_v10 = vshll.u32 %v4394_v5, 16  ;;  %vm5086_vm3 = vmor %vm81_vm1, %vm82_vm2 }
   0x4   :  { %v206_v11 = vshll.u32 %v4395_v6, 16  ;;  %v4928_v12 = vld [vmem:[%s7466_s2 + $0x10] sm:$0xff]  ;;  %v211_v13 = vshrl.u32 %v4396_v7, 16  ;;  %v214_v14 = vshll.u32 %v4396_v7, 16  ;;  %v220_v15 = vshll.u32 %v4397_v8, 16  ;;  %v4929_v17 = vld [vmem:[%s7466_s2 + $0x18] sm:$0xff] }
   0x5   :  { %v4378_v16 = vld [vmem:[%s7464_s0 + $0x120] sm:$0xf]  ;;  %4606 = vmatmul.msk.bf16.vlgmr.msra.gmra.mxu3 %vm1610_vm0, %v4585_v3  ;;  %v199_v18 = vrot.slane %v197_v9, 4  ;;  %v202_v19 = vrot.slane %v200_v10, 5  ;;  %v4379_v21 = vld [vmem:[%s7464_s0 + $0x124] sm:$0x1] }
   0x6   :  { %v208_v20 = vrot.slane %v206_v11, 5  ;;  %v85_v22 = vshrl.u32 %v4378_v16, 16  ;;  %v213_v23 = vrot.slane %v211_v13, 4  ;;  %v216_v24 = vrot.slane %v214_v14, 5  ;;  %v4380_v26 = vld [vmem:[%s7464_s0 + $0x128] sm:$0xf]  ;;  %2003 = vmatpush.bf16.msrb.mxu3 %v4929_v17 }
   0x7   :  { %1866 = vmatpush.bf16.msrb.mxu2 %v4928_v12  ;;  %v222_v25 = vrot.slane %v220_v15, 5  ;;  %v88_v27 = vshll.u32 %v4378_v16, 16  ;;  %v203_v28 = vor.u32 %v202_v19, %v199_v18  ;;  %v4381_v29 = vld [vmem:[%s7464_s0 + $0x12c] sm:$0x1]  ;;  %v94_v31 = vshll.u32 %v4379_v21, 16  ;;  %v4930_v33 = vld [vmem:[%s7466_s2 + $0x20] sm:$0xff] }
   0x8   :  { %v87_v30 = vrot.slane %v85_v22, 4  ;;  %v99_v32 = vshrl.u32 %v4380_v26, 16  ;;  %v217_v35 = vor.u32 %v216_v24, %v213_v23  ;;  %v102_v37 = vshll.u32 %v4380_v26, 16  ;;  %v4568_v39 = vld [vmem:[%s7464_s0 + $0x1b0] sm:$0xf]  ;;  %2124 = vmatpush.bf16.msrb.mxu0 %v4930_v33 }
   0x9   :  { %v90_v36 = vrot.slane %v88_v27, 5  ;;  %v108_v38 = vshll.u32 %v4381_v29, 16  ;;  %v204_v40 = vrot.slane %v203_v28, 4  ;;  %v96_v41 = vrot.slane %v94_v31, 5  ;;  %v4902_v43 = vld [vmem:[%s7464_s0 + $0x1b4] sm:$0xf0] }
   0xa   :  { %v101_v42 = vrot.slane %v99_v32, 4  ;;  %v218_v44 = vrot.slane %v217_v35, 4  ;;  %v104_v46 = vrot.slane %v102_v37, 5  ;;  %v4588_v48 = vld [vmem:[%s7464_s0 + $0x208] sm:$0xf]  ;;  %v4569_v50 = vor.u32 %v4902_v43, %v4568_v39 }
   0xb   :  { %v91_v45 = vor.u32 %v90_v36, %v87_v30  ;;  %v110_v47 = vrot.slane %v108_v38, 5  ;;  %v209_v49 = vsel %vm5086_vm3, %v204_v40, %v208_v20  ;;  %v4907_v51 = vld [vmem:[%s7464_s0 + $0x20c] sm:$0xf0]  ;;  %v4398_v52 = vld [vmem:[%s7464_s0 + $0x178] sm:$0xf] }
   0xc   :  { %v4399_v53 = vld [vmem:[%s7464_s0 + $0x17c] sm:$0x1]  ;;  %v223_v54 = vsel %vm5086_vm3, %v218_v44, %v222_v25  ;;  %v1588_v55 = vunpack.c.l.b16 %v209_v49  ;;  %v105_v57 = vor.u32 %v104_v46, %v101_v42  ;;  %v4400_v58 = vld [vmem:[%s7464_s0 + $0x180] sm:$0xf]  ;;  %4602 = vmatmul.msk.bf16.vlgmr.msra.gmra.mxu1 %vm1610_vm0, %v4569_v50  ;;  %v4589_v60 = vor.u32 %v4907_v51, %v4588_v48  ;;  %v4401_v61 = vld [vmem:[%s7464_s0 + $0x184] sm:$0x1] }
   0xd   :  { %v92_v56 = vrot.slane %v91_v45, 4  ;;  %v1589_v59 = vunpack.c.l.b16 %v223_v54  ;;  %v225_v62 = vshrl.u32 %v4398_v52, 16  ;;  %v228_v63 = vshll.u32 %v4398_v52, 16  ;;  %v4382_v4 = vld [vmem:[%s7464_s0 + $0x130] sm:$0xf] }
   0xe   :  { %v106_v1 = vrot.slane %v105_v57, 4  ;;  %v234_v2 = vshll.u32 %v4399_v53, 16  ;;  %v239_v3 = vshrl.u32 %v4400_v58, 16  ;;  %v4383_v9 = vld [vmem:[%s7464_s0 + $0x134] sm:$0x1]  ;;  %v242_v14 = vshll.u32 %v4400_v58, 16 }
   0xf   :  { %v97_v0 = vsel %vm5086_vm3, %v92_v56, %v96_v41  ;;  %v1600_v5 = vpack.c.b16 %v1589_v59, %v1588_v55  ;;  %v227_v7 = vrot.slane %v225_v62, 4  ;;  %v230_v8 = vrot.slane %v228_v63, 5  ;;  %v4384_v10 = vld [vmem:[%s7464_s0 + $0x138] sm:$0xf]  ;;  %v4385_v18 = vld [vmem:[%s7464_s0 + $0x13c] sm:$0x1] }
  0x10   :  { %v1580_v6 = vunpack.c.l.b16 %v97_v0  ;;  %v111_v11 = vsel %vm5086_vm3, %v106_v1, %v110_v47  ;;  %v236_v12 = vrot.slane %v234_v2, 5  ;;  %v241_v13 = vrot.slane %v239_v3, 4  ;;  %v4572_v24 = vld [vmem:[%s7464_s0 + $0x1c0] sm:$0xf]  ;;  %v4903_v28 = vld [vmem:[%s7464_s0 + $0x1c4] sm:$0xf0] }
  0x11   :  { %4562 = vmatmul.msk.bf16.vlgmr.msra.gmra.mxu2 %vm1610_vm0, %v1600_v5  ;;  %v1581_v15 = vunpack.c.l.b16 %v111_v11  ;;  %v231_v16 = vor.u32 %v230_v8, %v227_v7  ;;  %v248_v17 = vshll.u32 %v4401_v61, 16  ;;  %v113_v19 = vshrl.u32 %v4382_v4, 16  ;;  %v4402_v29 = vld [vmem:[%s7464_s0 + $0x188] sm:$0xf]  ;;  %v4403_v35 = vld [vmem:[%s7464_s0 + $0x18c] sm:$0x1] }
  0x12   :  { %v244_v20 = vrot.slane %v242_v14, 5  ;;  %v116_v21 = vshll.u32 %v4382_v4, 16  ;;  %v122_v22 = vshll.u32 %v4383_v9, 16  ;;  %v127_v23 = vshrl.u32 %v4384_v10, 16  ;;  %v4404_v40 = vld [vmem:[%s7464_s0 + $0x190] sm:$0xf] }
  0x13   :  { %v1596_v25 = vpack.c.b16 %v1581_v15, %v1580_v6  ;;  %v232_v26 = vrot.slane %v231_v16, 4  ;;  %v115_v27 = vrot.slane %v113_v19, 4  ;;  %v250_v31 = vrot.slane %v248_v17, 5  ;;  %v4405_v51 = vld [vmem:[%s7464_s0 + $0x194] sm:$0x1] }
  0x14   :  { %v245_v30 = vor.u32 %v244_v20, %v241_v13  ;;  %v118_v32 = vrot.slane %v116_v21, 5  ;;  %v124_v33 = vrot.slane %v122_v22, 5  ;;  %v129_v37 = vrot.slane %v127_v23, 4  ;;  %v4386_v58 = vld [vmem:[%s7464_s0 + $0x140] sm:$0xf] }
  0x15   :  { %4558 = vmatmul.msk.bf16.vlgmr.msra.gmra.mxu0 %vm1610_vm0, %v1596_v25  ;;  %4607 = vmatmul.msk.bf16.gmra.mxu3 %vm1610_vm0, %v4589_v60  ;;  %v237_v36 = vsel %vm5086_vm3, %v232_v26, %v236_v12  ;;  %v130_v38 = vshll.u32 %v4384_v10, 16  ;;  %v136_v39 = vshll.u32 %v4385_v18, 16  ;;  %v4573_v44 = vor.u32 %v4903_v28, %v4572_v24  ;;  %v4387_v59 = vld [vmem:[%s7464_s0 + $0x144] sm:$0x1]  ;;  %v4388_v0 = vld [vmem:[%s7464_s0 + $0x148] sm:$0xf] }
  0x16   :  { %v246_v41 = vrot.slane %v245_v30, 4  ;;  %v1590_v42 = vunpack.c.l.b16 %v237_v36  ;;  %v119_v43 = vor.u32 %v118_v32, %v115_v27  ;;  %v253_v47 = vshrl.u32 %v4402_v29, 16  ;;  %v4592_v4 = vld [vmem:[%s7464_s0 + $0x218] sm:$0xf]  ;;  %v4908_v6 = vld [vmem:[%s7464_s0 + $0x21c] sm:$0xf0] }
  0x17   :  { %v132_v45 = vrot.slane %v130_v38, 5  ;;  %v138_v46 = vrot.slane %v136_v39, 5  ;;  %v256_v48 = vshll.u32 %v4402_v29, 16  ;;  %v262_v52 = vshll.u32 %v4403_v35, 16  ;;  %v4389_v18 = vld [vmem:[%s7464_s0 + $0x14c] sm:$0x1] }
  0x18   :  { %v251_v49 = vsel %vm5086_vm3, %v246_v41, %v250_v31  ;;  %v120_v50 = vrot.slane %v119_v43, 4  ;;  %v267_v53 = vshrl.u32 %v4404_v40, 16  ;;  %v255_v56 = vrot.slane %v253_v47, 4  ;;  %v4406_v22 = vld [vmem:[%s7464_s0 + $0x198] sm:$0xf] }
  0x19   :  { %v1591_v54 = vunpack.c.l.b16 %v251_v49  ;;  %v133_v55 = vor.u32 %v132_v45, %v129_v37  ;;  %v258_v57 = vrot.slane %v256_v48, 5  ;;  %v264_v61 = vrot.slane %v262_v52, 5  ;;  %v4407_v23 = vld [vmem:[%s7464_s0 + $0x19c] sm:$0x1] }
  0x1a   :  { %v125_v60 = vsel %vm5086_vm3, %v120_v50, %v124_v33  ;;  %v269_v62 = vrot.slane %v267_v53, 4  ;;  %v270_v63 = vshll.u32 %v4404_v40, 16  ;;  %v276_v8 = vshll.u32 %v4405_v51, 16 }
  0x1b   :  { %v1601_v1 = vpack.c.b16 %v1591_v54, %v1590_v42  ;;  %v134_v2 = vrot.slane %v133_v55, 4  ;;  %v1582_v3 = vunpack.c.l.b16 %v125_v60  ;;  %v259_v5 = vor.u32 %v258_v57, %v255_v56 }
  0x1c   :  { %v272_v7 = vrot.slane %v270_v63, 5  ;;  %v141_v9 = vshrl.u32 %v4386_v58, 16  ;;  %v144_v10 = vshll.u32 %v4386_v58, 16  ;;  %4603 = vmatmul.msk.bf16.gmra.mxu1 %vm1610_vm0, %v4573_v44  ;;  %v150_v13 = vshll.u32 %v4387_v59, 16 }
  0x1d   :  { %v139_v11 = vsel %vm5086_vm3, %v134_v2, %v138_v46  ;;  %v260_v12 = vrot.slane %v259_v5, 4  ;;  %v155_v14 = vshrl.u32 %v4388_v0, 16  ;;  %v278_v17 = vrot.slane %v276_v8, 5 }
  0x1e   :  { %v1583_v15 = vunpack.c.l.b16 %v139_v11  ;;  %v273_v16 = vor.u32 %v272_v7, %v269_v62  ;;  %v143_v19 = vrot.slane %v141_v9, 4  ;;  %v4593_v20 = vor.u32 %v4908_v6, %v4592_v4 }
  0x1f   :  { %v146_v21 = vrot.slane %v144_v10, 5  ;;  %v265_v24 = vsel %vm5086_vm3, %v260_v12, %v264_v61  ;;  %v157_v26 = vrot.slane %v155_v14, 4  ;;  %v158_v27 = vshll.u32 %v4388_v0, 16 }
  0x20   :  { %v274_v25 = vrot.slane %v273_v16, 4 }
  0x21   :  { %13 = vsyncpa [#allocation4], 0  ;;  %4563 = vmatmul.msk.bf16.gmra.mxu2 %vm1610_vm0, %v1601_v1  ;;  %v1597_v28 = vpack.c.b16 %v1583_v15, %v1582_v3  ;;  %v147_v29 = vor.u32 %v146_v21, %v143_v19  ;;  %v152_v30 = vrot.slane %v150_v13, 5  ;;  %v164_v31 = vshll.u32 %v4389_v18, 16  ;;  %v4408_v32 = vld [vmem:[%s7464_s0 + $0x1a0] sm:$0xf] }
  0x22   :  { %v279_v33 = vsel %vm5086_vm3, %v274_v25, %v278_v17  ;;  %v160_v35 = vrot.slane %v158_v27, 5  ;;  %v281_v36 = vshrl.u32 %v4406_v22, 16  ;;  %v284_v37 = vshll.u32 %v4406_v22, 16  ;;  %v4409_v40 = vld [vmem:[%s7464_s0 + $0x1a4] sm:$0x1]  ;;  %s4990_s16 = smov 8  }
  0x23   :  { %v148_v38 = vrot.slane %v147_v29, 4  ;;  %v166_v39 = vrot.slane %v164_v31, 5  ;;  %v290_v41 = vshll.u32 %v4407_v23, 16  ;;  %v295_v45 = vshrl.u32 %v4408_v32, 16  ;;  %v4390_v46 = vld [vmem:[%s7464_s0 + $0x150] sm:$0xf] }
  0x24   :  { %v161_v42 = vor.u32 %v160_v35, %v157_v26  ;;  %v283_v43 = vrot.slane %v281_v36, 4  ;;  %v286_v44 = vrot.slane %v284_v37, 5  ;;  %v1592_v47 = vunpack.c.l.b16 %v265_v24  ;;  %v4392_v50 = vld [vmem:[%s7464_s0 + $0x158] sm:$0xf]  ;;  %v4576_v53 = vld [vmem:[%s7464_s0 + $0x1d0] sm:$0xf] }
  0x25   :  { %4559 = vmatmul.msk.bf16.gmra.mxu0 %vm1610_vm0, %v1597_v28  ;;  %4608 = vmatmul.msk.bf16.gmra.mxu3 %vm1610_vm0, %v4593_v20  ;;  %v1593_v48 = vunpack.c.l.b16 %v279_v33  ;;  %v298_v49 = vshll.u32 %v4408_v32, 16  ;;  %v153_v51 = vsel %vm5086_vm3, %v148_v38, %v152_v30  ;;  %v4904_v54 = vld [vmem:[%s7464_s0 + $0x1d4] sm:$0xf0]  ;;  %v297_v56 = vrot.slane %v295_v45, 4  ;;  %v4391_v59 = vld [vmem:[%s7464_s0 + $0x154] sm:$0x1] }
  0x26   :  { %v162_v52 = vrot.slane %v161_v42, 4  ;;  %v287_v55 = vor.u32 %v286_v44, %v283_v43  ;;  %v304_v58 = vshll.u32 %v4409_v40, 16  ;;  %v169_v60 = vshrl.u32 %v4390_v46, 16  ;;  %v5226_v4 = vld [vmem:[%s7464_s0 + $0x228] sm:$0xf]  ;;  %s4350_s24 = sshll.u32 %s7472_s8, 4  ;;  %s4351_s24 = int_to_ptr.hbm [resolvable:$true] %s4350_s24 }
  0x27   :  { %v300_v57 = vrot.slane %v298_v49, 5  ;;  %v172_v61 = vshll.u32 %v4390_v46, 16  ;;  %v292_v0 = vrot.slane %v290_v41, 5  ;;  %v183_v1 = vshrl.u32 %v4392_v50, 16  ;;  %v4393_v6 = vld [vmem:[%s7464_s0 + $0x15c] sm:$0x1] }
  0x28   :  { %v167_v62 = vsel %vm5086_vm3, %v162_v52, %v166_v39  ;;  %v288_v63 = vrot.slane %v287_v55, 4  ;;  %v5221_v2 = vunpack.c.l.b16 %v153_v51  ;;  %v4577_v3 = vor.u32 %v4904_v54, %v4576_v53  ;;  %v4362_v12 = vld [vmem:[%s7464_s0 + $0x1b0] sm:$0xf]  ;;  %v4363_v20 = vld [vmem:[%s7464_s0 + $0x1b8] sm:$0xf] }
  0x29   :  { %v301_v5 = vor.u32 %v300_v57, %v297_v56  ;;  %v171_v7 = vrot.slane %v169_v60, 4  ;;  %v1585_v8 = vunpack.c.l.b16 %v167_v62  ;;  %v306_v9 = vrot.slane %v304_v58, 5  ;;  %v4909_v13 = vld [vmem:[%s7464_s0 + $0x22c] sm:$0xf0]  ;;  %v4410_v23 = vld [vmem:[%s7464_s0 + $0x1b4] sm:$0x1] }
  0x2a   :  { %v174_v10 = vrot.slane %v172_v61, 5  ;;  %v178_v11 = vshll.u32 %v4391_v59, 16  ;;  %v185_v15 = vrot.slane %v183_v1, 4  ;;  %v186_v16 = vshll.u32 %v4392_v50, 16  ;;  %v5253_v30 = vld [vmem:[%s7464_s0 + $0x1e0] sm:$0xf] }
  0x2b   :  { %v302_v14 = vrot.slane %v301_v5, 4  ;;  %v1602_v17 = vpack.c.b16 %v1593_v48, %v1592_v47  ;;  %v293_v18 = vsel %vm5086_vm3, %v288_v63, %v292_v0  ;;  %v192_v22 = vshll.u32 %v4393_v6, 16  ;;  %v5258_v31 = vld [vmem:[%s7464_s0 + $0x1e4] sm:$0xf0]  ;;  %v5263_v33 = vld [vmem:[%s7464_s0 + $0x98] sm:$0xf] }
  0x2c   :  { %v175_v19 = vor.u32 %v174_v10, %v171_v7  ;;  %4604 = vmatmul.msk.bf16.gmra.mxu1 %vm1610_vm0, %v4577_v3  ;;  %v188_v21 = vrot.slane %v186_v16, 5  ;;  %v325_v24 = vshrl.u32 %v4362_v12, 16  ;;  %v328_v25 = vshll.u32 %v4362_v12, 16  ;;  %v4442_v38 = vld [vmem:[%s7464_s0 + $0x8] sm:$0xf]  ;;  %v4932_v49 = vld [vmem:[%s7466_s2 + $0x30] sm:$0xff] }
  0x2d   :  { %v1598_v26 = vpack.c.b16 %v1585_v8, %v5221_v2  ;;  %v4597_v27 = vor.u32 %v4909_v13, %v5226_v4  ;;  %v307_v28 = vsel %vm5086_vm3, %v302_v14, %v306_v9  ;;  %v180_v29 = vrot.slane %v178_v11, 5  ;;  %v4444_v43 = vld [vmem:[%s7464_s0 + $0x10] sm:$0xf]  ;;  %v5279_v47 = vld [vmem:[%s7464_s0 + $0x9c] sm:$0xf0]  ;;  %2382 = vmatpush.bf16.msra.mxu2 %v4932_v49  ;;  %v4933_v4 = vld [vmem:[%s7466_s2 + $0x38] sm:$0xff] }
  0x2e   :  { %v189_v32 = vor.u32 %v188_v21, %v185_v15  ;;  %v327_v35 = vrot.slane %v325_v24, 4  ;;  %v330_v36 = vrot.slane %v328_v25, 5  ;;  %v339_v37 = vshrl.u32 %v4363_v20, 16  ;;  %v4411_v50 = vld [vmem:[%s7464_s0 + $0x1bc] sm:$0x1]  ;;  %v4931_v5 = vld [vmem:[%s7466_s2 + $0x28] sm:$0xff]  ;;  %2503 = vmatpush.bf16.msra.mxu3 %v4933_v4 }
  0x2f   :  { %v5268_v39 = vunpack.c.l.b16 %v293_v18  ;;  %v176_v40 = vrot.slane %v175_v19, 4  ;;  %v334_v41 = vshll.u32 %v4410_v23, 16  ;;  %v342_v42 = vshll.u32 %v4363_v20, 16  ;;  %v4443_v56 = vld [vmem:[%s7464_s0 + $0xc] sm:$0x1]  ;;  %v4934_v6 = vld [vmem:[%s7466_s2 + $0x40] sm:$0xff]  ;;  %2245 = vmatpush.bf16.msrb.mxu1 %v4931_v5 }
  0x30   :  { %v5274_v44 = vunpack.c.l.b16 %v307_v28  ;;  %v190_v45 = vrot.slane %v189_v32, 4  ;;  %v194_v46 = vrot.slane %v192_v22, 5  ;;  %v331_v48 = vor.u32 %v330_v36, %v327_v35  ;;  %v4445_v61 = vld [vmem:[%s7464_s0 + $0x14] sm:$0x1]  ;;  %v4426_v63 = vld [vmem:[%s7464_s0 + $0x98] sm:$0xf]  ;;  %2624 = vmatpush.bf16.msra.mxu0 %v4934_v6 }
  0x31   :  { %4564 = vmatmul.msk.bf16.gmra.mxu2 %vm1610_vm0, %v1602_v17  ;;  %v341_v51 = vrot.slane %v339_v37, 4  ;;  %v344_v52 = vrot.slane %v342_v42, 5  ;;  %v599_v53 = vshrl.u32 %v4442_v38, 16  ;;  %v602_v54 = vshll.u32 %v4442_v38, 16  ;;  %v4427_v14 = vld [vmem:[%s7464_s0 + $0xa0] sm:$0xf] }
  0x32   :  { %v4581_v55 = vor.u32 %v5258_v31, %v5253_v30  ;;  %v613_v57 = vshrl.u32 %v4444_v43, 16  ;;  %v181_v58 = vsel %vm5086_vm3, %v176_v40, %v180_v29  ;;  %v4625_v59 = vor.u32 %v5279_v47, %v5263_v33  ;;  %v4474_v15 = vld [vmem:[%s7464_s0 + $0x9c] sm:$0x1]  ;;  %v4475_v20 = vld [vmem:[%s7464_s0 + $0xa4] sm:$0x1] }
  0x33   :  { %v5296_v60 = vrot.slane %v334_v41, 5  ;;  %v601_v62 = vrot.slane %v599_v53, 4  ;;  %v195_v0 = vsel %vm5086_vm3, %v190_v45, %v194_v46  ;;  %v332_v1 = vrot.slane %v331_v48, 4  ;;  %v4364_v30 = vld [vmem:[%s7464_s0 + $0x1c0] sm:$0xf] }
  0x34   :  { %v348_v2 = vshll.u32 %v4411_v50, 16  ;;  %v604_v3 = vrot.slane %v602_v54, 5  ;;  %v1603_v7 = vpack.c.b16 %v5274_v44, %v5268_v39  ;;  %v345_v8 = vor.u32 %v344_v52, %v341_v51  ;;  %v4365_v37 = vld [vmem:[%s7464_s0 + $0x1c8] sm:$0xf]  ;;  %v4412_v50 = vld [vmem:[%s7464_s0 + $0x1c4] sm:$0x1] }
  0x35   :  { %4560 = vmatmul.msk.bf16.gmra.mxu0 %vm1610_vm0, %v1598_v26  ;;  %4609 = vmatmul.msk.bf16.gmra.mxu3 %vm1610_vm0, %v4597_v27  ;;  %v615_v9 = vrot.slane %v613_v57, 4  ;;  %v616_v10 = vshll.u32 %v4444_v43, 16  ;;  %v5319_v11 = vunpack.c.l.b16 %v181_v58  ;;  %v608_v13 = vshll.u32 %v4443_v56, 16  ;;  %v4446_v56 = vld [vmem:[%s7464_s0 + $0x18] sm:$0xf] }
  0x36   :  { %v605_v12 = vor.u32 %v604_v3, %v601_v62  ;;  %v839_v16 = vshrl.u32 %v4426_v63, 16  ;;  %v5327_v17 = vunpack.c.l.b16 %v195_v0  ;;  %v622_v19 = vshll.u32 %v4445_v61, 16  ;;  %v4448_v5 = vld [vmem:[%s7464_s0 + $0x20] sm:$0xf] }
  0x37   :  { %v618_v18 = vrot.slane %v616_v10, 5  ;;  %v842_v21 = vshll.u32 %v4426_v63, 16  ;;  %v337_v22 = vsel %vm5086_vm3, %v332_v1, %v5296_v60  ;;  %v350_v23 = vrot.slane %v348_v2, 5  ;;  %v4413_v1 = vld [vmem:[%s7464_s0 + $0x1cc] sm:$0x1] }
  0x38   :  { %v841_v24 = vrot.slane %v839_v16, 4  ;;  %v848_v25 = vshll.u32 %v4474_v15, 16  ;;  %v346_v26 = vrot.slane %v345_v8, 4  ;;  %v853_v29 = vshrl.u32 %v4427_v14, 16  ;;  %v4447_v16 = vld [vmem:[%s7464_s0 + $0x1c] sm:$0x1] }
  0x39   :  { %v619_v27 = vor.u32 %v618_v18, %v615_v9  ;;  %v844_v28 = vrot.slane %v842_v21, 5  ;;  %v606_v31 = vrot.slane %v605_v12, 4  ;;  %v610_v32 = vrot.slane %v608_v13, 5  ;;  %v5381_v12 = vld [vmem:[%s7464_s0 + $0xac] sm:$0xf0] }
  0x3a   :  { %v856_v35 = vshll.u32 %v4427_v14, 16  ;;  %v862_v36 = vshll.u32 %v4475_v20, 16  ;;  %v624_v39 = vrot.slane %v622_v19, 5  ;;  %v855_v41 = vrot.slane %v853_v29, 4  ;;  %v4428_v18 = vld [vmem:[%s7464_s0 + $0xa8] sm:$0xf] }
  0x3b   :  { %v620_v38 = vrot.slane %v619_v27, 4  ;;  %v845_v40 = vor.u32 %v844_v28, %v841_v24  ;;  %v850_v42 = vrot.slane %v848_v25, 5  ;;  %v353_v44 = vshrl.u32 %v4364_v30, 16  ;;  %v4476_v29 = vld [vmem:[%s7464_s0 + $0xac] sm:$0x1] }
  0x3c   :  { %4605 = vmatmul.msk.bf16.gmra.mxu1 %vm1610_vm0, %v4581_v55  ;;  %v858_v43 = vrot.slane %v856_v35, 5  ;;  %v356_v45 = vshll.u32 %v4364_v30, 16  ;;  %v1599_v46 = vpack.c.b16 %v5327_v17, %v5319_v11  ;;  %v351_v48 = vsel %vm5086_vm3, %v346_v26, %v350_v23  ;;  %v5376_v11 = vld [vmem:[%s7464_s0 + $0xa8] sm:$0xf]  ;;  %v4449_v26 = vld [vmem:[%s7464_s0 + $0x24] sm:$0x1] }
  0x3d   :  { %v846_v49 = vrot.slane %v845_v40, 4  ;;  %v367_v51 = vshrl.u32 %v4365_v37, 16  ;;  %v864_v53 = vrot.slane %v862_v36, 5  ;;  %v355_v54 = vrot.slane %v353_v44, 4  ;;  %v4477_v36 = vld [vmem:[%s7464_s0 + $0xb4] sm:$0x1] }
  0x3e   :  { %v859_v52 = vor.u32 %v858_v43, %v855_v41  ;;  %v358_v55 = vrot.slane %v356_v45, 5  ;;  %v611_v57 = vsel %vm5086_vm3, %v606_v31, %v610_v32  ;;  %v625_v58 = vsel %vm5086_vm3, %v620_v38, %v624_v39 }
  0x3f   :  { %v369_v60 = vrot.slane %v367_v51, 4  ;;  %v370_v61 = vshll.u32 %v4365_v37, 16  ;;  %v5357_v62 = vunpack.c.l.b16 %v337_v22  ;;  %v851_v63 = vsel %vm5086_vm3, %v846_v49, %v850_v42 }
  0x40   :  { %v860_v0 = vrot.slane %v859_v52, 4  ;;  %v362_v2 = vshll.u32 %v4412_v50, 16  ;;  %v359_v3 = vor.u32 %v358_v55, %v355_v54  ;;  %v627_v6 = vshrl.u32 %v4446_v56, 16  ;;  %v4367_v52 = vld [vmem:[%s7464_s0 + $0x1d8] sm:$0xf] }
  0x41   :  { %4565 = vmatmul.msk.bf16.gmra.mxu2 %vm1610_vm0, %v1603_v7  ;;  %v372_v4 = vrot.slane %v370_v61, 5  ;;  %v630_v8 = vshll.u32 %v4446_v56, 16  ;;  %v5367_v7 = vunpack.c.l.b16 %v351_v48  ;;  %v5369_v9 = vunpack.c.l.b16 %v611_v57 }
  0x42   :  { %v5371_v10 = vunpack.c.l.b16 %v625_v58  ;;  %v865_v13 = vsel %vm5086_vm3, %v860_v0, %v864_v53  ;;  %v376_v15 = vshll.u32 %v4413_v1, 16  ;;  %v629_v17 = vrot.slane %v627_v6, 4  ;;  %v4414_v1 = vld [vmem:[%s7464_s0 + $0x1d4] sm:$0x1] }
  0x43   :  { %v373_v14 = vor.u32 %v372_v4, %v369_v60  ;;  %v2184_v19 = vunpack.c.l.b16 %v851_v63  ;;  %v2185_v20 = vunpack.c.l.b16 %v865_v13  ;;  %v632_v21 = vrot.slane %v630_v8, 5  ;;  %v4450_v8 = vld [vmem:[%s7464_s0 + $0x28] sm:$0xf] }
  0x44   :  { %v641_v22 = vshrl.u32 %v4448_v5, 16  ;;  %v4629_v23 = vor.u32 %v5381_v12, %v5376_v11  ;;  %v360_v24 = vrot.slane %v359_v3, 4  ;;  %v364_v25 = vrot.slane %v362_v2, 5  ;;  %v4478_v11 = vld [vmem:[%s7464_s0 + $0xbc] sm:$0x1] }
  0x45   :  { %4561 = vmatmul.msk.bf16.gmra.mxu0 %vm1610_vm0, %v1599_v46  ;;  %4658 = vmatmul.msk.bf16.vlgmr.msrb.gmra.mxu3 %vm1610_vm0, %v4625_v59  ;;  %v644_v27 = vshll.u32 %v4448_v5, 16  ;;  %v1821_v28 = vpack.c.b16 %v5367_v7, %v5357_v62  ;;  %v2079_v33 = vpack.c.b16 %v5371_v10, %v5369_v9  ;;  %v636_v47 = vshll.u32 %v4447_v16, 16  ;;  %v4429_v59 = vld [vmem:[%s7464_s0 + $0xb0] sm:$0xf] }
  0x46   :  { %v867_v30 = vshrl.u32 %v4428_v18, 16  ;;  %v374_v31 = vrot.slane %v373_v14, 4  ;;  %v378_v32 = vrot.slane %v376_v15, 5  ;;  %v633_v35 = vor.u32 %v632_v21, %v629_v17  ;;  %v4366_v46 = vld [vmem:[%s7464_s0 + $0x1d0] sm:$0xf] }
  0x47   :  { %v870_v37 = vshll.u32 %v4428_v18, 16  ;;  %v2200_v38 = vpack.c.b16 %v2185_v20, %v2184_v19  ;;  %v643_v39 = vrot.slane %v641_v22, 4  ;;  %v646_v40 = vrot.slane %v644_v27, 5  ;;  %v4415_v15 = vld [vmem:[%s7464_s0 + $0x1dc] sm:$0x1] }
  0x48   :  { %v869_v41 = vrot.slane %v867_v30, 4  ;;  %v365_v42 = vsel %vm5086_vm3, %v360_v24, %v364_v25  ;;  %v876_v44 = vshll.u32 %v4476_v29, 16  ;;  %v881_v45 = vshrl.u32 %v4429_v59, 16  ;;  %v4452_v17 = vld [vmem:[%s7464_s0 + $0x30] sm:$0xf] }
  0x49   :  { %v872_v43 = vrot.slane %v870_v37, 5  ;;  %v638_v48 = vrot.slane %v636_v47, 5  ;;  %v650_v49 = vshll.u32 %v4449_v26, 16  ;;  %v884_v50 = vshll.u32 %v4429_v59, 16  ;;  %v4451_v22 = vld [vmem:[%s7464_s0 + $0x2c] sm:$0x1] }
  0x4a   :  { %v890_v51 = vshll.u32 %v4477_v36, 16  ;;  %v379_v53 = vsel %vm5086_vm3, %v374_v31, %v378_v32  ;;  %v634_v54 = vrot.slane %v633_v35, 4  ;;  %v883_v56 = vrot.slane %v881_v45, 4  ;;  %v4430_v36 = vld [vmem:[%s7464_s0 + $0xb8] sm:$0xf] }
  0x4b   :  { %v873_v55 = vor.u32 %v872_v43, %v869_v41  ;;  %v647_v57 = vor.u32 %v646_v40, %v643_v39  ;;  %v886_v58 = vrot.slane %v884_v50, 5  ;;  %v381_v60 = vshrl.u32 %v4366_v46, 16  ;;  %v4453_v40 = vld [vmem:[%s7464_s0 + $0x34] sm:$0x1]  ;;  %v4479_v50 = vld [vmem:[%s7464_s0 + $0xc4] sm:$0x1] }
  0x4c   :  { %4682 = vmatmul.msk.bf16.vlgmr.msrb.gmra.mxu1 %vm1610_vm0, %v2200_v38  ;;  %v384_v61 = vshll.u32 %v4366_v46, 16  ;;  %v5425_v62 = vunpack.c.l.b16 %v365_v42  ;;  %v878_v0 = vrot.slane %v876_v44, 5  ;;  %v395_v2 = vshrl.u32 %v4367_v52, 16  ;;  %v4431_v44 = vld [vmem:[%s7464_s0 + $0xc0] sm:$0xf] }
  0x4d   :  { %v874_v63 = vrot.slane %v873_v55, 4  ;;  %v887_v3 = vor.u32 %v886_v58, %v883_v56  ;;  %v892_v4 = vrot.slane %v890_v51, 5  ;;  %v383_v5 = vrot.slane %v381_v60, 4 }
  0x4e   :  { %v386_v6 = vrot.slane %v384_v61, 5  ;;  %v5433_v7 = vunpack.c.l.b16 %v379_v53  ;;  %v639_v13 = vsel %vm5086_vm3, %v634_v54, %v638_v48  ;;  %v652_v14 = vrot.slane %v650_v49, 5  ;;  %v4368_v61 = vld [vmem:[%s7464_s0 + $0x1e0] sm:$0xf] }
  0x4f   :  { %v398_v16 = vshll.u32 %v4367_v52, 16  ;;  %v648_v18 = vrot.slane %v647_v57, 4  ;;  %v888_v19 = vrot.slane %v887_v3, 4  ;;  %v390_v20 = vshll.u32 %v4414_v1, 16  ;;  %v4632_v3 = vld [vmem:[%s7464_s0 + $0xb8] sm:$0xf] }
  0x50   :  { %v397_v21 = vrot.slane %v395_v2, 4  ;;  %v879_v24 = vsel %vm5086_vm3, %v874_v63, %v878_v0  ;;  %v655_v26 = vshrl.u32 %v4450_v8, 16  ;;  %v658_v27 = vshll.u32 %v4450_v8, 16 }
  0x51   :  { %4614 = vmatmul.msk.bf16.vlgmr.msrb.gmra.mxu2 %vm1610_vm0, %v1821_v28  ;;  %v400_v25 = vrot.slane %v398_v16, 5  ;;  %v893_v47 = vsel %vm5086_vm3, %v888_v19, %v892_v4  ;;  %v387_v59 = vor.u32 %v386_v6, %v383_v5  ;;  %v404_v29 = vshll.u32 %v4415_v15, 16  ;;  %v4416_v16 = vld [vmem:[%s7464_s0 + $0x1e4] sm:$0x1]  ;;  %v4912_v19 = vld [vmem:[%s7464_s0 + $0xbc] sm:$0xf0] }
  0x52   :  { %v669_v28 = vshrl.u32 %v4452_v17, 16  ;;  %v1822_v30 = vpack.c.b16 %v5433_v7, %v5425_v62  ;;  %v5453_v31 = vunpack.c.l.b16 %v639_v13  ;;  %v657_v32 = vrot.slane %v655_v26, 4  ;;  %v4369_v13 = vld [vmem:[%s7464_s0 + $0x1e8] sm:$0xf] }
  0x53   :  { %v664_v35 = vshll.u32 %v4451_v22, 16  ;;  %v2186_v37 = vunpack.c.l.b16 %v879_v24  ;;  %v2187_v38 = vunpack.c.l.b16 %v893_v47  ;;  %v401_v39 = vor.u32 %v400_v25, %v397_v21  ;;  %v5524_v7 = vld [vmem:[%s7464_s0 + $0xc8] sm:$0xf] }
  0x54   :  { %v660_v41 = vrot.slane %v658_v27, 5  ;;  %v653_v42 = vsel %vm5086_vm3, %v648_v18, %v652_v14  ;;  %v392_v43 = vrot.slane %v390_v20, 5  ;;  %v671_v9 = vrot.slane %v669_v28, 4 }
  0x55   :  { %4670 = vmatmul.msk.bf16.vlgmr.msrb.gmra.mxu0 %vm1610_vm0, %v2079_v33  ;;  %4659 = vmatmul.msk.bf16.gmra.mxu3 %vm1610_vm0, %v4629_v23  ;;  %v672_v10 = vshll.u32 %v4452_v17, 16  ;;  %v388_v12 = vrot.slane %v387_v59, 4  ;;  %v406_v23 = vrot.slane %v404_v29, 5  ;;  %v895_v45 = vshrl.u32 %v4430_v36, 16 }
  0x56   :  { %v661_v33 = vor.u32 %v660_v41, %v657_v32  ;;  %v666_v46 = vrot.slane %v664_v35, 5  ;;  %v678_v49 = vshll.u32 %v4453_v40, 16  ;;  %v898_v51 = vshll.u32 %v4430_v36, 16 }
  0x57   :  { %v674_v48 = vrot.slane %v672_v10, 5  ;;  %v2201_v52 = vpack.c.b16 %v2187_v38, %v2186_v37  ;;  %v402_v53 = vrot.slane %v401_v39, 4  ;;  %v897_v54 = vrot.slane %v895_v45, 4  ;;  %v4417_v37 = vld [vmem:[%s7464_s0 + $0x1ec] sm:$0x1] }
  0x58   :  { %v904_v55 = vshll.u32 %v4478_v11, 16  ;;  %v662_v56 = vrot.slane %v661_v33, 4  ;;  %v900_v58 = vrot.slane %v898_v51, 5  ;;  %v909_v60 = vshrl.u32 %v4431_v44, 16  ;;  %v4454_v39 = vld [vmem:[%s7464_s0 + $0x38] sm:$0xf] }
  0x59   :  { %v675_v57 = vor.u32 %v674_v48, %v671_v9  ;;  %v2066_v63 = vunpack.c.l.b16 %v653_v42  ;;  %v393_v0 = vsel %vm5086_vm3, %v388_v12, %v392_v43  ;;  %v912_v1 = vshll.u32 %v4431_v44, 16  ;;  %v5536_v43 = vld [vmem:[%s7464_s0 + $0xcc] sm:$0xf0]  ;;  %v4455_v12 = vld [vmem:[%s7464_s0 + $0x3c] sm:$0x1] }
  0x5a   :  { %v918_v2 = vshll.u32 %v4479_v50, 16  ;;  %v680_v5 = vrot.slane %v678_v49, 5  ;;  %v901_v6 = vor.u32 %v900_v58, %v897_v54  ;;  %v911_v8 = vrot.slane %v909_v60, 4  ;;  %v4433_v58 = vld [vmem:[%s7464_s0 + $0xd0] sm:$0xf] }
  0x5b   :  { %v676_v4 = vrot.slane %v675_v57, 4  ;;  %v407_v14 = vsel %vm5086_vm3, %v402_v53, %v406_v23  ;;  %v914_v15 = vrot.slane %v912_v1, 5  ;;  %v409_v17 = vshrl.u32 %v4368_v61, 16  ;;  %v4480_v60 = vld [vmem:[%s7464_s0 + $0xcc] sm:$0x1] }
  0x5c   :  { %4683 = vmatmul.msk.bf16.gmra.mxu1 %vm1610_vm0, %v2201_v52  ;;  %v412_v18 = vshll.u32 %v4368_v61, 16  ;;  %v667_v20 = vsel %vm5086_vm3, %v662_v56, %v666_v46  ;;  %v902_v21 = vrot.slane %v901_v6, 4  ;;  %v906_v22 = vrot.slane %v904_v55, 5  ;;  %v4432_v46 = vld [vmem:[%s7464_s0 + $0xc8] sm:$0xf] }
  0x5d   :  { %v920_v24 = vrot.slane %v918_v2, 5  ;;  %v915_v25 = vor.u32 %v914_v15, %v911_v8  ;;  %v411_v26 = vrot.slane %v409_v17, 4  ;;  %v423_v47 = vshrl.u32 %v4369_v13, 16  ;;  %v4481_v2 = vld [vmem:[%s7464_s0 + $0xd4] sm:$0x1] }
  0x5e   :  { %v414_v27 = vrot.slane %v412_v18, 5  ;;  %v681_v59 = vsel %vm5086_vm3, %v676_v4, %v680_v5  ;;  %v418_v29 = vshll.u32 %v4416_v16, 16  ;;  %v426_v28 = vshll.u32 %v4369_v13, 16  ;;  %v4457_v6 = vld [vmem:[%s7464_s0 + $0x44] sm:$0x1] }
  0x5f   :  { %v2080_v32 = vpack.c.b16 %v2066_v63, %v5453_v31  ;;  %v4633_v35 = vor.u32 %v4912_v19, %v4632_v3  ;;  %v916_v36 = vrot.slane %v915_v25, 4  ;;  %v5515_v40 = vunpack.c.l.b16 %v393_v0  ;;  %v4456_v31 = vld [vmem:[%s7464_s0 + $0x40] sm:$0xf]  ;;  %v4370_v18 = vld [vmem:[%s7464_s0 + $0x1f8] sm:$0xf] }
  0x60   :  { %v415_v38 = vor.u32 %v414_v27, %v411_v26  ;;  %v5517_v41 = vunpack.c.l.b16 %v407_v14  ;;  %v5519_v62 = vunpack.c.l.b16 %v667_v20  ;;  %v5531_v42 = vunpack.c.l.b16 %v681_v59 }
  0x61   :  { %4615 = vmatmul.msk.bf16.gmra.mxu2 %vm1610_vm0, %v1822_v30  ;;  %v907_v30 = vsel %vm5086_vm3, %v902_v21, %v906_v22  ;;  %v921_v9 = vsel %vm5086_vm3, %v916_v36, %v920_v24  ;;  %v425_v10 = vrot.slane %v423_v47, 4  ;;  %v428_v11 = vrot.slane %v426_v28, 5  ;;  %v4371_v24 = vld [vmem:[%s7464_s0 + $0x200] sm:$0xf]  ;;  %v4418_v28 = vld [vmem:[%s7464_s0 + $0x1fc] sm:$0x1] }
  0x62   :  { %v420_v23 = vrot.slane %v418_v29, 5  ;;  %v432_v33 = vshll.u32 %v4417_v37, 16  ;;  %v683_v44 = vshrl.u32 %v4454_v39, 16  ;;  %v686_v45 = vshll.u32 %v4454_v39, 16 }
  0x63   :  { %v2188_v48 = vunpack.c.l.b16 %v907_v30  ;;  %v2189_v49 = vunpack.c.l.b16 %v921_v9  ;;  %v416_v50 = vrot.slane %v415_v38, 4  ;;  %v697_v51 = vshrl.u32 %v4456_v31, 16  ;;  %v4419_v30 = vld [vmem:[%s7464_s0 + $0x204] sm:$0x1] }
  0x64   :  { %v1823_v52 = vpack.c.b16 %v5517_v41, %v5515_v40  ;;  %v4637_v53 = vor.u32 %v5536_v43, %v5524_v7  ;;  %v700_v54 = vshll.u32 %v4456_v31, 16  ;;  %v2081_v55 = vpack.c.b16 %v5531_v42, %v5519_v62 }
  0x65   :  { %4671 = vmatmul.msk.bf16.gmra.mxu0 %vm1610_vm0, %v2080_v32  ;;  %4660 = vmatmul.msk.bf16.gmra.mxu3 %vm1610_vm0, %v4633_v35  ;;  %v429_v56 = vor.u32 %v428_v11, %v425_v10  ;;  %v692_v57 = vshll.u32 %v4455_v12, 16  ;;  %v923_v61 = vshrl.u32 %v4432_v46, 16  ;;  %v434_v63 = vrot.slane %v432_v33, 5  ;;  %v5590_v11 = vld [vmem:[%s7464_s0 + $0xe0] sm:$0xf] }
  0x66   :  { %v685_v0 = vrot.slane %v683_v44, 4  ;;  %v688_v1 = vrot.slane %v686_v45, 5  ;;  %v926_v3 = vshll.u32 %v4432_v46, 16  ;;  %v2202_v4 = vpack.c.b16 %v2189_v49, %v2188_v48  ;;  %v4458_v44 = vld [vmem:[%s7464_s0 + $0x50] sm:$0xf] }
  0x67   :  { %v421_v5 = vsel %vm5086_vm3, %v416_v50, %v420_v23  ;;  %v699_v8 = vrot.slane %v697_v51, 4  ;;  %v925_v13 = vrot.slane %v923_v61, 4  ;;  %v702_v14 = vrot.slane %v700_v54, 5  ;;  %v4460_v50 = vld [vmem:[%s7464_s0 + $0x58] sm:$0xf] }
  0x68   :  { %v928_v15 = vrot.slane %v926_v3, 5  ;;  %v932_v16 = vshll.u32 %v4480_v60, 16  ;;  %v937_v17 = vshrl.u32 %v4433_v58, 16  ;;  %v430_v19 = vrot.slane %v429_v56, 4  ;;  %v5602_v54 = vld [vmem:[%s7464_s0 + $0xe4] sm:$0xf0] }
  0x69   :  { %v5571_v20 = vrot.slane %v692_v57, 5  ;;  %v940_v21 = vshll.u32 %v4433_v58, 16  ;;  %v946_v22 = vshll.u32 %v4481_v2, 16  ;;  %v5576_v25 = vunpack.c.l.b16 %v421_v5 }
  0x6a   :  { %v689_v26 = vor.u32 %v688_v1, %v685_v0  ;;  %v929_v27 = vor.u32 %v928_v15, %v925_v13  ;;  %v939_v47 = vrot.slane %v937_v17, 4  ;;  %v706_v59 = vshll.u32 %v4457_v6, 16  ;;  %v4482_v15 = vld [vmem:[%s7464_s0 + $0xe4] sm:$0x1] }
  0x6b   :  { %v942_v29 = vrot.slane %v940_v21, 5  ;;  %v437_v32 = vshrl.u32 %v4370_v18, 16  ;;  %v440_v35 = vshll.u32 %v4370_v18, 16  ;;  %v703_v36 = vor.u32 %v702_v14, %v699_v8  ;;  %v4435_v14 = vld [vmem:[%s7464_s0 + $0xe8] sm:$0xf] }
  0x6c   :  { %4684 = vmatmul.msk.bf16.gmra.mxu1 %vm1610_vm0, %v2202_v4  ;;  %v930_v37 = vrot.slane %v929_v27, 4  ;;  %v934_v38 = vrot.slane %v932_v16, 5  ;;  %v451_v39 = vshrl.u32 %v4371_v24, 16  ;;  %v948_v41 = vrot.slane %v946_v22, 5  ;;  %v4434_v4 = vld [vmem:[%s7464_s0 + $0xe0] sm:$0xf] }
  0x6d   :  { %v943_v40 = vor.u32 %v942_v29, %v939_v47  ;;  %v439_v31 = vrot.slane %v437_v32, 4  ;;  %v442_v9 = vrot.slane %v440_v35, 5  ;;  %v435_v10 = vsel %vm5086_vm3, %v430_v19, %v434_v63  ;;  %v4461_v21 = vld [vmem:[%s7464_s0 + $0x5c] sm:$0x1] }
  0x6e   :  { %v446_v12 = vshll.u32 %v4418_v28, 16  ;;  %v453_v23 = vrot.slane %v451_v39, 4  ;;  %v454_v33 = vshll.u32 %v4371_v24, 16  ;;  %v690_v45 = vrot.slane %v689_v26, 4  ;;  %v4483_v28 = vld [vmem:[%s7464_s0 + $0xec] sm:$0x1] }
  0x6f   :  { %v708_v46 = vrot.slane %v706_v59, 5  ;;  %v944_v48 = vrot.slane %v943_v40, 4  ;;  %v443_v49 = vor.u32 %v442_v9, %v439_v31  ;;  %v704_v51 = vrot.slane %v703_v36, 4  ;;  %v4372_v36 = vld [vmem:[%s7464_s0 + $0x208] sm:$0xf] }
  0x70   :  { %v935_v56 = vsel %vm5086_vm3, %v930_v37, %v934_v38  ;;  %v456_v57 = vrot.slane %v454_v33, 5  ;;  %v460_v58 = vshll.u32 %v4419_v30, 16  ;;  %v711_v61 = vshrl.u32 %v4458_v44, 16 }
  0x71   :  { %4616 = vmatmul.msk.bf16.gmra.mxu2 %vm1610_vm0, %v1823_v52  ;;  %v5606_v52 = vunpack.c.l.b16 %v435_v10  ;;  %v949_v60 = vsel %vm5086_vm3, %v944_v48, %v948_v41  ;;  %v714_v63 = vshll.u32 %v4458_v44, 16  ;;  %v444_v0 = vrot.slane %v443_v49, 4  ;;  %v4373_v41 = vld [vmem:[%s7464_s0 + $0x210] sm:$0xf] }
  0x72   :  { %v448_v1 = vrot.slane %v446_v12, 5  ;;  %v457_v2 = vor.u32 %v456_v57, %v453_v23  ;;  %v725_v3 = vshrl.u32 %v4460_v50, 16  ;;  %v4641_v5 = vor.u32 %v5602_v54, %v5590_v11  ;;  %v4437_v11 = vld [vmem:[%s7464_s0 + $0xf8] sm:$0xf] }
  0x73   :  { %v2190_v6 = vunpack.c.l.b16 %v935_v56  ;;  %v2191_v8 = vunpack.c.l.b16 %v949_v60  ;;  %v462_v13 = vrot.slane %v460_v58, 5  ;;  %v695_v62 = vsel %vm5086_vm3, %v690_v45, %v5571_v20  ;;  %v4459_v20 = vld [vmem:[%s7464_s0 + $0x54] sm:$0x1]  ;;  %v4462_v58 = vld [vmem:[%s7464_s0 + $0x60] sm:$0xf] }
  0x74   :  { %v709_v42 = vsel %vm5086_vm3, %v704_v51, %v708_v46  ;;  %v458_v7 = vrot.slane %v457_v2, 4  ;;  %v728_v43 = vshll.u32 %v4460_v50, 16  ;;  %v951_v16 = vshrl.u32 %v4434_v4, 16 }
  0x75   :  { %4672 = vmatmul.msk.bf16.gmra.mxu0 %vm1610_vm0, %v2081_v55  ;;  %4661 = vmatmul.msk.bf16.gmra.mxu3 %vm1610_vm0, %v4637_v53  ;;  %v713_v53 = vrot.slane %v711_v61, 4  ;;  %v716_v55 = vrot.slane %v714_v63, 5  ;;  %v954_v17 = vshll.u32 %v4434_v4, 16  ;;  %v1824_v18 = vpack.c.b16 %v5606_v52, %v5576_v25  ;;  %v5679_v4 = vld [vmem:[%s7464_s0 + $0xf0] sm:$0xf] }
  0x76   :  { %v449_v19 = vsel %vm5086_vm3, %v444_v0, %v448_v1  ;;  %v727_v22 = vrot.slane %v725_v3, 4  ;;  %v965_v24 = vshrl.u32 %v4435_v14, 16  ;;  %v2203_v26 = vpack.c.b16 %v2191_v8, %v2190_v6  ;;  %v4420_v0 = vld [vmem:[%s7464_s0 + $0x20c] sm:$0x1]  ;;  %v4464_v1 = vld [vmem:[%s7464_s0 + $0x68] sm:$0xf] }
  0x77   :  { %v463_v27 = vsel %vm5086_vm3, %v458_v7, %v462_v13  ;;  %v730_v47 = vrot.slane %v728_v43, 5  ;;  %v953_v59 = vrot.slane %v951_v16, 4  ;;  %v2069_v25 = vunpack.c.l.b16 %v695_v62  ;;  %v4421_v6 = vld [vmem:[%s7464_s0 + $0x214] sm:$0x1]  ;;  %v4463_v16 = vld [vmem:[%s7464_s0 + $0x64] sm:$0x1] }
  0x78   :  { %v2070_v29 = vunpack.c.l.b16 %v709_v42  ;;  %v956_v32 = vrot.slane %v954_v17, 5  ;;  %v960_v35 = vshll.u32 %v4482_v15, 16  ;;  %v5652_v37 = vunpack.c.l.b16 %v449_v19 }
  0x79   :  { %v717_v38 = vor.u32 %v716_v55, %v713_v53  ;;  %v720_v39 = vshll.u32 %v4459_v20, 16  ;;  %v734_v40 = vshll.u32 %v4461_v21, 16  ;;  %v5657_v30 = vunpack.c.l.b16 %v463_v27 }
  0x7a   :  { %v957_v31 = vor.u32 %v956_v32, %v953_v59  ;;  %v967_v9 = vrot.slane %v965_v24, 4  ;;  %v968_v10 = vshll.u32 %v4435_v14, 16  ;;  %v731_v12 = vor.u32 %v730_v47, %v727_v22  ;;  %v5687_v14 = vld [vmem:[%s7464_s0 + $0xf4] sm:$0xf0]  ;;  %v4436_v22 = vld [vmem:[%s7464_s0 + $0xf0] sm:$0xf] }
  0x7b   :  { %v974_v23 = vshll.u32 %v4483_v28, 16  ;;  %v465_v33 = vshrl.u32 %v4372_v36, 16  ;;  %v468_v44 = vshll.u32 %v4372_v36, 16  ;;  %v962_v46 = vrot.slane %v960_v35, 5  ;;  %v4484_v35 = vld [vmem:[%s7464_s0 + $0xf4] sm:$0x1] }
  0x7c   :  { %4685 = vmatmul.msk.bf16.gmra.mxu1 %vm1610_vm0, %v2203_v26  ;;  %v958_v45 = vrot.slane %v957_v31, 4  ;;  %v970_v48 = vrot.slane %v968_v10, 5  ;;  %v479_v49 = vshrl.u32 %v4373_v41, 16  ;;  %v5660_v50 = vrot.slane %v717_v38, 4 }
  0x7d   :  { %v5662_v51 = vrot.slane %v720_v39, 5  ;;  %v467_v56 = vrot.slane %v465_v33, 4  ;;  %v470_v57 = vrot.slane %v468_v44, 5  ;;  %v2082_v52 = vpack.c.b16 %v2070_v29, %v2069_v25 }
  0x7e   :  { %v736_v60 = vrot.slane %v734_v40, 5  ;;  %v971_v61 = vor.u32 %v970_v48, %v967_v9  ;;  %v976_v63 = vrot.slane %v974_v23, 5  ;;  %v1825_v2 = vpack.c.b16 %v5657_v30, %v5652_v37  ;;  %v4485_v23 = vld [vmem:[%s7464_s0 + $0xfc] sm:$0x1] }
  0x7f   :  { %v732_v3 = vrot.slane %v731_v12, 4  ;;  %v481_v8 = vrot.slane %v479_v49, 4  ;;  %v482_v13 = vshll.u32 %v4373_v41, 16  ;;  %v963_v62 = vsel %vm5086_vm3, %v958_v45, %v962_v46  ;;  %v4465_v41 = vld [vmem:[%s7464_s0 + $0x6c] sm:$0x1] }
  0x80   :  { %v972_v42 = vrot.slane %v971_v61, 4  ;;  %v739_v7 = vshrl.u32 %v4462_v58, 16  ;;  %v742_v43 = vshll.u32 %v4462_v58, 16  ;;  %v471_v53 = vor.u32 %v470_v57, %v467_v56 }
  0x81   :  { %4617 = vmatmul.msk.bf16.gmra.mxu2 %vm1610_vm0, %v1824_v18  ;;  %v474_v55 = vshll.u32 %v4420_v0, 16  ;;  %v484_v15 = vrot.slane %v482_v13, 5  ;;  %v753_v17 = vshrl.u32 %v4464_v1, 16  ;;  %v488_v19 = vshll.u32 %v4421_v6, 16 }
  0x82   :  { %v977_v18 = vsel %vm5086_vm3, %v972_v42, %v976_v63  ;;  %v741_v20 = vrot.slane %v739_v7, 4  ;;  %v744_v21 = vrot.slane %v742_v43, 5  ;;  %v723_v24 = vsel %vm5086_vm3, %v5660_v50, %v5662_v51  ;;  %v4374_v51 = vld [vmem:[%s7464_s0 + $0x218] sm:$0xf] }
  0x83   :  { %v2192_v26 = vunpack.c.l.b16 %v963_v62  ;;  %v2193_v27 = vunpack.c.l.b16 %v977_v18  ;;  %v485_v47 = vor.u32 %v484_v15, %v481_v8  ;;  %v4645_v59 = vor.u32 %v5687_v14, %v5679_v4  ;;  %v4486_v4 = vld [vmem:[%s7464_s0 + $0x104] sm:$0x1] }
  0x84   :  { %v745_v25 = vor.u32 %v744_v21, %v741_v20  ;;  %v748_v29 = vshll.u32 %v4463_v16, 16  ;;  %v756_v28 = vshll.u32 %v4464_v1, 16  ;;  %v737_v54 = vsel %vm5086_vm3, %v732_v3, %v736_v60  ;;  %v4375_v1 = vld [vmem:[%s7464_s0 + $0x220] sm:$0xf] }
  0x85   :  { %4673 = vmatmul.msk.bf16.gmra.mxu0 %vm1610_vm0, %v2082_v52  ;;  %4662 = vmatmul.msk.bf16.gmra.mxu3 %vm1610_vm0, %v4641_v5  ;;  %v476_v5 = vrot.slane %v474_v55, 5  ;;  %v755_v32 = vrot.slane %v753_v17, 4  ;;  %v979_v36 = vshrl.u32 %v4436_v22, 16  ;;  %v472_v39 = vrot.slane %v471_v53, 4  ;;  %v4466_v17 = vld [vmem:[%s7464_s0 + $0x70] sm:$0xf] }
  0x86   :  { %v490_v40 = vrot.slane %v488_v19, 5  ;;  %v758_v31 = vrot.slane %v756_v28, 5  ;;  %v982_v9 = vshll.u32 %v4436_v22, 16  ;;  %v2204_v10 = vpack.c.b16 %v2193_v27, %v2192_v26 }
  0x87   :  { %v486_v12 = vrot.slane %v485_v47, 4  ;;  %v981_v33 = vrot.slane %v979_v36, 4  ;;  %v993_v44 = vshrl.u32 %v4437_v11, 16  ;;  %v746_v46 = vrot.slane %v745_v25, 4 }
  0x88   :  { %v5718_v38 = vpop.f32.mrf.mxu3  ;;  %v750_v48 = vrot.slane %v748_v29, 5  ;;  %v984_v49 = vrot.slane %v982_v9, 5  ;;  %v988_v50 = vshll.u32 %v4484_v35, 16  ;;  %v2071_v56 = vunpack.c.l.b16 %v723_v24  ;;  %v4467_v9 = vld [vmem:[%s7464_s0 + $0x74] sm:$0x1] }
  0x89   :  { %v1763_v45 = vpop.f32.mrf.mxu1  ;;  %v2072_v57 = vunpack.c.l.b16 %v737_v54  ;;  %v759_v58 = vor.u32 %v758_v31, %v755_v32  ;;  %v762_v52 = vshll.u32 %v4465_v41, 16  ;;  %v477_v60 = vsel %vm5086_vm3, %v472_v39, %v476_v5  ;;  %v4422_v54 = vld [vmem:[%s7464_s0 + $0x21c] sm:$0x1]  ;;  %v4423_v32 = vld [vmem:[%s7464_s0 + $0x224] sm:$0x1] }
  0x8a   :  { %v985_v61 = vor.u32 %v984_v49, %v981_v33  ;;  %v995_v63 = vrot.slane %v993_v44, 4  ;;  %v996_v0 = vshll.u32 %v4437_v11, 16  ;;  %v491_v3 = vsel %vm5086_vm3, %v486_v12, %v490_v40  ;;  %v4468_v39 = vld [vmem:[%s7464_s0 + $0x78] sm:$0xf] }
  0x8b   :  { %v1002_v6 = vshll.u32 %v4485_v23, 16  ;;  %v493_v8 = vshrl.u32 %v4374_v51, 16  ;;  %v496_v13 = vshll.u32 %v4374_v51, 16  ;;  %v751_v62 = vsel %vm5086_vm3, %v746_v46, %v750_v48  ;;  %v4469_v46 = vld [vmem:[%s7464_s0 + $0x7c] sm:$0x1] }
  0x8c   :  { %4686 = vmatmul.msk.bf16.gmra.mxu1 %vm1610_vm0, %v2204_v10  ;;  %v986_v42 = vrot.slane %v985_v61, 4  ;;  %v990_v7 = vrot.slane %v988_v50, 5  ;;  %v998_v43 = vrot.slane %v996_v0, 5  ;;  %v2083_v53 = vpack.c.b16 %v2072_v57, %v2071_v56  ;;  %v4438_v48 = vld [vmem:[%s7464_s0 + $0x100] sm:$0xf] }
  0x8d   :  { %v760_v55 = vrot.slane %v759_v58, 4  ;;  %v764_v15 = vrot.slane %v762_v52, 5  ;;  %v507_v16 = vshrl.u32 %v4375_v1, 16  ;;  %v5744_v19 = vunpack.c.l.b16 %v477_v60 }
  0x8e   :  { %v5746_v20 = vunpack.c.l.b16 %v491_v3  ;;  %v999_v21 = vor.u32 %v998_v43, %v995_v63  ;;  %v1004_v22 = vrot.slane %v1002_v6, 5  ;;  %v5752_v24 = vunpack.c.l.b16 %v751_v62  ;;  %v4439_v6 = vld [vmem:[%s7464_s0 + $0x108] sm:$0xf] }
  0x8f   :  { %v495_v26 = vrot.slane %v493_v8, 4  ;;  %v498_v27 = vrot.slane %v496_v13, 5  ;;  %v510_v47 = vshll.u32 %v4375_v1, 16  ;;  %v991_v28 = vsel %vm5086_vm3, %v986_v42, %v990_v7  ;;  %v4648_v42 = vld [vmem:[%s7464_s0 + $0x100] sm:$0xf] }
  0x90   :  { %v5742_v18 = vpop.f32.mrf.mxu3  ;;  %v1000_v11 = vrot.slane %v999_v21, 4  ;;  %v767_v5 = vshrl.u32 %v4466_v17, 16  ;;  %v770_v37 = vshll.u32 %v4466_v17, 16  ;;  %v509_v35 = vrot.slane %v507_v16, 4 }
  0x91   :  { %4618 = vmatmul.msk.bf16.gmra.mxu2 %vm1610_vm0, %v1825_v2  ;;  %v5754_v29 = vpop.f32.mrf.mxu1  ;;  %v765_v2 = vsel %vm5086_vm3, %v760_v55, %v764_v15  ;;  %v512_v36 = vrot.slane %v510_v47, 5  ;;  %v1826_v41 = vpack.c.b16 %v5746_v20, %v5744_v19  ;;  %v2194_v33 = vunpack.c.l.b16 %v991_v28  ;;  %v4916_v47 = vld [vmem:[%s7464_s0 + $0x104] sm:$0xf0] }
  0x92   :  { %v1644_v25 = vpop.f32.mrf.mxu0  ;;  %v1005_v31 = vsel %vm5086_vm3, %v1000_v11, %v1004_v22  ;;  %v769_v10 = vrot.slane %v767_v5, 4  ;;  %v772_v12 = vrot.slane %v770_v37, 5  ;;  %v5792_v49 = vunpack.c.l.b16 %v765_v2 }
  0x93   :  { %v5761_v30 = vadd.f32 %v1763_v45, %v1644_v25  ;;  %v2195_v44 = vunpack.c.l.b16 %v1005_v31  ;;  %v502_v45 = vshll.u32 %v4422_v54, 16  ;;  %v516_v50 = vshll.u32 %v4423_v32, 16 }
  0x94   :  { %v1664_v40 = vpop.f32.mrf.mxu2  ;;  %v781_v51 = vshrl.u32 %v4468_v39, 16  ;;  %v513_v14 = vor.u32 %v512_v36, %v509_v35  ;;  %v776_v56 = vshll.u32 %v4467_v9, 16  ;;  %v784_v57 = vshll.u32 %v4468_v39, 16  ;;  %v4377_v39 = vld [vmem:[%s7464_s0 + $0x230] sm:$0xf] }
  0x95   :  { %4674 = vmatmul.msk.bf16.gmra.mxu0 %vm1610_vm0, %v2083_v53  ;;  %v5780_v23 = vadd.f32 %v5718_v38, %v1664_v40  ;;  %4663 = vmatmul.msk.bf16.gmra.mxu3 %vm1610_vm0, %v4645_v59  ;;  %v499_v38 = vor.u32 %v498_v27, %v495_v26  ;;  %v773_v59 = vor.u32 %v772_v12, %v769_v10  ;;  %v790_v60 = vshll.u32 %v4469_v46, 16  ;;  %v4487_v53 = vld [vmem:[%s7464_s0 + $0x10c] sm:$0x1]  ;;  %v4376_v26 = vld [vmem:[%s7464_s0 + $0x228] sm:$0xf] }
  0x96   :  { %v783_v52 = vrot.slane %v781_v51, 4  ;;  %v1007_v61 = vshrl.u32 %v4438_v48, 16  ;;  %v1010_v63 = vshll.u32 %v4438_v48, 16  ;;  %v2205_v0 = vpack.c.b16 %v2195_v44, %v2194_v33  ;;  %v4424_v44 = vld [vmem:[%s7464_s0 + $0x22c] sm:$0x1] }
  0x97   :  { %v5799_v1 = vrot.slane %v502_v45, 5  ;;  %v786_v3 = vrot.slane %v784_v57, 5  ;;  %v1016_v8 = vshll.u32 %v4486_v4, 16  ;;  %v500_v7 = vrot.slane %v499_v38, 4 }
  0x98   :  { %v5797_v58 = vpop.f32.mrf.mxu3  ;;  %v518_v43 = vrot.slane %v516_v50, 5  ;;  %v1009_v55 = vrot.slane %v1007_v61, 4  ;;  %v1012_v15 = vrot.slane %v1010_v63, 5  ;;  %v514_v16 = vrot.slane %v513_v14, 4  ;;  %v4470_v50 = vld [vmem:[%s7464_s0 + $0x80] sm:$0xf] }
  0x99   :  { %v1768_v62 = vpop.f32.mrf.mxu1  ;;  %v774_v17 = vrot.slane %v773_v59, 4  ;;  %v778_v21 = vrot.slane %v776_v56, 5  ;;  %v787_v22 = vor.u32 %v786_v3, %v783_v52  ;;  %v792_v25 = vrot.slane %v790_v60, 5  ;;  %v4472_v60 = vld [vmem:[%s7464_s0 + $0x88] sm:$0xf] }
  0x9a   :  { %v5804_v13 = vpop.f32.mrf.mxu0  ;;  %v1013_v28 = vor.u32 %v1012_v15, %v1009_v55  ;;  %v1018_v11 = vrot.slane %v1016_v8, 5  ;;  %v1021_v54 = vshrl.u32 %v4439_v6, 16  ;;  %v1024_v2 = vshll.u32 %v4439_v6, 16  ;;  %v4425_v63 = vld [vmem:[%s7464_s0 + $0x234] sm:$0x1] }
  0x9b   :  { %v788_v37 = vrot.slane %v787_v22, 4  ;;  %v1030_v32 = vshll.u32 %v4487_v53, 16  ;;  %v521_v40 = vshrl.u32 %v4376_v26, 16  ;;  %v524_v31 = vshll.u32 %v4376_v26, 16  ;;  %v5876_v15 = vld [vmem:[%s7464_s0 + $0x110] sm:$0xf] }
  0x9c   :  { %v1666_v27 = vpop.f32.mrf.mxu2  ;;  %4687 = vmatmul.msk.bf16.gmra.mxu1 %vm1610_vm0, %v2205_v0  ;;  %v1014_v35 = vrot.slane %v1013_v28, 4  ;;  %v1023_v36 = vrot.slane %v1021_v54, 4  ;;  %v4649_v9 = vor.u32 %v4916_v47, %v4648_v42  ;;  %v1026_v10 = vrot.slane %v1024_v2, 5  ;;  %v4473_v54 = vld [vmem:[%s7464_s0 + $0x8c] sm:$0x1] }
  0x9d   :  { %v5819_v5 = vadd.f32 %v5742_v18, %v1666_v27  ;;  %v2084_v12 = vpack.c.b16 %v5792_v49, %v5752_v24  ;;  %v505_v33 = vsel %vm5086_vm3, %v500_v7, %v5799_v1  ;;  %v523_v45 = vrot.slane %v521_v40, 4 }
  0x9e   :  { %v526_v46 = vrot.slane %v524_v31, 5  ;;  %v519_v24 = vsel %vm5086_vm3, %v514_v16, %v518_v43  ;;  %v1027_v48 = vor.u32 %v1026_v10, %v1023_v36  ;;  %v1032_v49 = vrot.slane %v1030_v32, 5  ;;  %v4471_v16 = vld [vmem:[%s7464_s0 + $0x84] sm:$0x1]  ;;  %v4508_v36 = vld [vmem:[%s7464_s0 + $0x130] sm:$0xf] }
  0x9f   :  { %v535_v38 = vshrl.u32 %v4377_v39, 16  ;;  %v779_v14 = vsel %vm5086_vm3, %v774_v17, %v778_v21  ;;  %v793_v19 = vsel %vm5086_vm3, %v788_v37, %v792_v25  ;;  %v1019_v20 = vsel %vm5086_vm3, %v1014_v35, %v1018_v11  ;;  %v4506_v17 = vld [vmem:[%s7464_s0 + $0x128] sm:$0xf]  ;;  %v5887_v21 = vld [vmem:[%s7464_s0 + $0x114] sm:$0xf0] }
  0xa0   :  { %v5827_v18 = vpop.f32.mrf.mxu3  ;;  %v1028_v56 = vrot.slane %v1027_v48, 4  ;;  %v530_v57 = vshll.u32 %v4424_v44, 16  ;;  %v527_v0 = vor.u32 %v526_v46, %v523_v45  ;;  %v795_v3 = vshrl.u32 %v4470_v50, 16  ;;  %v4507_v45 = vld [vmem:[%s7464_s0 + $0x12c] sm:$0x1] }
  0xa1   :  { %4619 = vmatmul.msk.bf16.gmra.mxu2 %vm1610_vm0, %v1826_v41  ;;  %v5844_v4 = vpop.f32.mrf.mxu1  ;;  %v538_v41 = vshll.u32 %v4377_v39, 16  ;;  %v537_v52 = vrot.slane %v535_v38, 4  ;;  %v798_v6 = vshll.u32 %v4470_v50, 16  ;;  %v2196_v7 = vunpack.c.l.b16 %v1019_v20  ;;  %v4440_v38 = vld [vmem:[%s7464_s0 + $0x110] sm:$0xf] }
  0xa2   :  { %v1649_v51 = vpop.f32.mrf.mxu0  ;;  %v1033_v42 = vsel %vm5086_vm3, %v1028_v56, %v1032_v49  ;;  %v1818_v43 = vunpack.c.l.b16 %v519_v24  ;;  %v5869_v53 = vunpack.c.l.b16 %v779_v14  ;;  %v5871_v55 = vunpack.c.l.b16 %v793_v19 }
  0xa3   :  { %v5852_v59 = vadd.f32 %v1768_v62, %v1649_v51  ;;  %v540_v1 = vrot.slane %v538_v41, 5  ;;  %v5865_v62 = vunpack.c.l.b16 %v505_v33  ;;  %v544_v26 = vshll.u32 %v4425_v63, 16  ;;  %v4488_v41 = vld [vmem:[%s7464_s0 + $0x114] sm:$0x1] }
  0xa4   :  { %v1669_v61 = vpop.f32.mrf.mxu2  ;;  %v809_v27 = vshrl.u32 %v4472_v60, 16  ;;  %v812_v47 = vshll.u32 %v4472_v60, 16  ;;  %v5891_v28 = vrot.slane %v527_v0, 4  ;;  %v5893_v11 = vrot.slane %v530_v57, 5  ;;  %v4509_v60 = vld [vmem:[%s7464_s0 + $0x134] sm:$0x1] }
  0xa5   :  { %4675 = vmatmul.msk.bf16.gmra.mxu0 %vm1610_vm0, %v2084_v12  ;;  %v5862_v8 = vadd.f32 %v5797_v58, %v1669_v61  ;;  %4664 = vmatmul.msk.bf16.gmra.mxu3 %vm1610_vm0, %v4649_v9  ;;  %v2197_v58 = vunpack.c.l.b16 %v1033_v42  ;;  %v541_v22 = vor.u32 %v540_v1, %v537_v52  ;;  %v797_v37 = vrot.slane %v795_v3, 4 }
  0xa6   :  { %v800_v2 = vrot.slane %v798_v6, 5  ;;  %v804_v35 = vshll.u32 %v4471_v16, 16  ;;  %v1113_v39 = vshrl.u32 %v4506_v17, 16  ;;  %v1116_v40 = vshll.u32 %v4506_v17, 16  ;;  %v4489_v17 = vld [vmem:[%s7464_s0 + $0x11c] sm:$0x1] }
  0xa7   :  { %v2206_v32 = vpack.c.b16 %v2197_v58, %v2196_v7  ;;  %v1827_v10 = vpack.c.b16 %v1818_v43, %v5865_v62  ;;  %v4653_v12 = vor.u32 %v5887_v21, %v5876_v15  ;;  %v811_v33 = vrot.slane %v809_v27, 4 }
  0xa8   :  { %v5889_v25 = vpop.f32.mrf.mxu3  ;;  %v814_v44 = vrot.slane %v812_v47, 5  ;;  %v2085_v46 = vpack.c.b16 %v5871_v55, %v5869_v53  ;;  %v542_v24 = vrot.slane %v541_v22, 4  ;;  %v546_v48 = vrot.slane %v544_v26, 5 }
  0xa9   :  { %v1773_v9 = vpop.f32.mrf.mxu1  ;;  %v1115_v49 = vrot.slane %v1113_v39, 4  ;;  %v801_v51 = vor.u32 %v800_v2, %v797_v37  ;;  %v818_v14 = vshll.u32 %v4473_v54, 16  ;;  %v1118_v19 = vrot.slane %v1116_v40, 5 }
  0xaa   :  { %v5901_v31 = vpop.f32.mrf.mxu0  ;;  %v1127_v20 = vshrl.u32 %v4508_v36, 16  ;;  %v533_v57 = vsel %vm5086_vm3, %v5891_v28, %v5893_v11  ;;  %v5925_v52 = vrot.slane %v804_v35, 5  ;;  %v1122_v61 = vshll.u32 %v4507_v45, 16  ;;  %v4490_v45 = vld [vmem:[%s7464_s0 + $0x1b8] sm:$0xf] }
  0xab   :  { %v815_v63 = vor.u32 %v814_v44, %v811_v33  ;;  %v1119_v0 = vor.u32 %v1118_v19, %v1115_v49  ;;  %v1130_v3 = vshll.u32 %v4508_v36, 16  ;;  %v547_v6 = vsel %vm5086_vm3, %v542_v24, %v546_v48 }
  0xac   :  { %v1671_v50 = vpop.f32.mrf.mxu2  ;;  %4688 = vmatmul.msk.bf16.gmra.mxu1 %vm1610_vm0, %v2206_v32  ;;  %v1129_v1 = vrot.slane %v1127_v20, 4  ;;  %v1035_v62 = vshrl.u32 %v4440_v38, 16  ;;  %v1038_v42 = vshll.u32 %v4440_v38, 16  ;;  %v1044_v7 = vshll.u32 %v4488_v41, 16  ;;  %v4491_v38 = vld [vmem:[%s7464_s0 + $0x1c0] sm:$0xf] }
  0xad   :  { %v5918_v56 = vadd.f32 %v5827_v18, %v1671_v50  ;;  %v4441_v18 = vld [vmem:[%s7464_s0 + $0x118] sm:$0xf]  ;;  %v802_v53 = vrot.slane %v801_v51, 4  ;;  %v820_v55 = vrot.slane %v818_v14, 5  ;;  %v1132_v15 = vrot.slane %v1130_v3, 5 }
  0xae   :  { %v1136_v58 = vshll.u32 %v4509_v60, 16  ;;  %v1124_v16 = vrot.slane %v1122_v61, 5  ;;  %v1037_v21 = vrot.slane %v1035_v62, 4  ;;  %v1040_v22 = vrot.slane %v1038_v42, 5  ;;  %v4510_v20 = vld [vmem:[%s7464_s0 + $0x138] sm:$0xf] }
  0xaf   :  { %v1049_v26 = vshrl.u32 %v4441_v18, 16  ;;  %v816_v47 = vrot.slane %v815_v63, 4  ;;  %v1120_v28 = vrot.slane %v1119_v0, 4  ;;  %v1133_v11 = vor.u32 %v1132_v15, %v1129_v1 }
  0xb0   :  { %v5935_v43 = vpop.f32.mrf.mxu3  ;;  %v1052_v54 = vshll.u32 %v4441_v18, 16  ;;  %v1041_v2 = vor.u32 %v1040_v22, %v1037_v21  ;;  %v1046_v32 = vrot.slane %v1044_v7, 5  ;;  %v1058_v44 = vshll.u32 %v4489_v17, 16  ;;  %v4538_v17 = vld [vmem:[%s7464_s0 + $0x1bc] sm:$0x1] }
  0xb1   :  { %4620 = vmatmul.msk.bf16.gmra.mxu2 %vm1610_vm0, %v1827_v10  ;;  %v1051_v35 = vrot.slane %v1049_v26, 4  ;;  %v5943_v39 = vpop.f32.mrf.mxu1  ;;  %v1134_v40 = vrot.slane %v1133_v11, 4  ;;  %v1138_v10 = vrot.slane %v1136_v58, 5  ;;  %v1820_v48 = vunpack.c.l.b16 %v547_v6  ;;  %v4512_v58 = vld [vmem:[%s7464_s0 + $0x140] sm:$0xf] }
  0xb2   :  { %v1654_v27 = vpop.f32.mrf.mxu0  ;;  %v1054_v33 = vrot.slane %v1052_v54, 5  ;;  %v1042_v49 = vrot.slane %v1041_v2, 4  ;;  %v807_v50 = vsel %vm5086_vm3, %v802_v53, %v5925_v52  ;;  %v1060_v14 = vrot.slane %v1058_v44, 5  ;;  %v4539_v11 = vld [vmem:[%s7464_s0 + $0x1c4] sm:$0x1] }
  0xb3   :  { %v5941_v37 = vadd.f32 %v1773_v9, %v1654_v27  ;;  %v1819_v9 = vunpack.c.l.b16 %v533_v57  ;;  %v1353_v19 = vshrl.u32 %v4490_v45, 16  ;;  %v1139_v57 = vsel %vm5086_vm3, %v1134_v40, %v1138_v10 }
  0xb4   :  { %v1674_v36 = vpop.f32.mrf.mxu2  ;;  %v1055_v51 = vor.u32 %v1054_v33, %v1051_v35  ;;  %v1356_v60 = vshll.u32 %v4490_v45, 16  ;;  %v1367_v61 = vshrl.u32 %v4491_v38, 16  ;;  %v1370_v1 = vshll.u32 %v4491_v38, 16  ;;  %v4511_v35 = vld [vmem:[%s7464_s0 + $0x13c] sm:$0x1] }
  0xb5   :  { %4676 = vmatmul.msk.bf16.gmra.mxu0 %vm1610_vm0, %v2085_v46  ;;  %v5950_v24 = vadd.f32 %v5889_v25, %v1674_v36  ;;  %4665 = vmatmul.msk.bf16.gmra.mxu3 %vm1610_vm0, %v4653_v12  ;;  %v821_v46 = vsel %vm5086_vm3, %v816_v47, %v820_v55  ;;  %v1125_v25 = vsel %vm5086_vm3, %v1120_v28, %v1124_v16  ;;  %v2077_v18 = vunpack.c.l.b16 %v807_v50 }
  0xb6   :  { %v1047_v12 = vsel %vm5086_vm3, %v1042_v49, %v1046_v32  ;;  %v1056_v52 = vrot.slane %v1055_v51, 4  ;;  %v1828_v63 = vpack.c.b16 %v1820_v48, %v1819_v9  ;;  %v1141_v62 = vshrl.u32 %v4510_v20, 16 }
  0xb7   :  { %v2198_v0 = vunpack.c.l.b16 %v1047_v12  ;;  %v1144_v42 = vshll.u32 %v4510_v20, 16  ;;  %v2078_v7 = vunpack.c.l.b16 %v821_v46  ;;  %v2442_v53 = vunpack.c.l.b16 %v1125_v25 }
  0xb8   :  { %v1798_v41 = vpop.f32.mrf.mxu3  ;;  %v1061_v6 = vsel %vm5086_vm3, %v1056_v52, %v1060_v14  ;;  %v2443_v55 = vunpack.c.l.b16 %v1139_v57  ;;  %v1355_v21 = vrot.slane %v1353_v19, 4  ;;  %v1358_v22 = vrot.slane %v1356_v60, 5 }
  0xb9   :  { %v2199_v15 = vunpack.c.l.b16 %v1061_v6  ;;  %v1369_v26 = vrot.slane %v1367_v61, 4  ;;  %v1372_v27 = vrot.slane %v1370_v1, 5  ;;  %v1143_v54 = vrot.slane %v1141_v62, 4  ;;  %v1778_v32 = vpop.f32.mrf.mxu1  ;;  %v4492_v61 = vld [vmem:[%s7464_s0 + $0x1c8] sm:$0xf] }
  0xba   :  { %v5970_v3 = vpop.f32.mrf.mxu0  ;;  %v1146_v2 = vrot.slane %v1144_v42, 5  ;;  %v1155_v36 = vshrl.u32 %v4512_v58, 16  ;;  %v2086_v40 = vpack.c.b16 %v2078_v7, %v2077_v18  ;;  %v1362_v10 = vshll.u32 %v4538_v17, 16  ;;  %v4493_v6 = vld [vmem:[%s7464_s0 + $0x1d0] sm:$0xf] }
  0xbb   :  { %v2207_v28 = vpack.c.b16 %v2199_v15, %v2198_v0  ;;  %v1158_v33 = vshll.u32 %v4512_v58, 16  ;;  %v2458_v45 = vpack.c.b16 %v2443_v55, %v2442_v53  ;;  %v1359_v9 = vor.u32 %v1358_v22, %v1355_v21  ;;  %v4514_v7 = vld [vmem:[%s7464_s0 + $0x148] sm:$0xf]  ;;  %v4918_v17 = vld [vmem:[%s7464_s0 + $0x1bc] sm:$0xf0] }
  0xbc   :  { %v1676_v16 = vpop.f32.mrf.mxu2  ;;  %v1376_v48 = vshll.u32 %v4539_v11, 16  ;;  %v1157_v49 = vrot.slane %v1155_v36, 4  ;;  %v1373_v38 = vor.u32 %v1372_v27, %v1369_v26  ;;  %v1147_v50 = vor.u32 %v1146_v2, %v1143_v54 }
  0xbd   :  { %v5981_v47 = vadd.f32 %v5935_v43, %v1676_v16  ;;  %4689 = vmatmul.msk.bf16.gmra.mxu1 %vm1610_vm0, %v2207_v28  ;;  %v4513_v43 = vld [vmem:[%s7464_s0 + $0x144] sm:$0x1]  ;;  %v1150_v51 = vshll.u32 %v4511_v35, 16  ;;  %v1160_v14 = vrot.slane %v1158_v33, 5  ;;  %v1360_v57 = vrot.slane %v1359_v9, 4 }
  0xbe   :  { %v1164_v25 = vshll.u32 %v4513_v43, 16  ;;  %v1364_v52 = vrot.slane %v1362_v10, 5  ;;  %v1378_v60 = vrot.slane %v1376_v48, 5  ;;  %v1374_v0 = vrot.slane %v1373_v38, 4  ;;  %v4692_v16 = vld [vmem:[%s7464_s0 + $0x1b8] sm:$0xf] }
  0xbf   :  { %v1161_v19 = vor.u32 %v1160_v14, %v1157_v49  ;;  %v1148_v1 = vrot.slane %v1147_v50, 4  ;;  %v1152_v18 = vrot.slane %v1150_v51, 5  ;;  %v1381_v53 = vshrl.u32 %v4492_v61, 16  ;;  %v4540_v49 = vld [vmem:[%s7464_s0 + $0x1cc] sm:$0x1] }
  0xc0   :  { %v1800_v44 = vpop.f32.mrf.mxu3  ;;  %v1166_v42 = vrot.slane %v1164_v25, 5  ;;  %v1384_v55 = vshll.u32 %v4492_v61, 16  ;;  %v1365_v21 = vsel %vm5086_vm3, %v1360_v57, %v1364_v52  ;;  %v1395_v22 = vshrl.u32 %v4493_v6, 16 }
  0xc1   :  { %4621 = vmatmul.msk.bf16.gmra.mxu2 %vm1610_vm0, %v1828_v63  ;;  %v1162_v62 = vrot.slane %v1161_v19, 4  ;;  %v6012_v15 = vpop.f32.mrf.mxu1  ;;  %v1398_v26 = vshll.u32 %v4493_v6, 16  ;;  %v1379_v27 = vsel %vm5086_vm3, %v1374_v0, %v1378_v60  ;;  %v1153_v28 = vsel %vm5086_vm3, %v1148_v1, %v1152_v18 }
  0xc2   :  { %v1659_v46 = vpop.f32.mrf.mxu0  ;;  %v1169_v11 = vshrl.u32 %v4514_v7, 16  ;;  %v1172_v54 = vshll.u32 %v4514_v7, 16  ;;  %v2563_v10 = vunpack.c.l.b16 %v1365_v21  ;;  %v1383_v43 = vrot.slane %v1381_v53, 4 }
  0xc3   :  { %v5994_v12 = vadd.f32 %v1778_v32, %v1659_v46  ;;  %v1167_v32 = vsel %vm5086_vm3, %v1162_v62, %v1166_v42  ;;  %v1386_v33 = vrot.slane %v1384_v55, 5  ;;  %v2564_v9 = vunpack.c.l.b16 %v1379_v27  ;;  %v4541_v46 = vld [vmem:[%s7464_s0 + $0x1d4] sm:$0x1] }
  0xc4   :  { %v1679_v20 = vpop.f32.mrf.mxu2  ;;  %v2444_v48 = vunpack.c.l.b16 %v1153_v28  ;;  %v1397_v38 = vrot.slane %v1395_v22, 4  ;;  %v1400_v50 = vrot.slane %v1398_v26, 5  ;;  %v2445_v14 = vunpack.c.l.b16 %v1167_v32  ;;  %v4494_v28 = vld [vmem:[%s7464_s0 + $0x1d8] sm:$0xf] }
  0xc5   :  { %4677 = vmatmul.msk.bf16.gmra.mxu0 %vm1610_vm0, %v2086_v40  ;;  %v6000_v63 = vadd.f32 %v1798_v41, %v1679_v20  ;;  %4738 = vmatmul.msk.bf16.vlgmr.msra.gmra.mxu3 %vm1610_vm0, %v2458_v45  ;;  %v4516_v41 = vld [vmem:[%s7464_s0 + $0x150] sm:$0xf]  ;;  %v4693_v40 = vor.u32 %v4918_v17, %v4692_v16  ;;  %v1171_v25 = vrot.slane %v1169_v11, 4  ;;  %v1174_v19 = vrot.slane %v1172_v54, 5  ;;  %v4515_v20 = vld [vmem:[%s7464_s0 + $0x14c] sm:$0x1] }
  0xc6   :  { %v1183_v35 = vshrl.u32 %v4516_v41, 16  ;;  %v1186_v36 = vshll.u32 %v4516_v41, 16  ;;  %v1387_v60 = vor.u32 %v1386_v33, %v1383_v43  ;;  %v1390_v61 = vshll.u32 %v4540_v49, 16  ;;  %v4518_v43 = vld [vmem:[%s7464_s0 + $0x158] sm:$0xf] }
  0xc7   :  { %v1401_v18 = vor.u32 %v1400_v50, %v1397_v38  ;;  %v1404_v6 = vshll.u32 %v4541_v46, 16  ;;  %v2579_v62 = vpack.c.b16 %v2564_v9, %v2563_v10  ;;  %v2459_v42 = vpack.c.b16 %v2445_v14, %v2444_v48  ;;  %v4520_v49 = vld [vmem:[%s7464_s0 + $0x160] sm:$0xf] }
  0xc8   :  { %v6014_v58 = vpop.f32.mrf.mxu3  ;;  %v1185_v57 = vrot.slane %v1183_v35, 4  ;;  %v1188_v52 = vrot.slane %v1186_v36, 5  ;;  %v1175_v7 = vor.u32 %v1174_v19, %v1171_v25  ;;  %v1178_v53 = vshll.u32 %v4515_v20, 16  ;;  %v4495_v35 = vld [vmem:[%s7464_s0 + $0x1e0] sm:$0xf] }
  0xc9   :  { %v2247_v1 = vpop.f32.mrf.mxu1  ;;  %v1388_v17 = vrot.slane %v1387_v60, 4  ;;  %v1392_v21 = vrot.slane %v1390_v61, 5  ;;  %v1402_v26 = vrot.slane %v1401_v18, 4  ;;  %v1406_v27 = vrot.slane %v1404_v6, 5  ;;  %v4696_v36 = vld [vmem:[%s7464_s0 + $0x1c8] sm:$0xf] }
  0xca   :  { %v6028_v2 = vpop.f32.mrf.mxu0  ;;  %v1189_v41 = vor.u32 %v1188_v52, %v1185_v57  ;;  %v1176_v54 = vrot.slane %v1175_v7, 4  ;;  %v1180_v32 = vrot.slane %v1178_v53, 5  ;;  %v1409_v48 = vshrl.u32 %v4494_v28, 16 }
  0xcb   :  { %v1393_v9 = vsel %vm5086_vm3, %v1388_v17, %v1392_v21  ;;  %v1407_v50 = vsel %vm5086_vm3, %v1402_v26, %v1406_v27  ;;  %v1197_v25 = vshrl.u32 %v4518_v43, 16  ;;  %v1200_v19 = vshll.u32 %v4518_v43, 16  ;;  %v4543_v26 = vld [vmem:[%s7464_s0 + $0x1e4] sm:$0x1] }
  0xcc   :  { %v1681_v45 = vpop.f32.mrf.mxu2  ;;  %v1181_v46 = vsel %vm5086_vm3, %v1176_v54, %v1180_v32  ;;  %v1211_v61 = vshrl.u32 %v4520_v49, 16  ;;  %v2565_v6 = vunpack.c.l.b16 %v1393_v9  ;;  %vm2682_vm4 = vcmask 261120  }
  0xcd   :  { %v6035_v51 = vadd.f32 %v1800_v44, %v1681_v45  ;;  %v4517_v44 = vld [vmem:[%s7464_s0 + $0x154] sm:$0x1]  ;;  %v4919_v45 = vld [vmem:[%s7464_s0 + $0x1cc] sm:$0xf0]  ;;  %v2446_v53 = vunpack.c.l.b16 %v1181_v46  ;;  %v1202_v27 = vrot.slane %v1200_v19, 5  ;;  %vm2848_vm5 = vcmask 254976  }
  0xce   :  { %v1192_v16 = vshll.u32 %v4517_v44, 16  ;;  %v4697_v57 = vor.u32 %v4919_v45, %v4696_v36  ;;  %v1214_v44 = vshll.u32 %v4520_v49, 16  ;;  %v4521_v36 = vld [vmem:[%s7464_s0 + $0x164] sm:$0x1]  ;;  %vm4327_vm12 = vcmask 195648  }
  0xd0   :  { %v6046_v0 = vpop.f32.mrf.mxu3  ;;  %v1194_v10 = vrot.slane %v1192_v16, 5  ;;  %v1216_v54 = vrot.slane %v1214_v44, 5 }
  0xd1   :  { %4726 = vmatmul.msk.bf16.vlgmr.msra.gmra.mxu2 %vm1610_vm0, %v4693_v40  ;;  %v1190_v40 = vrot.slane %v1189_v41, 4  ;;  %v6081_v52 = vpop.f32.mrf.mxu1 }
  0xd2   :  { %v2126_v55 = vpop.f32.mrf.mxu0 }
  0xd3   :  { %v1195_v60 = vsel %vm5086_vm3, %v1190_v40, %v1194_v10 }
  0xd4   :  { %v1868_v22 = vpop.f32.mrf.mxu2 }
  0xd5   :  { %4750 = vmatmul.msk.bf16.vlgmr.msra.gmra.mxu0 %vm1610_vm0, %v2579_v62  ;;  %v1908_v11 = vadd.f32 %v1868_v22, %v5761_v30  ;;  %4739 = vmatmul.msk.bf16.gmra.mxu3 %vm1610_vm0, %v2459_v42  ;;  %v1766_v30 = vadd.f32 %v5754_v29, %v5804_v13  ;;  %v1412_v29 = vshll.u32 %v4494_v28, 16  ;;  %v1423_v13 = vshrl.u32 %v4495_v35, 16  ;;  %v4519_v28 = vld [vmem:[%s7464_s0 + $0x15c] sm:$0x1] }
  0xd6   :  { %v2566_v62 = vunpack.c.l.b16 %v1407_v50  ;;  %v1411_v42 = vrot.slane %v1409_v48, 4  ;;  %v2447_v22 = vunpack.c.l.b16 %v1195_v60  ;;  %v1206_v49 = vshll.u32 %v4519_v28, 16 }
  0xd7   :  { %v2045_v33 = vadd.f32 %v6014_v58, %v1908_v11  ;;  %v1426_v58 = vshll.u32 %v4495_v35, 16  ;;  %v1414_v41 = vrot.slane %v1412_v29, 5  ;;  %v1425_v16 = vrot.slane %v1423_v13, 4  ;;  %v4496_v13 = vld [vmem:[%s7464_s0 + $0x1e8] sm:$0xf] }
  0xd8   :  { %v6075_v38 = vpop.f32.mrf.mxu3  ;;  %v1213_v11 = vrot.slane %v1211_v61, 4  ;;  %v2580_v40 = vpack.c.b16 %v2566_v62, %v2565_v6  ;;  %v2460_v9 = vpack.c.b16 %v2447_v22, %v2446_v53  ;;  %v1220_v29 = vshll.u32 %v4521_v36, 16  ;;  %v4522_v62 = vld [vmem:[%s7464_s0 + $0x170] sm:$0xf] }
  0xd9   :  { %v2166_v14 = vadd.f32 %v2126_v55, %v2045_v33  ;;  %v4542_v55 = vld [vmem:[%s7464_s0 + $0x1dc] sm:$0x1]  ;;  %v1428_v17 = vrot.slane %v1426_v58, 5  ;;  %v1415_v43 = vor.u32 %v1414_v41, %v1411_v42  ;;  %v1432_v33 = vshll.u32 %v4543_v26, 16 }
  0xda   :  { %v2128_v20 = vpop.f32.mrf.mxu0  ;;  %v1418_v35 = vshll.u32 %v4542_v55, 16  ;;  %v1208_v44 = vrot.slane %v1206_v49, 5  ;;  %v1437_v6 = vshrl.u32 %v4496_v13, 16  ;;  %v1440_v53 = vshll.u32 %v4496_v13, 16  ;;  %v4545_v13 = vld [vmem:[%s7464_s0 + $0x1f4] sm:$0x1] }
  0xdb   :  { %v6085_v18 = vadd.f32 %v2247_v1, %v2166_v14  ;;  %v1199_v1 = vrot.slane %v1197_v25, 4  ;;  %v2252_v14 = vpop.f32.mrf.mxu1  ;;  %v1416_v46 = vrot.slane %v1415_v43, 4  ;;  %v1434_v60 = vrot.slane %v1432_v33, 5 }
  0xdc   :  { %v1870_v7 = vpop.f32.mrf.mxu2  ;;  %v1420_v25 = vrot.slane %v1418_v35, 5  ;;  %v1225_v22 = vshrl.u32 %v4522_v62, 16  ;;  %v1228_v26 = vshll.u32 %v4522_v62, 16  ;;  %v1442_v36 = vrot.slane %v1440_v53, 5 }
  0xdd   :  { %v1909_v21 = vadd.f32 %v1870_v7, %v1766_v30  ;;  %v1429_v30 = vor.u32 %v1428_v17, %v1425_v16  ;;  %v1203_v48 = vor.u32 %v1202_v27, %v1199_v1  ;;  %v1222_v7 = vrot.slane %v1220_v29, 5  ;;  %v4700_v27 = vld [vmem:[%s7464_s0 + $0x1d8] sm:$0xf]  ;;  %v4544_v29 = vld [vmem:[%s7464_s0 + $0x1ec] sm:$0x1] }
  0xdf   :  { %v2046_v32 = vadd.f32 %v6046_v0, %v1909_v21  ;;  %v1217_v0 = vor.u32 %v1216_v54, %v1213_v11  ;;  %v1430_v19 = vrot.slane %v1429_v30, 4  ;;  %v1204_v61 = vrot.slane %v1203_v48, 4 }
  0xe0   :  { %v6100_v10 = vpop.f32.mrf.mxu3  ;;  %v1421_v21 = vsel %vm5086_vm3, %v1416_v46, %v1420_v25  ;;  %v1439_v54 = vrot.slane %v1437_v6, 4  ;;  %v1771_v30 = vadd.f32 %v5844_v4, %v5901_v31  ;;  %v1230_v46 = vrot.slane %v1228_v26, 5 }
  0xe1   :  { %4727 = vmatmul.msk.bf16.gmra.mxu2 %vm1610_vm0, %v4697_v57  ;;  %v6103_v45 = vadd.f32 %v2128_v20, %v2046_v32  ;;  %v4497_v20 = vld [vmem:[%s7464_s0 + $0x1f0] sm:$0xf]  ;;  %v1218_v42 = vrot.slane %v1217_v0, 4  ;;  %v1435_v28 = vsel %vm5086_vm3, %v1430_v19, %v1434_v60  ;;  %v1209_v11 = vsel %vm5086_vm3, %v1204_v61, %v1208_v44 }
  0xe2   :  { %v2131_v50 = vpop.f32.mrf.mxu0  ;;  %v1451_v41 = vshrl.u32 %v4497_v20, 16  ;;  %v1454_v16 = vshll.u32 %v4497_v20, 16  ;;  %v2567_v0 = vunpack.c.l.b16 %v1421_v21  ;;  %v2568_v19 = vunpack.c.l.b16 %v1435_v28 }
  0xe3   :  { %v1223_v35 = vsel %vm5086_vm3, %v1218_v42, %v1222_v7  ;;  %v2448_v4 = vunpack.c.l.b16 %v1209_v11  ;;  %v6150_v60 = vpop.f32.mrf.mxu1  ;;  %v1443_v20 = vor.u32 %v1442_v36, %v1439_v54  ;;  %v1446_v6 = vshll.u32 %v4544_v29, 16  ;;  %v4525_v7 = vld [vmem:[%s7464_s0 + $0x17c] sm:$0x1]  ;;  %v4498_v36 = vld [vmem:[%s7464_s0 + $0x200] sm:$0xf] }
  0xe4   :  { %v1873_v58 = vpop.f32.mrf.mxu2  ;;  %v1456_v48 = vrot.slane %v1454_v16, 5  ;;  %v2449_v31 = vunpack.c.l.b16 %v1223_v35  ;;  %v1460_v42 = vshll.u32 %v4545_v13, 16  ;;  %v1465_v29 = vshrl.u32 %v4498_v36, 16  ;;  %v4528_v13 = vld [vmem:[%s7464_s0 + $0x188] sm:$0xf] }
  0xe5   :  { %4751 = vmatmul.msk.bf16.gmra.mxu0 %vm1610_vm0, %v2580_v40  ;;  %v1910_v57 = vadd.f32 %v1873_v58, %v5852_v59  ;;  %4740 = vmatmul.msk.bf16.gmra.mxu3 %vm1610_vm0, %v2460_v9  ;;  %v4524_v59 = vld [vmem:[%s7464_s0 + $0x178] sm:$0xf]  ;;  %v1453_v9 = vrot.slane %v1451_v41, 4  ;;  %v1227_v58 = vrot.slane %v1225_v22, 4 }
  0xe6   :  { %v1239_v40 = vshrl.u32 %v4524_v59, 16  ;;  %v1242_v43 = vshll.u32 %v4524_v59, 16  ;;  %v2581_v59 = vpack.c.b16 %v2568_v19, %v2567_v0  ;;  %v2461_v21 = vpack.c.b16 %v2449_v31, %v2448_v4 }
  0xe7   :  { %v2047_v55 = vadd.f32 %v6075_v38, %v1910_v57  ;;  %v4920_v38 = vld [vmem:[%s7464_s0 + $0x1dc] sm:$0xf0]  ;;  %v1457_v62 = vor.u32 %v1456_v48, %v1453_v9  ;;  %v1462_v28 = vrot.slane %v1460_v42, 5  ;;  %v1776_v31 = vadd.f32 %v5943_v39, %v5970_v3 }
  0xe8   :  { %v6121_v17 = vpop.f32.mrf.mxu3  ;;  %v1241_v57 = vrot.slane %v1239_v40, 4  ;;  %v1244_v61 = vrot.slane %v1242_v43, 5  ;;  %v4499_v40 = vld [vmem:[%s7464_s0 + $0x208] sm:$0xf]  ;;  %v4526_v48 = vld [vmem:[%s7464_s0 + $0x180] sm:$0xf] }
  0xe9   :  { %v2168_v1 = vadd.f32 %v2131_v50, %v2047_v55  ;;  %v4701_v50 = vor.u32 %v4920_v38, %v4700_v27  ;;  %v1231_v55 = vor.u32 %v1230_v46, %v1227_v58  ;;  %v1448_v27 = vrot.slane %v1446_v6, 5  ;;  %v4704_v43 = vld [vmem:[%s7464_s0 + $0x1e8] sm:$0xf] }
  0xea   :  { %v2133_v32 = vpop.f32.mrf.mxu0  ;;  %v1245_v26 = vor.u32 %v1244_v61, %v1241_v57  ;;  %v1458_v38 = vrot.slane %v1457_v62, 4  ;;  %v1479_v19 = vshrl.u32 %v4499_v40, 16  ;;  %v1482_v4 = vshll.u32 %v4499_v40, 16 }
  0xeb   :  { %v6139_v33 = vadd.f32 %v2252_v14, %v2168_v1  ;;  %v4523_v14 = vld [vmem:[%s7464_s0 + $0x174] sm:$0x1]  ;;  %v1444_v1 = vrot.slane %v1443_v20, 4  ;;  %v1232_v54 = vrot.slane %v1231_v55, 4  ;;  %v2257_v58 = vpop.f32.mrf.mxu1  ;;  %v1253_v20 = vshrl.u32 %v4526_v48, 16 }
  0xec   :  { %v1875_v49 = vpop.f32.mrf.mxu2  ;;  %v1234_v41 = vshll.u32 %v4523_v14, 16  ;;  %v1463_v0 = vsel %vm5086_vm3, %v1458_v38, %v1462_v28  ;;  %v1256_v57 = vshll.u32 %v4526_v48, 16  ;;  %v1267_v62 = vshrl.u32 %v4528_v13, 16  ;;  %v4547_v38 = vld [vmem:[%s7464_s0 + $0x20c] sm:$0x1] }
  0xed   :  { %v1911_v25 = vadd.f32 %v1875_v49, %v1771_v30  ;;  %v1246_v30 = vrot.slane %v1245_v26, 4  ;;  %v1270_v42 = vshll.u32 %v4528_v13, 16  ;;  %v1467_v26 = vrot.slane %v1465_v29, 4 }
  0xee   :  { %v1236_v35 = vrot.slane %v1234_v41, 5  ;;  %v2570_v41 = vunpack.c.l.b16 %v1463_v0  ;;  %v1484_v39 = vrot.slane %v1482_v4, 5  ;;  %v1255_v28 = vrot.slane %v1253_v20, 4 }
  0xef   :  { %v2048_v44 = vadd.f32 %v6100_v10, %v1911_v25  ;;  %v1248_v10 = vshll.u32 %v4525_v7, 16  ;;  %v1468_v25 = vshll.u32 %v4498_v36, 16  ;;  %v1272_v36 = vrot.slane %v1270_v42, 5  ;;  %v4530_v42 = vld [vmem:[%s7464_s0 + $0x190] sm:$0xf] }
  0xf0   :  { %v6156_v53 = vpop.f32.mrf.mxu3 }
  0xf1   :  { %4728 = vmatmul.msk.bf16.gmra.mxu2 %vm1610_vm0, %v4701_v50  ;;  %v6159_v16 = vadd.f32 %v2133_v32, %v2048_v44  ;;  %v1250_v9 = vrot.slane %v1248_v10, 5  ;;  %v1449_v50 = vsel %vm5086_vm3, %v1444_v1, %v1448_v27  ;;  %v1470_v10 = vrot.slane %v1468_v25, 5  ;;  %v4546_v27 = vld [vmem:[%s7464_s0 + $0x204] sm:$0x1]  ;;  %v4500_v25 = vld [vmem:[%s7464_s0 + $0x210] sm:$0xf] }
  0xf2   :  { %v2136_v22 = vpop.f32.mrf.mxu0  ;;  %v2569_v55 = vunpack.c.l.b16 %v1449_v50  ;;  %v1481_v1 = vrot.slane %v1479_v19, 4  ;;  %v1474_v48 = vshll.u32 %v4546_v27, 16 }
  0xf3   :  { %v1251_v6 = vsel %vm5086_vm3, %v1246_v30, %v1250_v9  ;;  %v1471_v9 = vor.u32 %v1470_v10, %v1467_v26 }
  0xf4   :  { %v1878_v11 = vpop.f32.mrf.mxu2  ;;  %v2582_v40 = vpack.c.b16 %v2570_v41, %v2569_v55 }
  0xf5   :  { %4752 = vmatmul.msk.bf16.gmra.mxu0 %vm1610_vm0, %v2581_v59  ;;  %v1912_v32 = vadd.f32 %v1878_v11, %v5941_v37  ;;  %4741 = vmatmul.msk.bf16.gmra.mxu3 %vm1610_vm0, %v2461_v21  ;;  %v4921_v37 = vld [vmem:[%s7464_s0 + $0x1ec] sm:$0xf0]  ;;  %v1258_v11 = vrot.slane %v1256_v57, 5  ;;  %v1472_v4 = vrot.slane %v1471_v9, 4  ;;  %v4501_v57 = vld [vmem:[%s7464_s0 + $0x218] sm:$0xf]  ;;  %v1781_v9 = vadd.f32 %v6012_v15, %v6028_v2 }
  0xf6   :  { %v4705_v44 = vor.u32 %v4921_v37, %v4704_v43  ;;  %v4529_v43 = vld [vmem:[%s7464_s0 + $0x18c] sm:$0x1]  ;;  %v1488_v37 = vshll.u32 %v4547_v38, 16  ;;  %v1507_v26 = vshrl.u32 %v4501_v57, 16  ;;  %v1510_v10 = vshll.u32 %v4501_v57, 16 }
  0xf7   :  { %v2049_v49 = vadd.f32 %v6121_v17, %v1912_v32  ;;  %v1237_v17 = vsel %vm5086_vm3, %v1232_v54, %v1236_v35  ;;  %v4527_v54 = vld [vmem:[%s7464_s0 + $0x184] sm:$0x1]  ;;  %v1269_v35 = vrot.slane %v1267_v62, 4  ;;  %v1259_v29 = vor.u32 %v1258_v11, %v1255_v28  ;;  %v4708_v38 = vld [vmem:[%s7464_s0 + $0x200] sm:$0xf] }
  0xf8   :  { %v6187_v46 = vpop.f32.mrf.mxu3  ;;  %v2450_v59 = vunpack.c.l.b16 %v1237_v17  ;;  %v1262_v13 = vshll.u32 %v4527_v54, 16  ;;  %v1276_v17 = vshll.u32 %v4529_v43, 16  ;;  %v1490_v20 = vrot.slane %v1488_v37, 5  ;;  %v4531_v15 = vld [vmem:[%s7464_s0 + $0x194] sm:$0x1] }
  0xf9   :  { %v2170_v14 = vadd.f32 %v2136_v22, %v2049_v49  ;;  %v2451_v22 = vunpack.c.l.b16 %v1251_v6  ;;  %v1485_v49 = vor.u32 %v1484_v39, %v1481_v1  ;;  %v1493_v62 = vshrl.u32 %v4500_v25, 16 }
  0xfa   :  { %v2138_v61 = vpop.f32.mrf.mxu0  ;;  %v1264_v6 = vrot.slane %v1262_v13, 5  ;;  %v1278_v41 = vrot.slane %v1276_v17, 5  ;;  %v4548_v13 = vld [vmem:[%s7464_s0 + $0x214] sm:$0x1] }
  0xfb   :  { %v6195_v7 = vadd.f32 %v2257_v58, %v2170_v14  ;;  %v2462_v0 = vpack.c.b16 %v2451_v22, %v2450_v59  ;;  %v1486_v14 = vrot.slane %v1485_v49, 4  ;;  %v1496_v59 = vshll.u32 %v4500_v25, 16 }
  0xfc   :  { %v1880_v21 = vpop.f32.mrf.mxu2  ;;  %v1284_v22 = vshll.u32 %v4530_v42, 16  ;;  %v1495_v54 = vrot.slane %v1493_v62, 4  ;;  %v1512_v49 = vrot.slane %v1510_v10, 5  ;;  %v4533_v62 = vld [vmem:[%s7464_s0 + $0x19c] sm:$0x1] }
  0xfd   :  { %v1913_v3 = vadd.f32 %v1880_v21, %v1776_v31  ;;  %v1476_v31 = vrot.slane %v1474_v48, 5  ;;  %v1491_v28 = vsel %vm5086_vm3, %v1486_v14, %v1490_v20  ;;  %v1509_v48 = vrot.slane %v1507_v26, 4 }
  0xfe   :  { %v1286_v17 = vrot.slane %v1284_v22, 5 }
  0xff   :  { %v2050_v32 = vadd.f32 %v6156_v53, %v1913_v3  ;;  %v1273_v53 = vor.u32 %v1272_v36, %v1269_v35  ;;  %v1477_v39 = vsel %vm5086_vm3, %v1472_v4, %v1476_v31  ;;  %v1281_v3 = vshrl.u32 %v4530_v42, 16 }
 0x100   :  { %v6210_v30 = vpop.f32.mrf.mxu3 }
 0x101   :  { %4729 = vmatmul.msk.bf16.gmra.mxu2 %vm1610_vm0, %v4705_v44  ;;  %v6213_v50 = vadd.f32 %v2138_v61, %v2050_v32  ;;  %v1260_v44 = vrot.slane %v1259_v29, 4  ;;  %v1274_v55 = vrot.slane %v1273_v53, 4  ;;  %v1498_v32 = vrot.slane %v1496_v59, 5 }
 0x102   :  { %v2141_v58 = vpop.f32.mrf.mxu0  ;;  %v2571_v29 = vunpack.c.l.b16 %v1477_v39  ;;  %v1283_v53 = vrot.slane %v1281_v3, 4 }
 0x103   :  { %v1265_v11 = vsel %vm5086_vm3, %v1260_v44, %v1264_v6  ;;  %v1279_v36 = vsel %vm5086_vm3, %v1274_v55, %v1278_v41  ;;  %v1499_v2 = vor.u32 %v1498_v32, %v1495_v54  ;;  %v1513_v44 = vor.u32 %v1512_v49, %v1509_v48 }
 0x104   :  { %v1883_v19 = vpop.f32.mrf.mxu2  ;;  %v2452_v4 = vunpack.c.l.b16 %v1265_v11  ;;  %v2453_v31 = vunpack.c.l.b16 %v1279_v36  ;;  %v1287_v55 = vor.u32 %v1286_v17, %v1283_v53  ;;  %v1290_v41 = vshll.u32 %v4531_v15, 16  ;;  %v4503_v36 = vld [vmem:[%s7464_s0 + $0x228] sm:$0xf] }
 0x105   :  { %4753 = vmatmul.msk.bf16.gmra.mxu0 %vm1610_vm0, %v2582_v40  ;;  %v1914_v61 = vadd.f32 %v1883_v19, %v5994_v12  ;;  %4742 = vmatmul.msk.bf16.gmra.mxu3 %vm1610_vm0, %v2462_v0  ;;  %v4532_v12 = vld [vmem:[%s7464_s0 + $0x198] sm:$0xf]  ;;  %v2572_v19 = vunpack.c.l.b16 %v1491_v28  ;;  %v1500_v39 = vrot.slane %v1499_v2, 4  ;;  %v1514_v22 = vrot.slane %v1513_v44, 4 }
 0x106   :  { %v1295_v40 = vshrl.u32 %v4532_v12, 16  ;;  %v1298_v43 = vshll.u32 %v4532_v12, 16  ;;  %v2463_v26 = vpack.c.b16 %v2453_v31, %v2452_v4  ;;  %v1288_v28 = vrot.slane %v1287_v55, 4 }
 0x107   :  { %v2051_v21 = vadd.f32 %v6187_v46, %v1914_v61  ;;  %v4922_v46 = vld [vmem:[%s7464_s0 + $0x204] sm:$0xf0]  ;;  %v1502_v61 = vshll.u32 %v4548_v13, 16  ;;  %v1292_v11 = vrot.slane %v1290_v41, 5  ;;  %v1535_v53 = vshrl.u32 %v4503_v36, 16 }
 0x108   :  { %v6231_v1 = vpop.f32.mrf.mxu3  ;;  %v4709_v0 = vor.u32 %v4922_v46, %v4708_v38  ;;  %v1297_v14 = vrot.slane %v1295_v40, 4  ;;  %v1300_v20 = vrot.slane %v1298_v43, 5  ;;  %v4534_v43 = vld [vmem:[%s7464_s0 + $0x1a0] sm:$0xf] }
 0x109   :  { %v6235_v27 = vadd.f32 %v2141_v58, %v2051_v21  ;;  %v4549_v58 = vld [vmem:[%s7464_s0 + $0x21c] sm:$0x1]  ;;  %v2583_v21 = vpack.c.b16 %v2572_v19, %v2571_v29  ;;  %v1504_v3 = vrot.slane %v1502_v61, 5  ;;  %v4923_v29 = vld [vmem:[%s7464_s0 + $0x214] sm:$0xf0]  ;;  %v1309_v19 = vshrl.u32 %v4534_v43, 16 }
 0x10a   :  { %v2143_v35 = vpop.f32.mrf.mxu0  ;;  %v1516_v6 = vshll.u32 %v4549_v58, 16  ;;  %v1301_v12 = vor.u32 %v1300_v20, %v1297_v14  ;;  %v1312_v4 = vshll.u32 %v4534_v43, 16 }
 0x10b   :  { %v1505_v48 = vsel %vm5086_vm3, %v1500_v39, %v1504_v3  ;;  %v4535_v3 = vld [vmem:[%s7464_s0 + $0x1a4] sm:$0x1] }
 0x10c   :  { %v1885_v37 = vpop.f32.mrf.mxu2  ;;  %v1518_v38 = vrot.slane %v1516_v6, 5  ;;  %v1302_v32 = vrot.slane %v1301_v12, 4  ;;  %v1314_v39 = vrot.slane %v1312_v4, 5 }
 0x10d   :  { %v1915_v25 = vadd.f32 %v1885_v37, %v1781_v9  ;;  %v4536_v37 = vld [vmem:[%s7464_s0 + $0x1a8] sm:$0xf] }
 0x10e   :  { %v1519_v49 = vsel %vm5086_vm3, %v1514_v22, %v1518_v38  ;;  %v1323_v2 = vshrl.u32 %v4536_v37, 16  ;;  %v1326_v14 = vshll.u32 %v4536_v37, 16 }
 0x10f   :  { %v2052_v57 = vadd.f32 %v6210_v30, %v1915_v25  ;;  %v1304_v30 = vshll.u32 %v4533_v62, 16  ;;  %v1538_v25 = vshll.u32 %v4503_v36, 16  ;;  %v2574_v61 = vunpack.c.l.b16 %v1519_v49  ;;  %v4550_v62 = vld [vmem:[%s7464_s0 + $0x224] sm:$0x1] }
 0x110   :  { %v6264_v42 = vpop.f32.mrf.mxu3  ;;  %v1325_v22 = vrot.slane %v1323_v2, 4  ;;  %v1328_v38 = vrot.slane %v1326_v14, 5  ;;  %v4504_v2 = vld [vmem:[%s7464_s0 + $0x230] sm:$0xf] }
 0x111   :  { %4730 = vmatmul.msk.bf16.gmra.mxu2 %vm1610_vm0, %v4709_v0  ;;  %v6267_v59 = vadd.f32 %v2143_v35, %v2052_v57  ;;  %v4502_v35 = vld [vmem:[%s7464_s0 + $0x220] sm:$0xf]  ;;  %v1306_v40 = vrot.slane %v1304_v30, 5  ;;  %v2573_v57 = vunpack.c.l.b16 %v1505_v48  ;;  %v1540_v12 = vrot.slane %v1538_v25, 5 }
 0x112   :  { %v2146_v10 = vpop.f32.mrf.mxu0  ;;  %v1521_v13 = vshrl.u32 %v4502_v35, 16  ;;  %v1524_v58 = vshll.u32 %v4502_v35, 16  ;;  %v1311_v30 = vrot.slane %v1309_v19, 4  ;;  %v1530_v35 = vshll.u32 %v4550_v62, 16  ;;  %v4924_v62 = vld [vmem:[%s7464_s0 + $0x224] sm:$0xf0] }
 0x113   :  { %v1307_v15 = vsel %vm5086_vm3, %v1302_v32, %v1306_v40  ;;  %v1329_v48 = vor.u32 %v1328_v38, %v1325_v22 }
 0x114   :  { %v1888_v46 = vpop.f32.mrf.mxu2  ;;  %v1523_v55 = vrot.slane %v1521_v13, 4  ;;  %v1526_v41 = vrot.slane %v1524_v58, 5  ;;  %v1315_v43 = vor.u32 %v1314_v39, %v1311_v30 }
 0x115   :  { %4754 = vmatmul.msk.bf16.gmra.mxu0 %vm1610_vm0, %v2583_v21  ;;  %v1916_v54 = vadd.f32 %v1888_v46, %v5780_v23  ;;  %4743 = vmatmul.msk.bf16.gmra.mxu3 %vm1610_vm0, %v2463_v26  ;;  %v4712_v23 = vld [vmem:[%s7464_s0 + $0x210] sm:$0xf]  ;;  %v1537_v21 = vrot.slane %v1535_v53, 4  ;;  %v2455_v26 = vunpack.c.l.b16 %v1307_v15  ;;  %v4537_v46 = vld [vmem:[%s7464_s0 + $0x1ac] sm:$0x1]  ;;  %v1330_v4 = vrot.slane %v1329_v48, 4 }
 0x116   :  { %v4713_v20 = vor.u32 %v4923_v29, %v4712_v23  ;;  %v1332_v49 = vshll.u32 %v4537_v46, 16  ;;  %v1316_v25 = vrot.slane %v1315_v43, 4  ;;  %v4553_v43 = vld [vmem:[%s7464_s0 + $0x23c] sm:$0x1] }
 0x117   :  { %v2053_v9 = vadd.f32 %v6231_v1, %v1916_v54  ;;  %v1293_v1 = vsel %vm5086_vm3, %v1288_v28, %v1292_v11  ;;  %v2584_v28 = vpack.c.b16 %v2574_v61, %v2573_v57  ;;  %v1527_v54 = vor.u32 %v1526_v41, %v1523_v55 }
 0x118   :  { %v2030_v0 = vpop.f32.mrf.mxu3  ;;  %v2454_v6 = vunpack.c.l.b16 %v1293_v1  ;;  %v1541_v40 = vor.u32 %v1540_v12, %v1537_v21  ;;  %v1532_v1 = vrot.slane %v1530_v35, 5  ;;  %v1334_v15 = vrot.slane %v1332_v49, 5 }
 0x119   :  { %v6297_v17 = vadd.f32 %v2146_v10, %v2053_v9  ;;  %v4551_v10 = vld [vmem:[%s7464_s0 + $0x22c] sm:$0x1]  ;;  %v1318_v9 = vshll.u32 %v4535_v3, 16  ;;  %v1528_v29 = vrot.slane %v1527_v54, 4  ;;  %v1549_v41 = vshrl.u32 %v4504_v2, 16 }
 0x11a   :  { %v6299_v31 = vpop.f32.mrf.mxu0  ;;  %v1544_v36 = vshll.u32 %v4551_v10, 16  ;;  %v2464_v32 = vpack.c.b16 %v2455_v26, %v2454_v6  ;;  %v1542_v53 = vrot.slane %v1541_v40, 4  ;;  %v4716_v6 = vld [vmem:[%s7464_s0 + $0x220] sm:$0xf]  ;;  %v1335_v26 = vsel %vm5086_vm3, %v1330_v4, %v1334_v15  ;;  %v4552_v40 = vld [vmem:[%s7464_s0 + $0x234] sm:$0x1] }
 0x11b   :  { %v1320_v19 = vrot.slane %v1318_v9, 5  ;;  %v1552_v10 = vshll.u32 %v4504_v2, 16  ;;  %v4717_v3 = vor.u32 %v4924_v62, %v4716_v6  ;;  %v1551_v54 = vrot.slane %v1549_v41, 4  ;;  %v4720_v6 = vld [vmem:[%s7464_s0 + $0x230] sm:$0xf] }
 0x11c   :  { %v6303_v44 = vpop.f32.mrf.mxu2  ;;  %v1546_v13 = vrot.slane %v1544_v36, 5 }
 0x11d   :  { %v1321_v55 = vsel %vm5086_vm3, %v1316_v25, %v1320_v19  ;;  %v1554_v35 = vrot.slane %v1552_v10, 5 }
 0x11e   :  { %v2456_v46 = vunpack.c.l.b16 %v1321_v55 }
 0x120   :  { %v6317_v11 = vpop.f32.mrf.mxu3 }
 0x121   :  { %4731 = vmatmul.msk.bf16.gmra.mxu2 %vm1610_vm0, %v4713_v20  ;;  %v4505_v20 = vld [vmem:[%s7464_s0 + $0x238] sm:$0xf] }
 0x122   :  { %v2151_v23 = vpop.f32.mrf.mxu0  ;;  %v1563_v12 = vshrl.u32 %v4505_v20, 16  ;;  %v1566_v30 = vshll.u32 %v4505_v20, 16 }
 0x124   :  { %v1893_v37 = vpop.f32.mrf.mxu2  ;;  %v1565_v36 = vrot.slane %v1563_v12, 4 }
 0x125   :  { %4755 = vmatmul.msk.bf16.gmra.mxu0 %vm1610_vm0, %v2584_v28  ;;  %v1918_v58 = vadd.f32 %v1893_v37, %v5862_v8  ;;  %4744 = vmatmul.msk.bf16.gmra.mxu3 %vm1610_vm0, %v2464_v32  ;;  %v1533_v8 = vsel %vm5086_vm3, %v1528_v29, %v1532_v1  ;;  %v2457_v28 = vunpack.c.l.b16 %v1335_v26  ;;  %v1568_v32 = vrot.slane %v1566_v30, 5 }
 0x126   :  { %v2575_v22 = vunpack.c.l.b16 %v1533_v8  ;;  %v1555_v37 = vor.u32 %v1554_v35, %v1551_v54  ;;  %v1558_v29 = vshll.u32 %v4552_v40, 16 }
 0x127   :  { %v2055_v14 = vadd.f32 %v2030_v0, %v1918_v58  ;;  %v1547_v0 = vsel %vm5086_vm3, %v1542_v53, %v1546_v13  ;;  %v2465_v48 = vpack.c.b16 %v2457_v28, %v2456_v46  ;;  %v1569_v1 = vor.u32 %v1568_v32, %v1565_v36 }
 0x128   :  { %v2035_v57 = vpop.f32.mrf.mxu3  ;;  %v2576_v38 = vunpack.c.l.b16 %v1547_v0  ;;  %v1572_v13 = vshll.u32 %v4553_v43, 16  ;;  %v1556_v25 = vrot.slane %v1555_v37, 4  ;;  %v1560_v19 = vrot.slane %v1558_v29, 5  ;;  %v2259_v29 = vpop.f32.mrf.mxu1 }
 0x129   :  { %v6331_v61 = vadd.f32 %v2151_v23, %v2055_v14  ;;  %v1570_v4 = vrot.slane %v1569_v1, 4 }
 0x12a   :  { %v6343_v21 = vpop.f32.mrf.mxu0  ;;  %v2585_v23 = vpack.c.b16 %v2576_v38, %v2575_v22  ;;  %v1574_v15 = vrot.slane %v1572_v13, 5  ;;  %v1561_v62 = vsel %vm5086_vm3, %v1556_v25, %v1560_v19 }
 0x12b   :  { %v2577_v41 = vunpack.c.l.b16 %v1561_v62 }
 0x12c   :  { %v6347_v39 = vpop.f32.mrf.mxu2  ;;  %v1575_v0 = vsel %vm5086_vm3, %v1570_v4, %v1574_v15 }
 0x12d   :  { %v2578_v26 = vunpack.c.l.b16 %v1575_v0  ;;  %v4938_v0 = vld [vmem:[%s7469_s5 + $0x18] sm:$0xff] }
 0x12e   :  { %3116 = vmatpush.bf16.msra.mxu1 %v4938_v0  ;;  %v1917_v0 = vadd.f32 %v6303_v44, %v5819_v5  ;;  %v2292_v5 = vadd.f32 %v2259_v29, %v6213_v50 }
 0x12f   :  { %v2586_v12 = vpack.c.b16 %v2578_v26, %v2577_v41 }
 0x130   :  { %v6355_v9 = vpop.f32.mrf.mxu3  ;;  %v2262_v15 = vpop.f32.mrf.mxu1 }
 0x131   :  { %4732 = vmatmul.msk.bf16.gmra.mxu2 %vm1610_vm0, %v4717_v3 }
 0x132   :  { %v2156_v49 = vpop.f32.mrf.mxu0 }
 0x134   :  { %v1898_v58 = vpop.f32.mrf.mxu2 }
 0x135   :  { %4756 = vmatmul.msk.bf16.gmra.mxu0 %vm1610_vm0, %v2585_v23  ;;  %v1920_v53 = vadd.f32 %v1898_v58, %v5950_v24  ;;  %4745 = vmatmul.msk.bf16.gmra.mxu3 %vm1610_vm0, %v2465_v48  ;;  %v4925_v24 = vld [vmem:[%s7464_s0 + $0x234] sm:$0xf0]  ;;  %s4992_s0 = smov 128  }
 0x136   :  { %v4721_v55 = vor.u32 %v4925_v24, %v4720_v6 }
 0x137   :  { %v2057_v2 = vadd.f32 %v2035_v57, %v1920_v53 }
 0x138   :  { %v2040_v14 = vpop.f32.mrf.mxu3  ;;  %v2264_v62 = vpop.f32.mrf.mxu1 }
 0x139   :  { %v6361_v20 = vadd.f32 %v2156_v49, %v2057_v2 }
 0x13a   :  { %v6363_v8 = vpop.f32.mrf.mxu0 }
 0x13c   :  { %v6375_v57 = vpop.f32.mrf.mxu2 }
 0x140   :  { %v6377_v10 = vpop.f32.mrf.mxu3 }
 0x141   :  { %7475 = vst [vmem:[#allocation6_spill] sm:$0xff] %v6377_v10  ;;  %4733 = vmatmul.msk.bf16.gmra.mxu2 %vm1610_vm0, %v4721_v55  ;;  %v1919_v10 = vadd.f32 %v6347_v39, %v5918_v56 }
 0x142   :  { %v2161_v30 = vpop.f32.mrf.mxu0 }
 0x143   :  { %v2056_v44 = vadd.f32 %v6317_v11, %v1919_v10 }
 0x144   :  { %v1903_v3 = vpop.f32.mrf.mxu2 }
 0x145   :  { %4757 = vmatmul.msk.bf16.gmra.mxu0 %vm1610_vm0, %v2586_v12  ;;  %v1922_v22 = vadd.f32 %v1903_v3, %v6000_v63 }
 0x147   :  { %v2059_v38 = vadd.f32 %v2040_v14, %v1922_v22 }
 0x148   :  { %v2505_v46 = vpop.f32.mrf.mxu3 }
 0x149   :  { %v6382_v34 = vadd.f32 %v2161_v30, %v2059_v38  ;;  %v2267_v30 = vpop.f32.mrf.mxu1 }
 0x14a   :  { %v6384_v28 = vpop.f32.mrf.mxu0  ;;  %v2295_v10 = vadd.f32 %v2267_v30, %v6297_v17 }
 0x14b   :  { %7476 = vst [vmem:[#allocation7_spill] sm:$0xff] %v6382_v34 }
 0x14c   :  { %7477 = vst [vmem:[#allocation8_spill] sm:$0xff] %v6384_v28  ;;  %v6386_v54 = vpop.f32.mrf.mxu2 }
 0x150   :  { %v2507_v35 = vpop.f32.mrf.mxu3 }
 0x152   :  { %v2626_v36 = vpop.f32.mrf.mxu0 }
 0x154   :  { %v2384_v32 = vpop.f32.mrf.mxu2 }
 0x155   :  { %v2424_v40 = vadd.f32 %v2384_v32, %v6085_v18 }
 0x157   :  { %v2545_v43 = vadd.f32 %v2505_v46, %v2424_v40  ;;  %v2269_v46 = vpop.f32.mrf.mxu1 }
 0x158   :  { %v2510_v23 = vpop.f32.mrf.mxu3 }
 0x159   :  { %v6389_v48 = vadd.f32 %v2626_v36, %v2545_v43 }
 0x15a   :  { %v2628_v49 = vpop.f32.mrf.mxu0 }
 0x15b   :  { %v2720_v17 = vmul.f32 %v6389_v48, %v6389_v48 }
 0x15c   :  { %v2386_v37 = vpop.f32.mrf.mxu2 }
 0x160   :  { %v2512_v63 = vpop.f32.mrf.mxu3 }
 0x162   :  { %v2631_v1 = vpop.f32.mrf.mxu0 }
 0x164   :  { %v2389_v13 = vpop.f32.mrf.mxu2 }
 0x165   :  { %v2426_v58 = vadd.f32 %v2389_v13, %v6139_v33 }
 0x167   :  { %v2547_v53 = vadd.f32 %v2510_v23, %v2426_v58  ;;  %v2272_v23 = vpop.f32.mrf.mxu1 }
 0x168   :  { %v2515_v25 = vpop.f32.mrf.mxu3 }
 0x169   :  { %v6392_v19 = vadd.f32 %v2631_v1, %v2547_v53 }
 0x16a   :  { %v6394_v4 = vpop.f32.mrf.mxu0 }
 0x16c   :  { %v2391_v18 = vpop.f32.mrf.mxu2 }
 0x170   :  { %v2517_v2 = vpop.f32.mrf.mxu3 }
 0x172   :  { %v2636_v14 = vpop.f32.mrf.mxu0 }
 0x174   :  { %v2394_v6 = vpop.f32.mrf.mxu2 }
 0x175   :  { %v2428_v24 = vadd.f32 %v2394_v6, %v6195_v7 }
 0x177   :  { %v2549_v55 = vadd.f32 %v2515_v25, %v2428_v24  ;;  %v2274_v25 = vpop.f32.mrf.mxu1  ;;  %v2288_v24 = vadd.f32 %v6081_v52, %v6103_v45 }
 0x178   :  { %v6400_v33 = vpop.f32.mrf.mxu3 }
 0x179   :  { %v6402_v41 = vadd.f32 %v2636_v14, %v2549_v55  ;;  %v2425_v28 = vadd.f32 %v2386_v37, %v2288_v24 }
 0x17a   :  { %v6404_v26 = vpop.f32.mrf.mxu0 }
 0x17b   :  { %v2546_v52 = vadd.f32 %v2507_v35, %v2425_v28  ;;  %v2294_v28 = vadd.f32 %v2264_v62, %v6267_v59  ;;  %v2722_v62 = vmul.f32 %v6392_v19, %v6392_v19 }
 0x17c   :  { %v2396_v12 = vpop.f32.mrf.mxu2 }
 0x17d   :  { %v2429_v24 = vadd.f32 %v2396_v12, %v2292_v5 }
 0x17f   :  { %v2277_v34 = vpop.f32.mrf.mxu1  ;;  %v2550_v29 = vadd.f32 %v2517_v2, %v2429_v24 }
 0x180   :  { %v6406_v3 = vpop.f32.mrf.mxu3 }
 0x182   :  { %v6408_v22 = vpop.f32.mrf.mxu0 }
 0x184   :  { %v2399_v7 = vpop.f32.mrf.mxu2 }
 0x187   :  { %v2279_v35 = vpop.f32.mrf.mxu1 }
 0x188   :  { %v6410_v38 = vpop.f32.mrf.mxu3 }
 0x18a   :  { %v6412_v36 = vpop.f32.mrf.mxu0 }
 0x18c   :  { %v2401_v32 = vpop.f32.mrf.mxu2 }
 0x18d   :  { %v2431_v59 = vadd.f32 %v2401_v32, %v2294_v28 }
 0x190   :  { %v6416_v43 = vpop.f32.mrf.mxu3 }
 0x192   :  { %v6414_v40 = vpop.f32.mrf.mxu0 }
 0x193   :  { %7478 = vst [vmem:[#allocation9_spill] sm:$0xff] %v6414_v40 }
 0x194   :  { %v2404_v1 = vpop.f32.mrf.mxu2 }
 0x198   :  { %v6420_v53 = vpop.f32.mrf.mxu3 }
 0x199   :  { %7480 = vst [vmem:[#allocation11_spill] sm:$0xff] %v6420_v53  ;;  %v2054_v53 = vadd.f32 %v6264_v42, %v1917_v0  ;;  %v2177_v42 = vadd.f32 %v6343_v21, %v2056_v44 }
 0x19a   :  { %v6418_v13 = vpop.f32.mrf.mxu0 }
 0x19b   :  { %7479 = vst [vmem:[#allocation10_spill] sm:$0xff] %v6418_v13  ;;  %v2290_v13 = vadd.f32 %v6150_v60, %v6159_v16  ;;  %v2175_v39 = vadd.f32 %v6299_v31, %v2054_v53  ;;  %v2293_v60 = vadd.f32 %v2262_v15, %v6235_v27  ;;  %v6444_v16 = vadd.f32 %v2628_v49, %v2546_v52 }
 0x19c   :  { %v2406_v58 = vpop.f32.mrf.mxu2  ;;  %v2297_v31 = vadd.f32 %v2272_v23, %v6331_v61  ;;  %v2432_v15 = vadd.f32 %v2404_v1, %v2295_v10  ;;  %v2736_v23 = vsel %vm2682_vm4, %v2720_v17, 0.0  ;;  %v2739_v1 = vsel %vm2682_vm4, %v2722_v62, 0.0  ;;  %v7485_v17 = vld [vmem:[#allocation7_spill] sm:$0xff] }
 0x19d   :  { %v2427_v45 = vadd.f32 %v2391_v18, %v2290_v13  ;;  %v2430_v11 = vadd.f32 %v2399_v7, %v2293_v60  ;;  %v2721_v21 = vmul.f32 %v6444_v16, %v6444_v16  ;;  %v2684_v2 = vsel %vm2682_vm4, %v6444_v16, 0.0 }
 0x19f   :  { %v2551_v12 = vadd.f32 %v6400_v33, %v2430_v11  ;;  %v2737_v7 = vsel %vm2682_vm4, %v2721_v21, 0.0  ;;  %v2552_v33 = vadd.f32 %v6406_v3, %v2431_v59 }
 0x1a0   :  { %v6428_v55 = vpop.f32.mrf.mxu3 }
 0x1a1   :  { %v6498_v5 = vadd.f32 %v6412_v36, %v2552_v33 }
 0x1a2   :  { %v6422_v14 = vpop.f32.mrf.mxu0 }
 0x1a3   :  { %7481 = vst [vmem:[#allocation12_spill] sm:$0xff] %v6422_v14  ;;  %v1921_v14 = vadd.f32 %v6375_v57, %v5981_v47  ;;  %v2548_v47 = vadd.f32 %v2512_v63, %v2427_v45  ;;  %v2298_v63 = vadd.f32 %v2274_v25, %v2177_v42  ;;  %v2738_v25 = vadd.f32 %v2737_v7, %v2736_v23 }
 0x1a4   :  { %v2409_v6 = vpop.f32.mrf.mxu2  ;;  %v2727_v21 = vmul.f32 %v6498_v5, %v6498_v5 }
 0x1a5   :  { %v2058_v56 = vadd.f32 %v6355_v9, %v1921_v14  ;;  %v2296_v9 = vadd.f32 %v2269_v46, %v2175_v39  ;;  %v6458_v49 = vadd.f32 %v6394_v4, %v2548_v47  ;;  %v1923_v4 = vadd.f32 %v6386_v54, %v6035_v51  ;;  %v7482_v39 = vld [vmem:[#allocation9_spill] sm:$0xff] }
 0x1a6   :  { %v2686_v46 = vsel %vm2682_vm4, %v6392_v19, 0.0  ;;  %v2724_v54 = vmul.f32 %v6402_v41, %v6402_v41  ;;  %v2434_v53 = vadd.f32 %v2409_v6, %v2297_v31  ;;  %v7484_v31 = vld [vmem:[#allocation10_spill] sm:$0xff]  ;;  %v2749_v23 = vsel %vm2682_vm4, %v2727_v21, 0.0 }
 0x1a7   :  { %v2179_v50 = vadd.f32 %v6363_v8, %v2058_v56  ;;  %v2299_v8 = vadd.f32 %v2277_v34, %v6361_v20  ;;  %v2683_v20 = vsel %vm2682_vm4, %v6389_v48, 0.0  ;;  %v6473_v34 = vadd.f32 %v6404_v26, %v2550_v29 }
 0x1a8   :  { %v6447_v57 = vpop.f32.mrf.mxu3  ;;  %v2433_v30 = vadd.f32 %v2406_v58, %v2296_v9  ;;  %v2723_v32 = vmul.f32 %v6458_v49, %v6458_v49  ;;  %v2685_v51 = vadd.f32 %v2684_v2, %v2683_v20  ;;  %v2553_v26 = vadd.f32 %v6410_v38, %v2432_v15 }
 0x1a9   :  { %v2300_v18 = vadd.f32 %v2279_v35, %v2179_v50  ;;  %v2688_v13 = vsel %vm2682_vm4, %v6458_v49, 0.0  ;;  %v6489_v58 = vadd.f32 %v6408_v22, %v2551_v12  ;;  %v2725_v3 = vmul.f32 %v6473_v34, %v6473_v34  ;;  %v7483_v50 = vld [vmem:[#allocation11_spill] sm:$0xff] }
 0x1aa   :  { %v6437_v40 = vpop.f32.mrf.mxu0  ;;  %v2687_v14 = vadd.f32 %v2686_v46, %v2685_v51  ;;  %v2554_v0 = vadd.f32 %v6416_v43, %v2433_v30  ;;  %v2741_v45 = vsel %vm2682_vm4, %v2723_v32, 0.0  ;;  %v2690_v38 = vsel %vm2682_vm4, %v6402_v41, 0.0  ;;  %v2282_v43 = vpop.f32.mrf.mxu1  ;;  %v7486_v20 = vld [vmem:[#allocation12_spill] sm:$0xff]  ;;  %v7487_v46 = vld [vmem:[#allocation6_spill] sm:$0xff] }
 0x1ab   :  { %v2740_v22 = vadd.f32 %v2739_v1, %v2738_v25  ;;  %v2743_v6 = vsel %vm2682_vm4, %v2724_v54, 0.0  ;;  %v6502_v24 = vadd.f32 %v7482_v39, %v2553_v26  ;;  %v2692_v42 = vsel %vm2682_vm4, %v6473_v34, 0.0 }
 0x1ac   :  { %v2411_v37 = vpop.f32.mrf.mxu2  ;;  %v2689_v56 = vadd.f32 %v2688_v13, %v2687_v14  ;;  %v2726_v28 = vmul.f32 %v6489_v58, %v6489_v58  ;;  %v2555_v36 = vadd.f32 %v7483_v50, %v2434_v53  ;;  %v2745_v9 = vsel %vm2682_vm4, %v2725_v3, 0.0 }
 0x1ad   :  { %v2435_v44 = vadd.f32 %v2411_v37, %v2298_v63  ;;  %v2742_v37 = vadd.f32 %v2741_v45, %v2740_v22  ;;  %v6511_v35 = vadd.f32 %v7484_v31, %v2554_v0  ;;  %v2694_v29 = vsel %vm2682_vm4, %v6489_v58, 0.0  ;;  %v7488_v45 = vld [vmem:[#allocation8_spill] sm:$0xff] }
 0x1ae   :  { %v2691_v10 = vadd.f32 %v2690_v38, %v2689_v56  ;;  %v2301_v15 = vadd.f32 %v2282_v43, %v7485_v17  ;;  %v2747_v62 = vsel %vm2682_vm4, %v2726_v28, 0.0  ;;  %v2696_v12 = vsel %vm2682_vm4, %v6498_v5, 0.0 }
 0x1af   :  { %v2556_v59 = vadd.f32 %v6428_v55, %v2435_v44  ;;  %v2744_v2 = vadd.f32 %v2743_v6, %v2742_v37  ;;  %v6525_v30 = vadd.f32 %v7486_v20, %v2555_v36  ;;  %v2060_v55 = vadd.f32 %v7487_v46, %v1923_v4 }
 0x1b0   :  { %v2537_v52 = vpop.f32.mrf.mxu3  ;;  %v2729_v33 = vmul.f32 %v6511_v35, %v6511_v35  ;;  %v2698_v51 = vsel %vm2682_vm4, %v6502_v24, 0.0  ;;  %v2700_v25 = vsel %vm2682_vm4, %v6511_v35, 0.0 }
 0x1b1   :  { %v6535_v54 = vadd.f32 %v6437_v40, %v2556_v59  ;;  %v2730_v14 = vmul.f32 %v6525_v30, %v6525_v30  ;;  %v2181_v40 = vadd.f32 %v7488_v45, %v2060_v55  ;;  %v2702_v56 = vsel %vm2682_vm4, %v6525_v30, 0.0 }
 0x1b2   :  { %v6453_v27 = vpop.f32.mrf.mxu0  ;;  %v2753_v44 = vsel %vm2682_vm4, %v2729_v33, 0.0  ;;  %v2284_v43 = vpop.f32.mrf.mxu1 }
 0x1b3   :  { %v2731_v6 = vmul.f32 %v6535_v54, %v6535_v54  ;;  %v2755_v28 = vsel %vm2682_vm4, %v2730_v14, 0.0  ;;  %v2704_v50 = vsel %vm2682_vm4, %v6535_v54, 0.0 }
 0x1b4   :  { %v2414_v61 = vpop.f32.mrf.mxu2 }
 0x1b5   :  { %v2436_v11 = vadd.f32 %v2414_v61, %v2299_v8  ;;  %v2693_v8 = vadd.f32 %v2692_v42, %v2691_v10  ;;  %v2728_v61 = vmul.f32 %v6502_v24, %v6502_v24 }
 0x1b7   :  { %v2557_v7 = vadd.f32 %v6447_v57, %v2436_v11  ;;  %v2695_v32 = vadd.f32 %v2694_v29, %v2693_v8  ;;  %v2751_v57 = vsel %vm2682_vm4, %v2728_v61, 0.0 }
 0x1b8   :  { %v2540_v53 = vpop.f32.mrf.mxu3 }
 0x1b9   :  { %v2697_v13 = vadd.f32 %v2696_v12, %v2695_v32  ;;  %v6543_v3 = vadd.f32 %v6453_v27, %v2557_v7 }
 0x1ba   :  { %v2658_v60 = vpop.f32.mrf.mxu0 }
 0x1bb   :  { %v2732_v36 = vmul.f32 %v6543_v3, %v6543_v3  ;;  %v2706_v31 = vsel %vm2682_vm4, %v6543_v3, 0.0 }
 0x1bc   :  { %v2416_v47 = vpop.f32.mrf.mxu2 }
 0x1bd   :  { %v2437_v63 = vadd.f32 %v2416_v47, %v2300_v18  ;;  %v2746_v18 = vadd.f32 %v2745_v9, %v2744_v2  ;;  %v2302_v9 = vadd.f32 %v2284_v43, %v2181_v40  ;;  %v2759_v17 = vsel %vm2682_vm4, %v2732_v36, 0.0 }
 0x1be   :  { %v4989_v36 = vmov 0.0  }
 0x1bf   :  { %v2558_v26 = vadd.f32 %v2537_v52, %v2437_v63  ;;  %v2748_v1 = vadd.f32 %v2747_v62, %v2746_v18  ;;  %v2699_v52 = vadd.f32 %v2698_v51, %v2697_v13  ;;  %2884 = vst.msk [vmem:[#allocation2 + $0x120] sm:$0xff] %vm2682_vm4, %v4989_v36 }
 0x1c0   :  { %v2542_v12 = vpop.f32.mrf.mxu3  ;;  %2885 = vst.msk [vmem:[#allocation2 + $0x128] sm:$0x3] %vm2848_vm5, %v4989_v36 }
 0x1c1   :  { %v2750_v38 = vadd.f32 %v2749_v23, %v2748_v1  ;;  %v6551_v39 = vadd.f32 %v2658_v60, %v2558_v26  ;;  %v2701_v42 = vadd.f32 %v2700_v25, %v2699_v52  ;;  %v2757_v60 = vsel %vm2682_vm4, %v2731_v6, 0.0  ;;  %2847 = vst.msk [vmem:[#allocation2] sm:$0xff] %vm2682_vm4, %v4989_v36 }
 0x1c2   :  { %v2661_v22 = vpop.f32.mrf.mxu0  ;;  %2849 = vst.msk [vmem:[#allocation2 + $0x8] sm:$0x3] %vm2848_vm5, %v4989_v36 }
 0x1c3   :  { %v2752_v27 = vadd.f32 %v2751_v57, %v2750_v38  ;;  %v2703_v10 = vadd.f32 %v2702_v56, %v2701_v42  ;;  %v2733_v29 = vmul.f32 %v6551_v39, %v6551_v39  ;;  %2850 = vst.msk [vmem:[#allocation2 + $0x10] sm:$0xff] %vm2682_vm4, %v4989_v36 }
 0x1c4   :  { %v2419_v4 = vpop.f32.mrf.mxu2  ;;  %2851 = vst.msk [vmem:[#allocation2 + $0x18] sm:$0x3] %vm2848_vm5, %v4989_v36 }
 0x1c5   :  { %v2438_v0 = vadd.f32 %v2419_v4, %v2301_v15  ;;  %v2754_v37 = vadd.f32 %v2753_v44, %v2752_v27  ;;  %v2705_v59 = vadd.f32 %v2704_v50, %v2703_v10  ;;  %v2708_v15 = vsel %vm2682_vm4, %v6551_v39, 0.0  ;;  %2852 = vst.msk [vmem:[#allocation2 + $0x20] sm:$0xff] %vm2682_vm4, %v4989_v36  ;;  %v4937_v10 = vld [vmem:[%s7469_s5 + $0x10] sm:$0xff] }
 0x1c6   :  { %v2761_v20 = vsel %vm2682_vm4, %v2733_v29, 0.0  ;;  %2853 = vst.msk [vmem:[#allocation2 + $0x28] sm:$0x3] %vm2848_vm5, %v4989_v36  ;;  %v4942_v29 = vld [vmem:[%s7469_s5 + $0x38] sm:$0xff]  ;;  %3117 = vmatpush.bf16.msra.mxu1 %v4937_v10 }
 0x1c7   :  { %v2559_v47 = vadd.f32 %v2540_v53, %v2438_v0  ;;  %v2756_v21 = vadd.f32 %v2755_v28, %v2754_v37  ;;  %v2707_v62 = vadd.f32 %v2706_v31, %v2705_v59  ;;  %2854 = vst.msk [vmem:[#allocation2 + $0x30] sm:$0xff] %vm2682_vm4, %v4989_v36  ;;  %v4935_v59 = vld [vmem:[%s7469_s5] sm:$0xff]  ;;  %3411 = vmatpush.bf16.msrb.mxu0 %v4942_v29 }
 0x1c8   :  { %2855 = vst.msk [vmem:[#allocation2 + $0x38] sm:$0x3] %vm2848_vm5, %v4989_v36 }
 0x1c9   :  { %v6558_v11 = vadd.f32 %v2661_v22, %v2559_v47  ;;  %v2758_v61 = vadd.f32 %v2757_v60, %v2756_v21  ;;  %v2709_v18 = vadd.f32 %v2708_v15, %v2707_v62  ;;  %v4940_v60 = vld [vmem:[%s7469_s5 + $0x28] sm:$0xff]  ;;  %2856 = vst.msk [vmem:[#allocation2 + $0x40] sm:$0xff] %vm2682_vm4, %v4989_v36 }
 0x1ca   :  { %v2663_v32 = vpop.f32.mrf.mxu0  ;;  %2857 = vst.msk [vmem:[#allocation2 + $0x48] sm:$0x3] %vm2848_vm5, %v4989_v36  ;;  %3298 = vmatpush.bf16.msrb.mxu3 %v4940_v60  ;;  %v2905_v60 = vld [vmem:[#allocation2] sm:$0xff] }
 0x1cb   :  { %v2734_v2 = vmul.f32 %v6558_v11, %v6558_v11  ;;  %v2710_v7 = vsel %vm2682_vm4, %v6558_v11, 0.0  ;;  %v2760_v55 = vadd.f32 %v2759_v17, %v2758_v61  ;;  %v4941_v17 = vld [vmem:[%s7469_s5 + $0x30] sm:$0xff]  ;;  %2858 = vst.msk [vmem:[#allocation2 + $0x50] sm:$0xff] %vm2682_vm4, %v4989_v36  ;;  %v2777_v61 = vld [vmem:[%s7467_s3] sm:$0x1] }
 0x1cc   :  { %v2421_v63 = vpop.f32.mrf.mxu2  ;;  %v2711_v26 = vadd.f32 %v2710_v7, %v2709_v18  ;;  %2859 = vst.msk [vmem:[#allocation2 + $0x58] sm:$0x3] %vm2848_vm5, %v4989_v36  ;;  %3412 = vmatpush.bf16.msrb.mxu0 %v4941_v17 }
 0x1cd   :  { %v2439_v8 = vadd.f32 %v2421_v63, %v2302_v9  ;;  %v2763_v33 = vsel %vm2682_vm4, %v2734_v2, 0.0  ;;  %v2762_v51 = vadd.f32 %v2761_v20, %v2760_v55  ;;  %v4936_v9 = vld [vmem:[%s7469_s5 + $0x8] sm:$0xff]  ;;  %v4939_v63 = vld [vmem:[%s7469_s5 + $0x20] sm:$0xff]  ;;  %2860 = vst.msk [vmem:[#allocation2 + $0x60] sm:$0xff] %vm2682_vm4, %v4989_v36 }
 0x1ce   :  { %3201 = vmatpush.bf16.msrb.mxu2 %v4936_v9  ;;  %2861 = vst.msk [vmem:[#allocation2 + $0x68] sm:$0x3] %vm2848_vm5, %v4989_v36  ;;  %3299 = vmatpush.bf16.msrb.mxu3 %v4939_v63  ;;  %v4944_v20 = vld [vmem:[%s7469_s5 + $0x48] sm:$0xff] }
 0x1cf   :  { %v2560_v46 = vadd.f32 %v2542_v12, %v2439_v8  ;;  %v2764_v57 = vadd.f32 %v2763_v33, %v2762_v51  ;;  %2862 = vst.msk [vmem:[#allocation2 + $0x70] sm:$0xff] %vm2682_vm4, %v4989_v36  ;;  %3524 = vmatpush.bf16.msrb.mxu1 %v4944_v20  ;;  %v2921_v9 = vld [vmem:[#allocation2 + $0x1] sm:$0xff] }
 0x1d0   :  { %2863 = vst.msk [vmem:[#allocation2 + $0x78] sm:$0x3] %vm2848_vm5, %v4989_v36 }
 0x1d1   :  { %v6574_v23 = vadd.f32 %v2663_v32, %v2560_v46  ;;  %2864 = vst.msk [vmem:[#allocation2 + $0x80] sm:$0xff] %vm2682_vm4, %v4989_v36  ;;  %v2790_v46 = vld [vmem:[%s7468_s4] sm:$0x1] }
 0x1d2   :  { %3202 = vmatpush.bf16.msrb.mxu2 %v4935_v59  ;;  %2865 = vst.msk [vmem:[#allocation2 + $0x88] sm:$0x3] %vm2848_vm5, %v4989_v36 }
 0x1d3   :  { %v2712_v1 = vsel %vm2682_vm4, %v6574_v23, 0.0  ;;  %v2735_v13 = vmul.f32 %v6574_v23, %v6574_v23  ;;  %2866 = vst.msk [vmem:[#allocation2 + $0x90] sm:$0xff] %vm2682_vm4, %v4989_v36 }
 0x1d4   :  { %v2713_v53 = vadd.f32 %v2712_v1, %v2711_v26  ;;  %2867 = vst.msk [vmem:[#allocation2 + $0x98] sm:$0x3] %vm2848_vm5, %v4989_v36 }
 0x1d5   :  { %v2765_v4 = vsel %vm2682_vm4, %v2735_v13, 0.0  ;;  %2868 = vst.msk [vmem:[#allocation2 + $0xa0] sm:$0xff] %vm2682_vm4, %v4989_v36 }
 0x1d6   :  { %v2714_v25 = vrot.slane %v2713_v53, 4  ;;  %v2766_v14 = vadd.f32 %v2765_v4, %v2764_v57  ;;  %2869 = vst.msk [vmem:[#allocation2 + $0xa8] sm:$0x3] %vm2848_vm5, %v4989_v36 }
 0x1d7   :  { %2870 = vst.msk [vmem:[#allocation2 + $0xb0] sm:$0xff] %vm2682_vm4, %v4989_v36 }
 0x1d8   :  { %v2715_v0 = vadd.f32 %v2714_v25, %v2713_v53  ;;  %v2767_v45 = vrot.slane %v2766_v14, 4  ;;  %2871 = vst.msk [vmem:[#allocation2 + $0xb8] sm:$0x3] %vm2848_vm5, %v4989_v36 }
 0x1d9   :  { %2872 = vst.msk [vmem:[#allocation2 + $0xc0] sm:$0xff] %vm2682_vm4, %v4989_v36 }
 0x1da   :  { %v2716_v40 = vrot.slane %v2715_v0, 2  ;;  %v2768_v38 = vadd.f32 %v2767_v45, %v2766_v14  ;;  %2873 = vst.msk [vmem:[#allocation2 + $0xc8] sm:$0x3] %vm2848_vm5, %v4989_v36 }
 0x1db   :  { %2874 = vst.msk [vmem:[#allocation2 + $0xd0] sm:$0xff] %vm2682_vm4, %v4989_v36 }
 0x1dc   :  { %v2717_v52 = vadd.f32 %v2716_v40, %v2715_v0  ;;  %v2769_v44 = vrot.slane %v2768_v38, 2  ;;  %2875 = vst.msk [vmem:[#allocation2 + $0xd8] sm:$0x3] %vm2848_vm5, %v4989_v36 }
 0x1dd   :  { %2876 = vst.msk [vmem:[#allocation2 + $0xe0] sm:$0xff] %vm2682_vm4, %v4989_v36 }
 0x1de   :  { %v2718_v22 = vrot.slane %v2717_v52, 1  ;;  %v2770_v56 = vadd.f32 %v2769_v44, %v2768_v38  ;;  %2877 = vst.msk [vmem:[#allocation2 + $0xe8] sm:$0x3] %vm2848_vm5, %v4989_v36 }
 0x1df   :  { %2878 = vst.msk [vmem:[#allocation2 + $0xf0] sm:$0xff] %vm2682_vm4, %v4989_v36 }
 0x1e0   :  { %v2719_v6 = vadd.f32 %v2718_v22, %v2717_v52  ;;  %v2771_v47 = vrot.slane %v2770_v56, 1  ;;  %2879 = vst.msk [vmem:[#allocation2 + $0xf8] sm:$0x3] %vm2848_vm5, %v4989_v36 }
 0x1e1   :  { %2880 = vst.msk [vmem:[#allocation2 + $0x100] sm:$0xff] %vm2682_vm4, %v4989_v36 }
 0x1e2   :  { %v2772_v43 = vadd.f32 %v2771_v47, %v2770_v56  ;;  %v2773_v27 = vmul.f32 0.0078125, %v2719_v6  ;;  %2881 = vst.msk [vmem:[#allocation2 + $0x108] sm:$0x3] %vm2848_vm5, %v4989_v36 }
 0x1e3   :  { %2882 = vst.msk [vmem:[#allocation2 + $0x110] sm:$0xff] %vm2682_vm4, %v4989_v36 }
 0x1e4   :  { %v2774_v42 = vmul.f32 0.0078125, %v2772_v43  ;;  %v2775_v28 = vmul.f32 %v2773_v27, %v2773_v27  ;;  %2883 = vst.msk [vmem:[#allocation2 + $0x118] sm:$0x3] %vm2848_vm5, %v4989_v36 }
 0x1e5   :  { %2886 = vst.msk [vmem:[#allocation2 + $0x130] sm:$0xff] %vm2682_vm4, %v4989_v36 }
 0x1e6   :  { %v2776_v50 = vsub.f32 %v2774_v42, %v2775_v28  ;;  %2887 = vst.msk [vmem:[#allocation2 + $0x138] sm:$0x3] %vm2848_vm5, %v4989_v36 }
 0x1e8   :  { %v2778_v37 = vadd.f32 1e-05, %v2776_v50 }
 0x1ea   :  { %4959 = vrsqrt.f32 %v2778_v37  ;;  %vm2785_vm7 = vweird.f32 %v2778_v37 }
 0x1f0   :  { %v4960_v31 = vpop.eup %4959 }
 0x1f1   :  { %v2780_v21 = vmul.f32 %v4960_v31, %v2778_v37  ;;  %vm2786_vm6 = vweird.f32 %v4960_v31 }
 0x1f2   :  { %vm2787_vm8 = vmor %vm2785_vm7, %vm2786_vm6 }
 0x1f3   :  { %v2781_v15 = vmul.f32 %v4960_v31, %v2780_v21 }
 0x1f5   :  { %v2782_v2 = vmul.f32 0.5, %v2781_v15 }
 0x1f7   :  { %v2783_v8 = vsub.f32 1.5, %v2782_v2 }
 0x1f9   :  { %v2784_v62 = vmul.f32 %v4960_v31, %v2783_v8 }
 0x1fb   :  { %v2788_v12 = vsel %vm2787_vm8, %v4960_v31, %v2784_v62  ;;  %v2937_v31 = vld [vmem:[#allocation2 + $0x2] sm:$0xff] }
 0x1fc   :  { %v2789_v7 = vmul.f32 %v2788_v12, %v2777_v61 }
 0x1fe   :  { %v2791_v55 = vmul.f32 %v2789_v7, %v2773_v27  ;;  %v2794_v18 = vperm.slane %v2789_v7, 0 }
 0x200   :  { %v2792_v32 = vsub.f32 %v2790_v46, %v2791_v55  ;;  %v2811_v33 = vmul.f32 %v2794_v18, %v6574_v23  ;;  %v2796_v51 = vmul.f32 %v2794_v18, %v6389_v48  ;;  %v2797_v1 = vmul.f32 %v2794_v18, %v6444_v16 }
 0x201   :  { %v2798_v13 = vmul.f32 %v2794_v18, %v6392_v19  ;;  %v2799_v57 = vmul.f32 %v2794_v18, %v6458_v49  ;;  %v2800_v23 = vmul.f32 %v2794_v18, %v6402_v41  ;;  %v2801_v53 = vmul.f32 %v2794_v18, %v6473_v34 }
 0x202   :  { %v2813_v26 = vperm.slane %v2792_v32, 0  ;;  %v2802_v4 = vmul.f32 %v2794_v18, %v6489_v58  ;;  %v2803_v48 = vmul.f32 %v2794_v18, %v6498_v5  ;;  %v2804_v34 = vmul.f32 %v2794_v18, %v6502_v24 }
 0x203   :  { %v2805_v58 = vmul.f32 %v2794_v18, %v6511_v35  ;;  %v2806_v5 = vmul.f32 %v2794_v18, %v6525_v30  ;;  %v2807_v38 = vmul.f32 %v2794_v18, %v6535_v54  ;;  %v2808_v52 = vmul.f32 %v2794_v18, %v6543_v3 }
 0x204   :  { %v2830_v25 = vadd.f32 %v2813_v26, %v2811_v33  ;;  %v2815_v16 = vadd.f32 %v2813_v26, %v2796_v51  ;;  %v2816_v14 = vadd.f32 %v2813_v26, %v2797_v1  ;;  %v2817_v19 = vadd.f32 %v2813_v26, %v2798_v13 }
 0x205   :  { %v2818_v49 = vadd.f32 %v2813_v26, %v2799_v57  ;;  %v2819_v0 = vadd.f32 %v2813_v26, %v2800_v23  ;;  %v2820_v45 = vadd.f32 %v2813_v26, %v2801_v53  ;;  %v2821_v41 = vadd.f32 %v2813_v26, %v2802_v4 }
 0x206   :  { %v2846_v40 = vmax.f32 %v2830_v25, 0.0  ;;  %v2822_v44 = vadd.f32 %v2813_v26, %v2803_v48  ;;  %v2823_v22 = vadd.f32 %v2813_v26, %v2804_v34  ;;  %v2824_v56 = vadd.f32 %v2813_v26, %v2805_v58 }
 0x207   :  { %v2825_v6 = vadd.f32 %v2813_v26, %v2806_v5  ;;  %v6694_v24 = vadd.f32 %v2813_v26, %v2807_v38  ;;  %v6696_v35 = vadd.f32 %v2813_v26, %v2808_v52  ;;  %v2809_v30 = vmul.f32 %v2794_v18, %v6551_v39 }
 0x208   :  { %2904 = vst.msk [vmem:[#allocation2 + $0x121] sm:$0xff] %vm2682_vm4, %v2846_v40  ;;  %v2810_v47 = vmul.f32 %v2794_v18, %v6558_v11  ;;  %v2831_v43 = vmax.f32 %v2815_v16, 0.0  ;;  %v2832_v39 = vmax.f32 %v2816_v14, 0.0  ;;  %v2833_v11 = vmax.f32 %v2817_v19, 0.0 }
 0x209   :  { %v6704_v54 = vadd.f32 %v2813_v26, %v2809_v30  ;;  %v2834_v27 = vmax.f32 %v2818_v49, 0.0  ;;  %v2835_v42 = vmax.f32 %v2819_v0, 0.0  ;;  %v2836_v28 = vmax.f32 %v2820_v45, 0.0 }
 0x20a   :  { %v6706_v3 = vadd.f32 %v2813_v26, %v2810_v47  ;;  %2889 = vst.msk [vmem:[#allocation2 + $0x11] sm:$0xff] %vm2682_vm4, %v2831_v43  ;;  %v2837_v50 = vmax.f32 %v2821_v41, 0.0  ;;  %v2838_v37 = vmax.f32 %v2822_v44, 0.0  ;;  %v2839_v10 = vmax.f32 %v2823_v22, 0.0 }
 0x20b   :  { %2890 = vst.msk [vmem:[#allocation2 + $0x21] sm:$0xff] %vm2682_vm4, %v2832_v39  ;;  %v2840_v36 = vmax.f32 %v2824_v56, 0.0  ;;  %v2841_v29 = vmax.f32 %v2825_v6, 0.0  ;;  %v2842_v17 = vmax.f32 %v6694_v24, 0.0  ;;  %v2843_v20 = vmax.f32 %v6696_v35, 0.0 }
 0x20c   :  { %2891 = vst.msk [vmem:[#allocation2 + $0x31] sm:$0xff] %vm2682_vm4, %v2833_v11  ;;  %v2844_v18 = vmax.f32 %v6704_v54, 0.0  ;;  %v2845_v1 = vmax.f32 %v6706_v3, 0.0 }
 0x20d   :  { %2892 = vst.msk [vmem:[#allocation2 + $0x41] sm:$0xff] %vm2682_vm4, %v2834_v27 }
 0x20e   :  { %2893 = vst.msk [vmem:[#allocation2 + $0x51] sm:$0xff] %vm2682_vm4, %v2835_v42 }
 0x20f   :  { %2894 = vst.msk [vmem:[#allocation2 + $0x61] sm:$0xff] %vm2682_vm4, %v2836_v28 }
 0x210   :  { %2895 = vst.msk [vmem:[#allocation2 + $0x71] sm:$0xff] %vm2682_vm4, %v2837_v50 }
 0x211   :  { %v6723_v21 = vld [vmem:[#allocation2 + $0x11] sm:$0xff]  ;;  %2896 = vst.msk [vmem:[#allocation2 + $0x81] sm:$0xff] %vm2682_vm4, %v2838_v37 }
 0x212   :  { %v2906_v59 = vld [vmem:[#allocation2 + $0x10] sm:$0xff]  ;;  %v3062_v15 = vpack.c.bf16 %v6723_v21, %v2921_v9  ;;  %v2954_v61 = vld [vmem:[#allocation2 + $0x20] sm:$0xff]  ;;  %2897 = vst.msk [vmem:[#allocation2 + $0xb1] sm:$0xff] %vm2682_vm4, %v2839_v10 }
 0x213   :  { %v6725_v63 = vld [vmem:[#allocation2 + $0x12] sm:$0xff]  ;;  %v3050_v2 = vpack.c.bf16 %v2906_v59, %v2905_v60  ;;  %v6731_v62 = vld [vmem:[#allocation2 + $0x21] sm:$0xff]  ;;  %v3357_v7 = vpack.c.bf16 %v2954_v61, %v2906_v59  ;;  %2898 = vst.msk [vmem:[#allocation2 + $0xc1] sm:$0xff] %vm2682_vm4, %v2840_v36 }
 0x214   :  { %v3244_v8 = vpack.c.bf16 %v6725_v63, %v2937_v31  ;;  %v6733_v12 = vld [vmem:[#allocation2 + $0x22] sm:$0xff]  ;;  %v6737_v46 = vld [vmem:[#allocation2 + $0x31] sm:$0xff]  ;;  %v3470_v32 = vpack.c.bf16 %v6731_v62, %v6723_v21  ;;  %4766 = vmatmul.msk.bf16.vlgmr.msra.gmra.mxu1 %vm2682_vm4, %v3062_v15  ;;  %2899 = vst.msk [vmem:[#allocation2 + $0xd1] sm:$0xff] %vm2682_vm4, %v2841_v29 }
 0x215   :  { %v6739_v55 = vld [vmem:[#allocation2 + $0x32] sm:$0xff]  ;;  %v3583_v33 = vpack.c.bf16 %v6733_v12, %v6725_v63  ;;  %4782 = vmatmul.msk.bf16.vlgmr.msrb.gmra.mxu2 %vm2682_vm4, %v3050_v2  ;;  %v6749_v51 = vld [vmem:[#allocation2 + $0x41] sm:$0xff]  ;;  %4814 = vmatmul.msk.bf16.vlgmr.msrb.gmra.mxu0 %vm2682_vm4, %v3357_v7  ;;  %2900 = vst.msk [vmem:[#allocation2 + $0xe1] sm:$0xff] %vm2682_vm4, %v2842_v17  ;;  %v6815_v54 = vpack.c.bf16 %v6737_v46, %v6731_v62 }
 0x216   :  { %v6751_v26 = vld [vmem:[#allocation2 + $0x42] sm:$0xff]  ;;  %4798 = vmatmul.msk.bf16.vlgmr.msrb.gmra.mxu3 %vm2682_vm4, %v3244_v8  ;;  %v6757_v13 = vld [vmem:[#allocation2 + $0x51] sm:$0xff]  ;;  %v3471_v23 = vpack.c.bf16 %v6749_v51, %v6737_v46  ;;  %2901 = vst.msk [vmem:[#allocation2 + $0xf1] sm:$0xff] %vm2682_vm4, %v2843_v20  ;;  %v6821_v43 = vpack.c.bf16 %v6739_v55, %v6733_v12 }
 0x217   :  { %v6759_v57 = vld [vmem:[#allocation2 + $0x52] sm:$0xff]  ;;  %v3584_v53 = vpack.c.bf16 %v6751_v26, %v6739_v55  ;;  %v6766_v4 = vld [vmem:[#allocation2 + $0x61] sm:$0xff]  ;;  %2902 = vst.msk [vmem:[#allocation2 + $0x101] sm:$0xff] %vm2682_vm4, %v2844_v18  ;;  %v6832_v42 = vpack.c.bf16 %v6757_v13, %v6749_v51 }
 0x218   :  { %v6768_v48 = vld [vmem:[#allocation2 + $0x62] sm:$0xff]  ;;  %v3472_v25 = vpack.c.bf16 %v6766_v4, %v6757_v13  ;;  %2903 = vst.msk [vmem:[#allocation2 + $0x111] sm:$0xff] %vm2682_vm4, %v2845_v1  ;;  %v2908_v24 = vld [vmem:[#allocation2 + $0x30] sm:$0xff]  ;;  %v6838_v50 = vpack.c.bf16 %v6759_v57, %v6751_v26 }
 0x219   :  { %v3585_v16 = vpack.c.bf16 %v6768_v48, %v6759_v57  ;;  %v6777_v14 = vld [vmem:[#allocation2 + $0xb1] sm:$0xff]  ;;  %v2956_v47 = vld [vmem:[#allocation2 + $0x40] sm:$0xff]  ;;  %v6817_v3 = vpack.c.bf16 %v2908_v24, %v2954_v61 }
 0x21a   :  { %v6779_v19 = vld [vmem:[#allocation2 + $0xb2] sm:$0xff]  ;;  %v6781_v49 = vld [vmem:[#allocation2 + $0xc1] sm:$0xff]  ;;  %v3358_v39 = vpack.c.bf16 %v2956_v47, %v2908_v24 }
 0x21b   :  { %v6783_v0 = vld [vmem:[#allocation2 + $0xc2] sm:$0xff]  ;;  %v6785_v45 = vld [vmem:[#allocation2 + $0xd1] sm:$0xff]  ;;  %v3474_v40 = vpack.c.bf16 %v6781_v49, %v6777_v14 }
 0x21c   :  { %v6787_v41 = vld [vmem:[#allocation2 + $0xd2] sm:$0xff]  ;;  %v6793_v58 = vld [vmem:[#allocation2 + $0xe1] sm:$0xff] }
 0x21d   :  { %v6795_v5 = vld [vmem:[#allocation2 + $0xe2] sm:$0xff]  ;;  %v6797_v38 = vld [vmem:[#allocation2 + $0xf1] sm:$0xff] }
 0x21e   :  { %v6799_v52 = vld [vmem:[#allocation2 + $0xf2] sm:$0xff]  ;;  %v6805_v56 = vld [vmem:[#allocation2 + $0x101] sm:$0xff] }
 0x21f   :  { %v6807_v6 = vld [vmem:[#allocation2 + $0x102] sm:$0xff]  ;;  %v2910_v11 = vld [vmem:[#allocation2 + $0x50] sm:$0xff] }
 0x220   :  { %v2958_v27 = vld [vmem:[#allocation2 + $0x60] sm:$0xff]  ;;  %v6834_v28 = vpack.c.bf16 %v2910_v11, %v2956_v47  ;;  %v6850_v9 = vld [vmem:[#allocation2 + $0x71] sm:$0xff] }
 0x221   :  { %v3359_v37 = vpack.c.bf16 %v2958_v27, %v2910_v11  ;;  %v4943_v10 = vld [vmem:[%s7469_s5 + $0x40] sm:$0xff]  ;;  %v2912_v60 = vld [vmem:[#allocation2 + $0x70] sm:$0xff]  ;;  %v6858_v29 = vpack.c.bf16 %v6850_v9, %v6766_v4 }
 0x222   :  { %3525 = vmatpush.bf16.msrb.mxu1 %v4943_v10  ;;  %v6852_v31 = vld [vmem:[#allocation2 + $0x72] sm:$0xff]  ;;  %v6854_v36 = vld [vmem:[#allocation2 + $0x80] sm:$0xff]  ;;  %v6860_v59 = vpack.c.bf16 %v2912_v60, %v2958_v27  ;;  %v6882_v27 = vpack.c.bf16 %v6785_v45, %v6781_v49  ;;  %v6888_v10 = vpack.c.bf16 %v6787_v41, %v6783_v0 }
 0x223   :  { %v6864_v17 = vpack.c.bf16 %v6852_v31, %v6768_v48  ;;  %v3360_v15 = vpack.c.bf16 %v6854_v36, %v2912_v60  ;;  %v2929_v2 = vld [vmem:[#allocation2 + $0xa1] sm:$0xff]  ;;  %v2914_v61 = vld [vmem:[#allocation2 + $0xb0] sm:$0xff] }
 0x224   :  { %4767 = vmatmul.msk.bf16.gmra.mxu1 %vm2682_vm4, %v6815_v54  ;;  %v2913_v8 = vld [vmem:[#allocation2 + $0xa0] sm:$0xff]  ;;  %v3066_v18 = vpack.c.bf16 %v6777_v14, %v2929_v2  ;;  %v4948_v2 = vld [vmem:[%s7469_s5 + $0x68] sm:$0xff] }
 0x225   :  { %4783 = vmatmul.msk.bf16.gmra.mxu2 %vm2682_vm4, %v6817_v3  ;;  %4815 = vmatmul.msk.bf16.gmra.mxu0 %vm2682_vm4, %v3358_v39  ;;  %v2945_v20 = vld [vmem:[#allocation2 + $0xa2] sm:$0xff]  ;;  %v3054_v1 = vpack.c.bf16 %v2914_v61, %v2913_v8  ;;  %v2916_v39 = vld [vmem:[#allocation2 + $0xd0] sm:$0xff]  ;;  %v4950_v8 = vld [vmem:[%s7469_s5 + $0x78] sm:$0xff] }
 0x226   :  { %4799 = vmatmul.msk.bf16.gmra.mxu3 %vm2682_vm4, %v6821_v43  ;;  %v2962_v7 = vld [vmem:[#allocation2 + $0xc0] sm:$0xff]  ;;  %v3248_v24 = vpack.c.bf16 %v6779_v19, %v2945_v20  ;;  %3863 = vmatpush.bf16.msra.mxu0 %v4950_v8  ;;  %v6937_v8 = vld [vmem:[#allocation2 + $0x112] sm:$0xff] }
 0x227   :  { %v3361_v47 = vpack.c.bf16 %v2962_v7, %v2914_v61  ;;  %v2964_v11 = vld [vmem:[#allocation2 + $0xe0] sm:$0xff]  ;;  %3750 = vmatpush.bf16.msra.mxu3 %v4948_v2  ;;  %v2918_v61 = vld [vmem:[#allocation2 + $0xf0] sm:$0xff]  ;;  %v6949_v35 = vpack.c.bf16 %v6937_v8, %v6807_v6 }
 0x228   :  { %v3362_v60 = vpack.c.bf16 %v2964_v11, %v2916_v39  ;;  %v2966_v20 = vld [vmem:[#allocation2 + $0x100] sm:$0xff]  ;;  %v2920_v2 = vld [vmem:[#allocation2 + $0x110] sm:$0xff] }
 0x234   :  { %4768 = vmatmul.msk.bf16.gmra.mxu1 %vm2682_vm4, %v6832_v42 }
 0x235   :  { %4784 = vmatmul.msk.bf16.gmra.mxu2 %vm2682_vm4, %v6834_v28  ;;  %4816 = vmatmul.msk.bf16.gmra.mxu0 %vm2682_vm4, %v3359_v37  ;;  %v6884_v37 = vpack.c.bf16 %v2916_v39, %v2962_v7  ;;  %v6908_v7 = vpack.c.bf16 %v6797_v38, %v6793_v58  ;;  %v3363_v39 = vpack.c.bf16 %v2966_v20, %v2918_v61 }
 0x236   :  { %4800 = vmatmul.msk.bf16.gmra.mxu3 %vm2682_vm4, %v6838_v50 }
 0x244   :  { %4769 = vmatmul.msk.bf16.gmra.mxu1 %vm2682_vm4, %v6858_v29 }
 0x245   :  { %4785 = vmatmul.msk.bf16.gmra.mxu2 %vm2682_vm4, %v6860_v59  ;;  %4817 = vmatmul.msk.bf16.gmra.mxu0 %vm2682_vm4, %v3360_v15  ;;  %v4946_v15 = vld [vmem:[%s7469_s5 + $0x58] sm:$0xff] }
 0x246   :  { %4801 = vmatmul.msk.bf16.gmra.mxu3 %vm2682_vm4, %v6864_v17  ;;  %3637 = vmatpush.bf16.msra.mxu2 %v4946_v15  ;;  %v6935_v15 = vld [vmem:[#allocation2 + $0x111] sm:$0xff] }
 0x247   :  { %v6943_v30 = vpack.c.bf16 %v6935_v15, %v6805_v56 }
 0x254   :  { %4770 = vmatmul.msk.bf16.gmra.mxu1 %vm2682_vm4, %v3066_v18  ;;  %v6910_v18 = vpack.c.bf16 %v2918_v61, %v2964_v11  ;;  %v4952_v11 = vld [vmem:[%s7469_s5 + $0x88] sm:$0xff]  ;;  %v6939_v61 = vld [vmem:[#allocation2 + $0x120] sm:$0xff] }
 0x255   :  { %4786 = vmatmul.msk.bf16.gmra.mxu2 %vm2682_vm4, %v3054_v1  ;;  %4818 = vmatmul.msk.bf16.gmra.mxu0 %vm2682_vm4, %v3361_v47  ;;  %v4945_v1 = vld [vmem:[%s7469_s5 + $0x50] sm:$0xff]  ;;  %v6920_v47 = vpack.c.bf16 %v6799_v52, %v6795_v5 }
 0x256   :  { %4802 = vmatmul.msk.bf16.gmra.mxu3 %vm2682_vm4, %v3248_v24  ;;  %v4947_v24 = vld [vmem:[%s7469_s5 + $0x60] sm:$0xff]  ;;  %3638 = vmatpush.bf16.msra.mxu2 %v4945_v1  ;;  %v3364_v1 = vpack.c.bf16 %v6939_v61, %v2920_v2 }
 0x257   :  { %3751 = vmatpush.bf16.msra.mxu3 %v4947_v24  ;;  %3976 = vmatpush.bf16.msra.mxu1 %v4952_v11 }
 0x264   :  { %4771 = vmatmul.msk.bf16.gmra.mxu1 %vm2682_vm4, %v6882_v27 }
 0x265   :  { %4787 = vmatmul.msk.bf16.gmra.mxu2 %vm2682_vm4, %v6884_v37  ;;  %4819 = vmatmul.msk.bf16.gmra.mxu0 %vm2682_vm4, %v3362_v60  ;;  %v4949_v60 = vld [vmem:[%s7469_s5 + $0x70] sm:$0xff] }
 0x266   :  { %4803 = vmatmul.msk.bf16.gmra.mxu3 %vm2682_vm4, %v6888_v10  ;;  %3864 = vmatpush.bf16.msra.mxu0 %v4949_v60 }
 0x274   :  { %4772 = vmatmul.msk.bf16.gmra.mxu1 %vm2682_vm4, %v6908_v7 }
 0x275   :  { %4788 = vmatmul.msk.bf16.gmra.mxu2 %vm2682_vm4, %v6910_v18  ;;  %4820 = vmatmul.msk.bf16.gmra.mxu0 %vm2682_vm4, %v3363_v39  ;;  %v6945_v39 = vpack.c.bf16 %v2920_v2, %v2966_v20 }
 0x276   :  { %4804 = vmatmul.msk.bf16.gmra.mxu3 %vm2682_vm4, %v6920_v47 }
 0x284   :  { %4773 = vmatmul.msk.bf16.gmra.mxu1 %vm2682_vm4, %v6943_v30 }
 0x285   :  { %4789 = vmatmul.msk.bf16.gmra.mxu2 %vm2682_vm4, %v6945_v39  ;;  %4821 = vmatmul.msk.bf16.gmra.mxu0 %vm2682_vm4, %v3364_v1 }
 0x286   :  { %4805 = vmatmul.msk.bf16.gmra.mxu3 %vm2682_vm4, %v6949_v35 }
 0x291   :  { %v3119_v24 = vpop.f32.mrf.mxu1 }
 0x292   :  { %v3414_v20 = vpop.f32.mrf.mxu0 }
 0x294   :  { %4830 = vmatmul.msk.bf16.vlgmr.msrb.gmra.mxu1 %vm2682_vm4, %v3470_v32 }
 0x295   :  { %4846 = vmatmul.msk.bf16.vlgmr.msra.gmra.mxu2 %vm2682_vm4, %v3583_v33  ;;  %4878 = vmatmul.msk.bf16.vlgmr.msra.gmra.mxu0 %vm2682_vm4, %v6815_v54 }
 0x296   :  { %4862 = vmatmul.msk.bf16.vlgmr.msra.gmra.mxu3 %vm2682_vm4, %v6817_v3 }
 0x298   :  { %v3204_v60 = vpop.f32.mrf.mxu2 }
 0x299   :  { %v3205_v11 = vadd.f32 %v3204_v60, %v3119_v24  ;;  %v3301_v2 = vpop.f32.mrf.mxu3  ;;  %v3121_v1 = vpop.f32.mrf.mxu1 }
 0x29a   :  { %v3416_v44 = vpop.f32.mrf.mxu0 }
 0x29b   :  { %v3341_v22 = vadd.f32 %v3301_v2, %v3205_v11 }
 0x29d   :  { %v6971_v21 = vadd.f32 %v3414_v20, %v3341_v22 }
 0x2a0   :  { %v3206_v62 = vpop.f32.mrf.mxu2 }
 0x2a1   :  { %v3207_v32 = vadd.f32 %v3206_v62, %v3121_v1  ;;  %v3303_v34 = vpop.f32.mrf.mxu3  ;;  %v3124_v63 = vpop.f32.mrf.mxu1  ;;  %v2976_v1 = vld [vmem:[#allocation2 + $0x81] sm:$0xff] }
 0x2a2   :  { %v3419_v33 = vpop.f32.mrf.mxu0  ;;  %v7008_v62 = vld [vmem:[#allocation2 + $0x82] sm:$0xff] }
 0x2a3   :  { %v3342_v12 = vadd.f32 %v3303_v34, %v3207_v32 }
 0x2a4   :  { %4831 = vmatmul.msk.bf16.gmra.mxu1 %vm2682_vm4, %v3471_v23 }
 0x2a5   :  { %4847 = vmatmul.msk.bf16.gmra.mxu2 %vm2682_vm4, %v3584_v53  ;;  %v6981_v54 = vadd.f32 %v3416_v44, %v3342_v12  ;;  %4879 = vmatmul.msk.bf16.gmra.mxu0 %vm2682_vm4, %v6832_v42 }
 0x2a6   :  { %4863 = vmatmul.msk.bf16.gmra.mxu3 %vm2682_vm4, %v6834_v28  ;;  %v4951_v28 = vld [vmem:[%s7469_s5 + $0x80] sm:$0xff] }
 0x2a7   :  { %3977 = vmatpush.bf16.msra.mxu1 %v4951_v28 }
 0x2a8   :  { %v3209_v34 = vpop.f32.mrf.mxu2 }
 0x2a9   :  { %v3210_v22 = vadd.f32 %v3209_v34, %v3124_v63  ;;  %v3306_v3 = vpop.f32.mrf.mxu3  ;;  %v3126_v24 = vpop.f32.mrf.mxu1  ;;  %v3025_v63 = vld [vmem:[#allocation2 + $0x91] sm:$0xff] }
 0x2aa   :  { %v3421_v51 = vpop.f32.mrf.mxu0 }
 0x2ab   :  { %v3343_v46 = vadd.f32 %v3306_v3, %v3210_v22  ;;  %v3473_v22 = vpack.c.bf16 %v2976_v1, %v6850_v9  ;;  %v3586_v3 = vpack.c.bf16 %v7008_v62, %v6852_v31 }
 0x2ad   :  { %v6987_v23 = vadd.f32 %v3419_v33, %v3343_v46  ;;  %v3812_v46 = vpack.c.bf16 %v3025_v63, %v2976_v1 }
 0x2b0   :  { %v3211_v20 = vpop.f32.mrf.mxu2 }
 0x2b1   :  { %v3212_v55 = vadd.f32 %v3211_v20, %v3126_v24  ;;  %v3308_v26 = vpop.f32.mrf.mxu3  ;;  %v3129_v53 = vpop.f32.mrf.mxu1 }
 0x2b2   :  { %v3424_v60 = vpop.f32.mrf.mxu0 }
 0x2b3   :  { %v3344_v44 = vadd.f32 %v3308_v26, %v3212_v55 }
 0x2b4   :  { %4832 = vmatmul.msk.bf16.gmra.mxu1 %vm2682_vm4, %v3472_v25 }
 0x2b5   :  { %4848 = vmatmul.msk.bf16.gmra.mxu2 %vm2682_vm4, %v3585_v16  ;;  %v6997_v42 = vadd.f32 %v3421_v51, %v3344_v44  ;;  %4880 = vmatmul.msk.bf16.gmra.mxu0 %vm2682_vm4, %v6858_v29  ;;  %v3009_v29 = vld [vmem:[#allocation2 + $0x90] sm:$0xff] }
 0x2b6   :  { %4864 = vmatmul.msk.bf16.gmra.mxu3 %vm2682_vm4, %v6860_v59  ;;  %v3699_v24 = vpack.c.bf16 %v3009_v29, %v6854_v36 }
 0x2b8   :  { %v3214_v13 = vpop.f32.mrf.mxu2 }
 0x2b9   :  { %v3215_v4 = vadd.f32 %v3214_v13, %v3129_v53  ;;  %v3311_v25 = vpop.f32.mrf.mxu3  ;;  %v3131_v11 = vpop.f32.mrf.mxu1 }
 0x2ba   :  { %v3426_v48 = vpop.f32.mrf.mxu0 }
 0x2bb   :  { %v3345_v57 = vadd.f32 %v3311_v25, %v3215_v4 }
 0x2bd   :  { %v7006_v16 = vadd.f32 %v3424_v60, %v3345_v57 }
 0x2c0   :  { %v3216_v2 = vpop.f32.mrf.mxu2 }
 0x2c1   :  { %v3217_v59 = vadd.f32 %v3216_v2, %v3131_v11  ;;  %v3313_v32 = vpop.f32.mrf.mxu3  ;;  %v3134_v12 = vpop.f32.mrf.mxu1  ;;  %v7489_v11 = vpack.c.bf16 %v6783_v0, %v6779_v19 }
 0x2c2   :  { %v3429_v34 = vpop.f32.mrf.mxu0 }
 0x2c3   :  { %v3346_v33 = vadd.f32 %v3313_v32, %v3217_v59 }
 0x2c4   :  { %4833 = vmatmul.msk.bf16.gmra.mxu1 %vm2682_vm4, %v3473_v22 }
 0x2c5   :  { %4849 = vmatmul.msk.bf16.gmra.mxu2 %vm2682_vm4, %v3586_v3  ;;  %v7016_v51 = vadd.f32 %v3426_v48, %v3346_v33  ;;  %4881 = vmatmul.msk.bf16.gmra.mxu0 %vm2682_vm4, %v3812_v46 }
 0x2c6   :  { %4865 = vmatmul.msk.bf16.gmra.mxu3 %vm2682_vm4, %v3699_v24 }
 0x2c8   :  { %v3219_v20 = vpop.f32.mrf.mxu2 }
 0x2c9   :  { %v3220_v55 = vadd.f32 %v3219_v20, %v3134_v12  ;;  %v3316_v26 = vpop.f32.mrf.mxu3  ;;  %v3136_v9 = vpop.f32.mrf.mxu1 }
 0x2ca   :  { %v3431_v44 = vpop.f32.mrf.mxu0 }
 0x2cb   :  { %v3347_v53 = vadd.f32 %v3316_v26, %v3220_v55 }
 0x2cd   :  { %v7020_v31 = vadd.f32 %v3429_v34, %v3347_v53 }
 0x2d0   :  { %v3221_v36 = vpop.f32.mrf.mxu2 }
 0x2d1   :  { %v3222_v60 = vadd.f32 %v3221_v36, %v3136_v9  ;;  %v3318_v28 = vpop.f32.mrf.mxu3  ;;  %v3139_v13 = vpop.f32.mrf.mxu1 }
 0x2d2   :  { %v3434_v25 = vpop.f32.mrf.mxu0 }
 0x2d3   :  { %v3348_v4 = vadd.f32 %v3318_v28, %v3222_v60 }
 0x2d4   :  { %4834 = vmatmul.msk.bf16.gmra.mxu1 %vm2682_vm4, %v3474_v40 }
 0x2d5   :  { %4850 = vmatmul.msk.bf16.gmra.mxu2 %vm2682_vm4, %v7489_v11  ;;  %v7030_v57 = vadd.f32 %v3431_v44, %v3348_v4  ;;  %4882 = vmatmul.msk.bf16.gmra.mxu0 %vm2682_vm4, %v6882_v27  ;;  %v7491_v27 = vpack.c.bf16 %v6795_v5, %v6787_v41 }
 0x2d6   :  { %4866 = vmatmul.msk.bf16.gmra.mxu3 %vm2682_vm4, %v6884_v37  ;;  %v7490_v37 = vpack.c.bf16 %v6793_v58, %v6785_v45 }
 0x2d8   :  { %v3224_v48 = vpop.f32.mrf.mxu2 }
 0x2d9   :  { %v3225_v2 = vadd.f32 %v3224_v48, %v3139_v13  ;;  %v3321_v1 = vpop.f32.mrf.mxu3  ;;  %v3141_v59 = vpop.f32.mrf.mxu1  ;;  %v3017_v48 = vld [vmem:[#allocation2 + $0x130] sm:$0xff] }
 0x2da   :  { %v3436_v49 = vpop.f32.mrf.mxu0 }
 0x2db   :  { %v3349_v14 = vadd.f32 %v3321_v1, %v3225_v2  ;;  %v3033_v2 = vld [vmem:[#allocation2 + $0x131] sm:$0xff] }
 0x2dd   :  { %v7036_v40 = vadd.f32 %v3434_v25, %v3349_v14 }
 0x2e0   :  { %v3226_v32 = vpop.f32.mrf.mxu2 }
 0x2e1   :  { %v3227_v19 = vadd.f32 %v3226_v32, %v3141_v59  ;;  %v3323_v0 = vpop.f32.mrf.mxu3  ;;  %v3144_v29 = vpop.f32.mrf.mxu1 }
 0x2e2   :  { %v3439_v12 = vpop.f32.mrf.mxu0 }
 0x2e3   :  { %v3350_v63 = vadd.f32 %v3323_v0, %v3227_v19 }
 0x2e4   :  { %4835 = vmatmul.msk.bf16.gmra.mxu1 %vm2682_vm4, %v7490_v37 }
 0x2e5   :  { %4851 = vmatmul.msk.bf16.gmra.mxu2 %vm2682_vm4, %v7491_v27  ;;  %v7046_v33 = vadd.f32 %v3436_v49, %v3350_v63  ;;  %4883 = vmatmul.msk.bf16.gmra.mxu0 %vm2682_vm4, %v6908_v7  ;;  %v7493_v7 = vpack.c.bf16 %v6807_v6, %v6799_v52  ;;  %v2984_v52 = vld [vmem:[#allocation2 + $0x121] sm:$0xff]  ;;  %v3703_v49 = vpack.c.bf16 %v3017_v48, %v6939_v61 }
 0x2e6   :  { %4867 = vmatmul.msk.bf16.gmra.mxu3 %vm2682_vm4, %v6910_v18  ;;  %v7492_v18 = vpack.c.bf16 %v6805_v56, %v6797_v38  ;;  %v7070_v6 = vld [vmem:[#allocation2 + $0x122] sm:$0xff]  ;;  %v3816_v32 = vpack.c.bf16 %v3033_v2, %v2984_v52 }
 0x2e7   :  { %v3590_v14 = vpack.c.bf16 %v7070_v6, %v6937_v8 }
 0x2e8   :  { %v3229_v34 = vpop.f32.mrf.mxu2 }
 0x2e9   :  { %v3230_v22 = vadd.f32 %v3229_v34, %v3144_v29  ;;  %v3326_v3 = vpop.f32.mrf.mxu3  ;;  %v3146_v24 = vpop.f32.mrf.mxu1 }
 0x2ea   :  { %v3441_v58 = vpop.f32.mrf.mxu0 }
 0x2eb   :  { %v3351_v45 = vadd.f32 %v3326_v3, %v3230_v22 }
 0x2ed   :  { %v7052_v46 = vadd.f32 %v3439_v12, %v3351_v45 }
 0x2f0   :  { %v3231_v20 = vpop.f32.mrf.mxu2 }
 0x2f1   :  { %v3232_v41 = vadd.f32 %v3231_v20, %v3146_v24  ;;  %v3328_v5 = vpop.f32.mrf.mxu3  ;;  %v3149_v55 = vpop.f32.mrf.mxu1 }
 0x2f2   :  { %v3444_v9 = vpop.f32.mrf.mxu0 }
 0x2f3   :  { %v3352_v26 = vadd.f32 %v3328_v5, %v3232_v41 }
 0x2f4   :  { %4836 = vmatmul.msk.bf16.gmra.mxu1 %vm2682_vm4, %v7492_v18 }
 0x2f5   :  { %4852 = vmatmul.msk.bf16.gmra.mxu2 %vm2682_vm4, %v7493_v7  ;;  %v7062_v53 = vadd.f32 %v3441_v58, %v3352_v26  ;;  %4884 = vmatmul.msk.bf16.gmra.mxu0 %vm2682_vm4, %v6943_v30  ;;  %v3477_v30 = vpack.c.bf16 %v2984_v52, %v6935_v15 }
 0x2f6   :  { %4868 = vmatmul.msk.bf16.gmra.mxu3 %vm2682_vm4, %v6945_v39 }
 0x2f8   :  { %v3234_v44 = vpop.f32.mrf.mxu2 }
 0x2f9   :  { %v3235_v36 = vadd.f32 %v3234_v44, %v3149_v55  ;;  %v3331_v60 = vpop.f32.mrf.mxu3  ;;  %v3151_v28 = vpop.f32.mrf.mxu1 }
 0x2fa   :  { %v3446_v56 = vpop.f32.mrf.mxu0 }
 0x2fb   :  { %v3353_v38 = vadd.f32 %v3331_v60, %v3235_v36 }
 0x2fd   :  { %v7068_v13 = vadd.f32 %v3444_v9, %v3353_v38 }
 0x300   :  { %v3236_v4 = vpop.f32.mrf.mxu2 }
 0x301   :  { %v3237_v25 = vadd.f32 %v3236_v4, %v3151_v28  ;;  %v3333_v11 = vpop.f32.mrf.mxu3  ;;  %v3154_v39 = vpop.f32.mrf.mxu1 }
 0x302   :  { %v3449_v59 = vpop.f32.mrf.mxu0 }
 0x303   :  { %v3354_v1 = vadd.f32 %v3333_v11, %v3237_v25 }
 0x304   :  { %4837 = vmatmul.msk.bf16.gmra.mxu1 %vm2682_vm4, %v3477_v30 }
 0x305   :  { %4853 = vmatmul.msk.bf16.gmra.mxu2 %vm2682_vm4, %v3590_v14  ;;  %v7078_v19 = vadd.f32 %v3446_v56, %v3354_v1  ;;  %4885 = vmatmul.msk.bf16.gmra.mxu0 %vm2682_vm4, %v3816_v32 }
 0x306   :  { %4869 = vmatmul.msk.bf16.gmra.mxu3 %vm2682_vm4, %v3703_v49 }
 0x308   :  { %v3239_v0 = vpop.f32.mrf.mxu2 }
 0x309   :  { %v3240_v29 = vadd.f32 %v3239_v0, %v3154_v39  ;;  %v3336_v63 = vpop.f32.mrf.mxu3  ;;  %v3156_v15 = vpop.f32.mrf.mxu1 }
 0x30a   :  { %v3451_v37 = vpop.f32.mrf.mxu0 }
 0x30b   :  { %v3355_v12 = vadd.f32 %v3336_v63, %v3240_v29 }
 0x30d   :  { %v7082_v8 = vadd.f32 %v3449_v59, %v3355_v12 }
 0x310   :  { %v3241_v61 = vpop.f32.mrf.mxu2 }
 0x311   :  { %v3242_v27 = vadd.f32 %v3241_v61, %v3156_v15  ;;  %v3338_v34 = vpop.f32.mrf.mxu3  ;;  %v3527_v22 = vpop.f32.mrf.mxu1  ;;  %v3041_v61 = vld [vmem:[#allocation2 + $0x92] sm:$0xff] }
 0x312   :  { %v3567_v24 = vadd.f32 %v3527_v22, %v6971_v21  ;;  %v3866_v45 = vpop.f32.mrf.mxu0 }
 0x313   :  { %v3356_v3 = vadd.f32 %v3338_v34, %v3242_v27 }
 0x314   :  { %4894 = vmatmul.msk.bf16.vlgmr.msra.gmra.mxu1 %vm2682_vm4, %v6821_v43 }
 0x315   :  { %v7087_v58 = vadd.f32 %v3451_v37, %v3356_v3 }
 0x318   :  { %v3640_v20 = vpop.f32.mrf.mxu2 }
 0x319   :  { %v3680_v41 = vadd.f32 %v3640_v20, %v3567_v24  ;;  %v3753_v5 = vpop.f32.mrf.mxu3  ;;  %v3529_v55 = vpop.f32.mrf.mxu1 }
 0x31a   :  { %v3568_v9 = vadd.f32 %v3529_v55, %v6981_v54  ;;  %v3868_v7 = vpop.f32.mrf.mxu0 }
 0x31b   :  { %v3793_v26 = vadd.f32 %v3753_v5, %v3680_v41 }
 0x31d   :  { %v7090_v18 = vadd.f32 %v3866_v45, %v3793_v26 }
 0x320   :  { %v3642_v44 = vpop.f32.mrf.mxu2 }
 0x321   :  { %v3681_v36 = vadd.f32 %v3642_v44, %v3568_v9  ;;  %v3755_v60 = vpop.f32.mrf.mxu3  ;;  %v3532_v21 = vpop.f32.mrf.mxu1  ;;  %v4189_v9 = vld [vmem:[%s7465_s1 + $0x30] sm:$0xff] }
 0x322   :  { %v3569_v38 = vadd.f32 %v3532_v21, %v6987_v23  ;;  %v3871_v56 = vpop.f32.mrf.mxu0  ;;  %v4192_v21 = vld [vmem:[%s7465_s1 + $0x48] sm:$0xff] }
 0x323   :  { %v3794_v28 = vadd.f32 %v3755_v60, %v3681_v36 }
 0x324   :  { %4895 = vmatmul.msk.bf16.gmra.mxu1 %vm2682_vm4, %v6838_v50 }
 0x325   :  { %v7095_v43 = vadd.f32 %v3868_v7, %v3794_v28 }
 0x328   :  { %v3645_v4 = vpop.f32.mrf.mxu2 }
 0x329   :  { %v3682_v52 = vadd.f32 %v3645_v4, %v3569_v38  ;;  %v3758_v25 = vpop.f32.mrf.mxu3  ;;  %v3534_v54 = vpop.f32.mrf.mxu1  ;;  %v4187_v4 = vld [vmem:[%s7465_s1 + $0x20] sm:$0xff] }
 0x32a   :  { %v3570_v48 = vadd.f32 %v3534_v54, %v6997_v42  ;;  %v3873_v30 = vpop.f32.mrf.mxu0  ;;  %4223 = vrot.lane.b32.xlu2 %v4187_v4, %s4990_s16 }
 0x32b   :  { %v3795_v11 = vadd.f32 %v3758_v25, %v3682_v52  ;;  %v4193_v52 = vld [vmem:[%s7465_s1 + $0x50] sm:$0xff]  ;;  %v4195_v25 = vld [vmem:[%s7465_s1 + $0x60] sm:$0xff] }
 0x32d   :  { %v7098_v2 = vadd.f32 %v3871_v56, %v3795_v11 }
 0x330   :  { %v3647_v39 = vpop.f32.mrf.mxu2 }
 0x331   :  { %v3683_v1 = vadd.f32 %v3647_v39, %v3570_v48  ;;  %v3760_v59 = vpop.f32.mrf.mxu3  ;;  %v3537_v23 = vpop.f32.mrf.mxu1 }
 0x332   :  { %v3571_v50 = vadd.f32 %v3537_v23, %v7006_v16  ;;  %v3876_v12 = vpop.f32.mrf.mxu0 }
 0x333   :  { %v3796_v14 = vadd.f32 %v3760_v59, %v3683_v1  ;;  %v4188_v1 = vld [vmem:[%s7465_s1 + $0x28] sm:$0xff] }
 0x334   :  { %4896 = vmatmul.msk.bf16.gmra.mxu1 %vm2682_vm4, %v6864_v17  ;;  %v3925_v17 = vpack.c.bf16 %v3041_v61, %v7008_v62  ;;  %v4196_v59 = vld [vmem:[%s7465_s1 + $0x68] sm:$0xff]  ;;  %4225 = vrot.lane.b32.xlu2 %v4188_v1, %s4990_s16 }
 0x335   :  { %v7103_v49 = vadd.f32 %v3873_v30, %v3796_v14  ;;  %v4198_v30 = vld [vmem:[%s7465_s1 + $0x78] sm:$0xff] }
 0x338   :  { %v3650_v32 = vpop.f32.mrf.mxu2 }
 0x339   :  { %v3684_v0 = vadd.f32 %v3650_v32, %v3571_v50  ;;  %v3763_v29 = vpop.f32.mrf.mxu3  ;;  %v3539_v63 = vpop.f32.mrf.mxu1 }
 0x33a   :  { %v7106_v15 = vadd.f32 %v3539_v63, %v7016_v51 }
 0x33b   :  { %v3797_v42 = vadd.f32 %v3763_v29, %v3684_v0  ;;  %v4191_v0 = vld [vmem:[%s7465_s1 + $0x40] sm:$0xff] }
 0x33c   :  { %4231 = vrot.lane.b32.xlu2 %v4191_v0, %s4990_s16 }
 0x33d   :  { %v7108_v37 = vadd.f32 %v3876_v12, %v3797_v42  ;;  %v4194_v42 = vld [vmem:[%s7465_s1 + $0x58] sm:$0xff] }
 0x340   :  { %v3652_v7 = vpop.f32.mrf.mxu2 }
 0x341   :  { %v3542_v27 = vpop.f32.mrf.mxu1  ;;  %v7176_v60 = vpop.f32.mrf.mxu3 }
 0x342   :  { %v7111_v16 = vadd.f32 %v3542_v27, %v7020_v31 }
 0x344   :  { %4897 = vmatmul.msk.bf16.gmra.mxu1 %vm2682_vm4, %v3925_v17  ;;  %4237 = vrot.lane.b32.xlu2 %v4194_v42, %s4990_s16  ;;  %v4197_v17 = vld [vmem:[%s7465_s1 + $0x70] sm:$0xff] }
 0x348   :  { %v3655_v38 = vpop.f32.mrf.mxu2 }
 0x349   :  { %v3544_v34 = vpop.f32.mrf.mxu1  ;;  %v3768_v54 = vpop.f32.mrf.mxu3 }
 0x34a   :  { %v7116_v22 = vadd.f32 %v3544_v34, %v7030_v57 }
 0x34c   :  { %4243 = vrot.lane.b32.xlu2 %v4197_v17, %s4990_s16 }
 0x351   :  { %v3547_v3 = vpop.f32.mrf.mxu1  ;;  %v3770_v50 = vpop.f32.mrf.mxu3 }
 0x352   :  { %v7119_v51 = vadd.f32 %v3547_v3, %v7036_v40 }
 0x354   :  { %4898 = vmatmul.msk.bf16.gmra.mxu1 %vm2682_vm4, %v6888_v10 }
 0x359   :  { %v3549_v24 = vpop.f32.mrf.mxu1  ;;  %v3773_v63 = vpop.f32.mrf.mxu3 }
 0x35a   :  { %v7124_v45 = vadd.f32 %v3549_v24, %v7046_v33 }
 0x361   :  { %v3552_v31 = vpop.f32.mrf.mxu1  ;;  %v3775_v27 = vpop.f32.mrf.mxu3 }
 0x362   :  { %v7127_v62 = vadd.f32 %v3552_v31, %v7052_v46  ;;  %v3049_v46 = vld [vmem:[#allocation2 + $0x132] sm:$0xff] }
 0x364   :  { %4899 = vmatmul.msk.bf16.gmra.mxu1 %vm2682_vm4, %v6920_v47  ;;  %v3929_v47 = vpack.c.bf16 %v3049_v46, %v7070_v6  ;;  %v4184_v6 = vld [vmem:[%s7465_s1 + $0x8] sm:$0xff] }
 0x369   :  { %v3554_v57 = vpop.f32.mrf.mxu1  ;;  %v3778_v31 = vpop.f32.mrf.mxu3 }
 0x36a   :  { %v7132_v20 = vadd.f32 %v3554_v57, %v7062_v53  ;;  %v4183_v53 = vld [vmem:[%s7465_s1] sm:$0xff] }
 0x36b   :  { %4215 = vrot.lane.b32.xlu0 %v4183_v53, %s4990_s16 }
 0x371   :  { %v3557_v40 = vpop.f32.mrf.mxu1 }
 0x372   :  { %v7135_v41 = vadd.f32 %v3557_v40, %v7068_v13 }
 0x373   :  { %4217 = vrot.lane.b32.xlu0 %v4184_v6, %s4990_s16  ;;  %v3685_v6 = vadd.f32 %v3652_v7, %v7106_v15 }
 0x374   :  { %4900 = vmatmul.msk.bf16.gmra.mxu1 %vm2682_vm4, %v6949_v35 }
 0x375   :  { %v3798_v4 = vadd.f32 %v7176_v60, %v3685_v6 }
 0x379   :  { %v3559_v10 = vpop.f32.mrf.mxu1 }
 0x37a   :  { %v7140_v33 = vadd.f32 %v3559_v10, %v7078_v19  ;;  %v4185_v19 = vld [vmem:[%s7465_s1 + $0x10] sm:$0xff] }
 0x37b   :  { %4219 = vrot.lane.b32.xlu1 %v4185_v19, %s4990_s16  ;;  %4227 = vrot.lane.b32.xlu0 %v4189_v9, %s4990_s16 }
 0x381   :  { %v3562_v5 = vpop.f32.mrf.mxu1 }
 0x382   :  { %v7143_v55 = vadd.f32 %v3562_v5, %v7082_v8  ;;  %v3780_v5 = vpop.f32.mrf.mxu3 }
 0x383   :  { %4233 = vrot.lane.b32.xlu0 %v4192_v21, %s4990_s16 }
 0x384   :  { %4901 = vmatmul.msk.bf16.gmra.mxu1 %vm2682_vm4, %v3929_v47 }
 0x389   :  { %v3564_v35 = vpop.f32.mrf.mxu1 }
 0x38a   :  { %v7152_v13 = vadd.f32 %v3564_v35, %v7087_v58  ;;  %v4186_v58 = vld [vmem:[%s7465_s1 + $0x18] sm:$0xff]  ;;  %v3783_v19 = vpop.f32.mrf.mxu3 }
 0x38b   :  { %4221 = vrot.lane.b32.xlu1 %v4186_v58, %s4990_s16  ;;  %4239 = vrot.lane.b32.xlu0 %v4195_v25, %s4990_s16 }
 0x391   :  { %v3979_v8 = vpop.f32.mrf.mxu1 }
 0x392   :  { %v7163_v26 = vadd.f32 %v3979_v8, %v7090_v18  ;;  %v4190_v18 = vld [vmem:[%s7465_s1 + $0x38] sm:$0xff]  ;;  %v3686_v8 = vadd.f32 %v3655_v38, %v7111_v16 }
 0x393   :  { %4229 = vrot.lane.b32.xlu1 %v4190_v18, %s4990_s16  ;;  %4245 = vrot.lane.b32.xlu0 %v4198_v30, %s4990_s16 }
 0x399   :  { %v3981_v44 = vpop.f32.mrf.mxu1 }
 0x39a   :  { %v7174_v36 = vadd.f32 %v3981_v44, %v7095_v43  ;;  %v7189_v43 = vpop.f32.mrf.mxu0 }
 0x39b   :  { %4235 = vrot.lane.b32.xlu1 %v4193_v52, %s4990_s16  ;;  %v3799_v52 = vadd.f32 %v3768_v54, %v3686_v8  ;;  %v3911_v60 = vadd.f32 %v7189_v43, %v3798_v4 }
 0x39c   :  { %v4073_v16 = vmul.f32 %v7174_v36, %v7174_v36 }
 0x39e   :  { %v4089_v30 = vsel %vm2682_vm4, %v4073_v16, 0.0 }
 0x3a1   :  { %v3984_v28 = vpop.f32.mrf.mxu1 }
 0x3a2   :  { %v7187_v56 = vadd.f32 %v3984_v28, %v7098_v2  ;;  %v3657_v2 = vpop.f32.mrf.mxu2  ;;  %v3881_v39 = vpop.f32.mrf.mxu0 }
 0x3a3   :  { %4241 = vrot.lane.b32.xlu1 %v4196_v59, %s4990_s16  ;;  %v3687_v58 = vadd.f32 %v3657_v2, %v7116_v22  ;;  %v3912_v38 = vadd.f32 %v3881_v39, %v3799_v52  ;;  %v3785_v2 = vpop.f32.mrf.mxu3 }
 0x3a4   :  { %v4074_v7 = vmul.f32 %v7187_v56, %v7187_v56 }
 0x3a5   :  { %v3800_v25 = vadd.f32 %v3770_v50, %v3687_v58 }
 0x3a9   :  { %v3986_v11 = vpop.f32.mrf.mxu1 }
 0x3aa   :  { %v7204_v48 = vadd.f32 %v3986_v11, %v7103_v49  ;;  %v3660_v49 = vpop.f32.mrf.mxu2  ;;  %v3883_v32 = vpop.f32.mrf.mxu0 }
 0x3ab   :  { %v3688_v9 = vadd.f32 %v3660_v49, %v7119_v51  ;;  %v4072_v51 = vmul.f32 %v7163_v26, %v7163_v26  ;;  %v3913_v1 = vadd.f32 %v3883_v32, %v3800_v25  ;;  %v4091_v32 = vsel %vm2682_vm4, %v4074_v7, 0.0 }
 0x3ac   :  { %v4075_v50 = vmul.f32 %v7204_v48, %v7204_v48 }
 0x3ad   :  { %v3801_v11 = vadd.f32 %v3773_v63, %v3688_v9  ;;  %v4088_v39 = vsel %vm2682_vm4, %v4072_v51, 0.0  ;;  %v3788_v51 = vpop.f32.mrf.mxu3 }
 0x3b1   :  { %v3989_v23 = vpop.f32.mrf.mxu1 }
 0x3b2   :  { %v7219_v14 = vadd.f32 %v3989_v23, %v7108_v37  ;;  %v3662_v12 = vpop.f32.mrf.mxu2  ;;  %v3886_v37 = vpop.f32.mrf.mxu0  ;;  %v4038_v23 = vsel %vm2682_vm4, %v7187_v56, 0.0 }
 0x3b3   :  { %v3689_v18 = vadd.f32 %v3662_v12, %v7124_v45  ;;  %v4036_v45 = vsel %vm2682_vm4, %v7174_v36, 0.0  ;;  %v3914_v59 = vadd.f32 %v3886_v37, %v3801_v11  ;;  %v4040_v37 = vsel %vm2682_vm4, %v7204_v48, 0.0 }
 0x3b4   :  { %v4042_v6 = vsel %vm2682_vm4, %v7219_v14, 0.0 }
 0x3b5   :  { %v3802_v22 = vadd.f32 %v3775_v27, %v3689_v18  ;;  %v4076_v27 = vmul.f32 %v7219_v14, %v7219_v14 }
 0x3b9   :  { %v3991_v29 = vpop.f32.mrf.mxu1 }
 0x3ba   :  { %v3665_v3 = vpop.f32.mrf.mxu2  ;;  %v3888_v24 = vpop.f32.mrf.mxu0  ;;  %v7268_v49 = vadd.f32 %v3991_v29, %v3911_v60 }
 0x3bb   :  { %v3690_v15 = vadd.f32 %v3665_v3, %v7127_v62  ;;  %v4035_v62 = vsel %vm2682_vm4, %v7163_v26, 0.0  ;;  %v3915_v63 = vadd.f32 %v3888_v24, %v3802_v22  ;;  %v4093_v24 = vsel %vm2682_vm4, %v4075_v50, 0.0 }
 0x3bc   :  { %v4037_v0 = vadd.f32 %v4036_v45, %v4035_v62  ;;  %v4077_v8 = vmul.f32 %v7268_v49, %v7268_v49 }
 0x3bd   :  { %v3803_v54 = vadd.f32 %v3778_v31, %v3690_v15 }
 0x3be   :  { %v4039_v31 = vadd.f32 %v4038_v23, %v4037_v0 }
 0x3c0   :  { %v4041_v4 = vadd.f32 %v4040_v37, %v4039_v31 }
 0x3c1   :  { %v3994_v61 = vpop.f32.mrf.mxu1 }
 0x3c2   :  { %v3667_v40 = vpop.f32.mrf.mxu2  ;;  %v3891_v10 = vpop.f32.mrf.mxu0  ;;  %v7277_v17 = vadd.f32 %v3994_v61, %v3912_v38 }
 0x3c3   :  { %v3691_v43 = vadd.f32 %v3667_v40, %v7132_v20  ;;  %v4090_v20 = vadd.f32 %v4089_v30, %v4088_v39  ;;  %v3916_v40 = vadd.f32 %v3891_v10, %v3803_v54  ;;  %v4044_v10 = vsel %vm2682_vm4, %v7268_v49, 0.0 }
 0x3c5   :  { %v3804_v9 = vadd.f32 %v3780_v5, %v3691_v43  ;;  %v4092_v18 = vadd.f32 %v4091_v32, %v4090_v20  ;;  %v4043_v5 = vadd.f32 %v4042_v6, %v4041_v4 }
 0x3c7   :  { %v4094_v11 = vadd.f32 %v4093_v24, %v4092_v18  ;;  %v4045_v45 = vadd.f32 %v4044_v10, %v4043_v5  ;;  %v3790_v18 = vpop.f32.mrf.mxu3 }
 0x3c9   :  { %v3996_v34 = vpop.f32.mrf.mxu1 }
 0x3ca   :  { %v3670_v47 = vpop.f32.mrf.mxu2  ;;  %v7237_v53 = vpop.f32.mrf.mxu0  ;;  %v7285_v58 = vadd.f32 %v3996_v34, %v3913_v1 }
 0x3cb   :  { %v3692_v29 = vadd.f32 %v3670_v47, %v7135_v41  ;;  %v4095_v41 = vsel %vm2682_vm4, %v4076_v27, 0.0  ;;  %v4078_v47 = vmul.f32 %v7277_v17, %v7277_v17 }
 0x3cc   :  { %v4079_v15 = vmul.f32 %v7285_v58, %v7285_v58  ;;  %v4048_v60 = vsel %vm2682_vm4, %v7285_v58, 0.0 }
 0x3cd   :  { %v3805_v25 = vadd.f32 %v3783_v19, %v3692_v29  ;;  %v3917_v19 = vadd.f32 %v7237_v53, %v3804_v9  ;;  %v4099_v7 = vsel %vm2682_vm4, %v4078_v47, 0.0 }
 0x3ce   :  { %v4101_v53 = vsel %vm2682_vm4, %v4079_v15, 0.0 }
 0x3d1   :  { %v7233_v57 = vpop.f32.mrf.mxu1 }
 0x3d2   :  { %v3672_v44 = vpop.f32.mrf.mxu2  ;;  %v7246_v21 = vpop.f32.mrf.mxu0  ;;  %v7294_v52 = vadd.f32 %v7233_v57, %v3914_v59  ;;  %v4096_v57 = vadd.f32 %v4095_v41, %v4094_v11 }
 0x3d3   :  { %v3693_v61 = vadd.f32 %v3672_v44, %v7140_v33  ;;  %v4097_v33 = vsel %vm2682_vm4, %v4077_v8, 0.0  ;;  %v4046_v44 = vsel %vm2682_vm4, %v7277_v17, 0.0  ;;  %v3918_v1 = vadd.f32 %v7246_v21, %v3805_v25 }
 0x3d4   :  { %v4080_v38 = vmul.f32 %v7294_v52, %v7294_v52  ;;  %v4098_v62 = vadd.f32 %v4097_v33, %v4096_v57  ;;  %v4050_v30 = vsel %vm2682_vm4, %v7294_v52, 0.0 }
 0x3d5   :  { %v3806_v22 = vadd.f32 %v3785_v2, %v3693_v61  ;;  %v4047_v2 = vadd.f32 %v4046_v44, %v4045_v45 }
 0x3d7   :  { %v4049_v39 = vadd.f32 %v4048_v60, %v4047_v2 }
 0x3d9   :  { %v7235_v46 = vpop.f32.mrf.mxu1  ;;  %v4051_v29 = vadd.f32 %v4050_v30, %v4049_v39 }
 0x3da   :  { %v3675_v12 = vpop.f32.mrf.mxu2  ;;  %v3898_v3 = vpop.f32.mrf.mxu0  ;;  %v7303_v16 = vadd.f32 %v7235_v46, %v3915_v63  ;;  %v4103_v63 = vsel %vm2682_vm4, %v4080_v38, 0.0 }
 0x3db   :  { %v3694_v34 = vadd.f32 %v3675_v12, %v7143_v55  ;;  %v3919_v0 = vadd.f32 %v3898_v3, %v3806_v22 }
 0x3dc   :  { %v4081_v23 = vmul.f32 %v7303_v16, %v7303_v16  ;;  %v4052_v21 = vsel %vm2682_vm4, %v7303_v16, 0.0 }
 0x3dd   :  { %v3807_v46 = vadd.f32 %v3788_v51, %v3694_v34  ;;  %v4053_v6 = vadd.f32 %v4052_v21, %v4051_v29 }
 0x3de   :  { %v4105_v20 = vsel %vm2682_vm4, %v4081_v23, 0.0 }
 0x3e1   :  { %v7239_v35 = vpop.f32.mrf.mxu1 }
 0x3e2   :  { %v7312_v54 = vadd.f32 %v7239_v35, %v3916_v40  ;;  %v3677_v59 = vpop.f32.mrf.mxu2  ;;  %v3901_v43 = vpop.f32.mrf.mxu0  ;;  %v4100_v35 = vadd.f32 %v4099_v7, %v4098_v62 }
 0x3e3   :  { %v3695_v37 = vadd.f32 %v3677_v59, %v7152_v13 }
 0x3e4   :  { %v4082_v12 = vmul.f32 %v7312_v54, %v7312_v54  ;;  %v4102_v27 = vadd.f32 %v4101_v53, %v4100_v35  ;;  %v4054_v3 = vsel %vm2682_vm4, %v7312_v54, 0.0 }
 0x3e5   :  { %v4055_v41 = vadd.f32 %v4054_v3, %v4053_v6  ;;  %v3808_v10 = vadd.f32 %v3790_v18, %v3695_v37 }
 0x3e6   :  { %v4104_v24 = vadd.f32 %v4103_v63, %v4102_v27 }
 0x3e8   :  { %v4106_v4 = vadd.f32 %v4105_v20, %v4104_v24 }
 0x3e9   :  { %v7248_v28 = vpop.f32.mrf.mxu1 }
 0x3ea   :  { %v7321_v50 = vadd.f32 %v7248_v28, %v3917_v19  ;;  %v3920_v28 = vadd.f32 %v3901_v43, %v3807_v46  ;;  %v3903_v22 = vpop.f32.mrf.mxu0 }
 0x3ec   :  { %v4083_v31 = vmul.f32 %v7321_v50, %v7321_v50  ;;  %v4056_v13 = vsel %vm2682_vm4, %v7321_v50, 0.0 }
 0x3ed   :  { %v4057_v5 = vadd.f32 %v4056_v13, %v4055_v41 }
 0x3ee   :  { %v4109_v47 = vsel %vm2682_vm4, %v4083_v31, 0.0 }
 0x3f1   :  { %v4009_v42 = vpop.f32.mrf.mxu1 }
 0x3f2   :  { %v7328_v32 = vadd.f32 %v4009_v42, %v3918_v1  ;;  %v4107_v42 = vsel %vm2682_vm4, %v4082_v12, 0.0 }
 0x3f3   :  { %v4108_v11 = vadd.f32 %v4107_v42, %v4106_v4  ;;  %v4224_v4 = vpop.permute.xlu2 %4223 }
 0x3f4   :  { %v4084_v9 = vmul.f32 %v7328_v32, %v7328_v32  ;;  %v4058_v25 = vsel %vm2682_vm4, %v7328_v32, 0.0 }
 0x3f5   :  { %v4110_v51 = vadd.f32 %v4109_v47, %v4108_v11  ;;  %v4059_v57 = vadd.f32 %v4058_v25, %v4057_v5  ;;  %v4129_v5 = vld [vmem:[%s7470_s6] sm:$0x1]  ;;  %s4991_s6 = smov [#allocation3]  }
 0x3f6   :  { %v4111_v33 = vsel %vm2682_vm4, %v4084_v9, 0.0  ;;  %v4216_v9 = vpop.permute.xlu0 %4215 }
 0x3f7   :  { %v4112_v7 = vadd.f32 %v4111_v33, %v4110_v51 }
 0x3f9   :  { %v4011_v55 = vpop.f32.mrf.mxu1 }
 0x3fa   :  { %v7336_v40 = vadd.f32 %v4011_v55, %v3919_v0  ;;  %v3921_v55 = vadd.f32 %v3903_v22, %v3808_v10  ;;  %v4220_v10 = vpop.permute.xlu1 %4219 }
 0x3fc   :  { %v4085_v34 = vmul.f32 %v7336_v40, %v7336_v40  ;;  %v4060_v44 = vsel %vm2682_vm4, %v7336_v40, 0.0 }
 0x3fd   :  { %v4061_v60 = vadd.f32 %v4060_v44, %v4059_v57  ;;  %v4226_v44 = vpop.permute.xlu2 %4225  ;;  %v4142_v57 = vld [vmem:[%s7471_s7] sm:$0x1]  ;;  %s4348_s7 = sshll.u32 %s4991_s6, 4  ;;  %s4349_s7 = int_to_ptr.vmem [resolvable:$true] %s4348_s7 }
 0x3fe   :  { %v4113_v45 = vsel %vm2682_vm4, %v4085_v34, 0.0  ;;  %v4218_v25 = vpop.permute.xlu0 %4217 }
 0x3ff   :  { %v4114_v2 = vadd.f32 %v4113_v45, %v4112_v7 }
 0x401   :  { %v4014_v8 = vpop.f32.mrf.mxu1 }
 0x402   :  { %v7343_v61 = vadd.f32 %v4014_v8, %v3920_v28  ;;  %v4222_v51 = vpop.permute.xlu1 %4221 }
 0x404   :  { %v4086_v15 = vmul.f32 %v7343_v61, %v7343_v61  ;;  %v4062_v19 = vsel %vm2682_vm4, %v7343_v61, 0.0 }
 0x405   :  { %v4063_v1 = vadd.f32 %v4062_v19, %v4061_v60 }
 0x406   :  { %v4115_v46 = vsel %vm2682_vm4, %v4086_v15, 0.0 }
 0x407   :  { %v4116_v30 = vadd.f32 %v4115_v46, %v4114_v2 }
 0x409   :  { %v4016_v38 = vpop.f32.mrf.mxu1 }
 0x40a   :  { %v7359_v62 = vadd.f32 %v4016_v38, %v3921_v55  ;;  %v4228_v55 = vpop.permute.xlu0 %4227 }
 0x40c   :  { %v4064_v59 = vsel %vm2682_vm4, %v7359_v62, 0.0  ;;  %v4087_v53 = vmul.f32 %v7359_v62, %v7359_v62 }
 0x40d   :  { %v4065_v23 = vadd.f32 %v4064_v59, %v4063_v1 }
 0x40e   :  { %v4117_v43 = vsel %vm2682_vm4, %v4087_v53, 0.0 }
 0x40f   :  { %v4066_v35 = vrot.slane %v4065_v23, 4  ;;  %v4118_v39 = vadd.f32 %v4117_v43, %v4116_v30  ;;  %v4232_v43 = vpop.permute.xlu2 %4231 }
 0x411   :  { %v4067_v0 = vadd.f32 %v4066_v35, %v4065_v23  ;;  %v4119_v63 = vrot.slane %v4118_v39, 4 }
 0x413   :  { %v4068_v21 = vrot.slane %v4067_v0, 2  ;;  %v4120_v12 = vadd.f32 %v4119_v63, %v4118_v39 }
 0x415   :  { %v4069_v37 = vadd.f32 %v4068_v21, %v4067_v0  ;;  %v4121_v27 = vrot.slane %v4120_v12, 2  ;;  %v4230_v21 = vpop.permute.xlu1 %4229 }
 0x417   :  { %v4070_v29 = vrot.slane %v4069_v37, 1  ;;  %v4122_v28 = vadd.f32 %v4121_v27, %v4120_v12 }
 0x419   :  { %v4071_v20 = vadd.f32 %v4070_v29, %v4069_v37  ;;  %v4123_v3 = vrot.slane %v4122_v28, 1 }
 0x41b   :  { %v4124_v31 = vadd.f32 %v4123_v3, %v4122_v28  ;;  %v4125_v24 = vmul.f32 0.0078125, %v4071_v20  ;;  %v4234_v20 = vpop.permute.xlu0 %4233 }
 0x41d   :  { %v4126_v6 = vmul.f32 0.0078125, %v4124_v31  ;;  %v4127_v8 = vmul.f32 %v4125_v24, %v4125_v24 }
 0x41f   :  { %v4128_v42 = vsub.f32 %v4126_v6, %v4127_v8 }
 0x421   :  { %v4130_v13 = vadd.f32 1e-05, %v4128_v42 }
 0x423   :  { %4961 = vrsqrt.f32 %v4130_v13  ;;  %vm4137_vm10 = vweird.f32 %v4130_v13 }
 0x429   :  { %v4962_v18 = vpop.eup %4961 }
 0x42a   :  { %v4132_v41 = vmul.f32 %v4962_v18, %v4130_v13  ;;  %vm4138_vm9 = vweird.f32 %v4962_v18 }
 0x42b   :  { %vm4139_vm11 = vmor %vm4137_vm10, %vm4138_vm9 }
 0x42c   :  { %v4133_v47 = vmul.f32 %v4962_v18, %v4132_v41 }
 0x42e   :  { %v4134_v34 = vmul.f32 0.5, %v4133_v47 }
 0x430   :  { %v4135_v11 = vsub.f32 1.5, %v4134_v34  ;;  %v4238_v34 = vpop.permute.xlu2 %4237 }
 0x432   :  { %v4136_v33 = vmul.f32 %v4962_v18, %v4135_v11 }
 0x434   :  { %v4140_v15 = vsel %vm4139_vm11, %v4962_v18, %v4136_v33 }
 0x435   :  { %v4141_v22 = vmul.f32 %v4140_v15, %v4129_v5 }
 0x437   :  { %v4143_v45 = vmul.f32 %v4141_v22, %v4125_v24  ;;  %v7372_v19 = vperm.slane %v4141_v22, 0  ;;  %v4236_v22 = vpop.permute.xlu1 %4235 }
 0x439   :  { %v4144_v7 = vsub.f32 %v4142_v57, %v4143_v45  ;;  %v4148_v60 = vmul.f32 %v7372_v19, %v7163_v26  ;;  %v4152_v38 = vmul.f32 %v7372_v19, %v7219_v14  ;;  %v4150_v2 = vmul.f32 %v7372_v19, %v7187_v56 }
 0x43a   :  { %v4149_v1 = vmul.f32 %v7372_v19, %v7174_v36  ;;  %v4153_v59 = vmul.f32 %v7372_v19, %v7268_v49  ;;  %v4151_v53 = vmul.f32 %v7372_v19, %v7204_v48  ;;  %v4154_v26 = vmul.f32 %v7372_v19, %v7277_v17 }
 0x43b   :  { %v7378_v46 = vperm.slane %v4144_v7, 0  ;;  %v4156_v14 = vmul.f32 %v7372_v19, %v7294_v52  ;;  %v4162_v30 = vmul.f32 %v7372_v19, %v7343_v61  ;;  %v4155_v24 = vmul.f32 %v7372_v19, %v7285_v58  ;;  %v4240_v7 = vpop.permute.xlu0 %4239 }
 0x43c   :  { %v4157_v6 = vmul.f32 %v7372_v19, %v7303_v16  ;;  %v4159_v42 = vmul.f32 %v7372_v19, %v7321_v50  ;;  %v4158_v13 = vmul.f32 %v7372_v19, %v7312_v54  ;;  %v4160_v54 = vmul.f32 %v7372_v19, %v7328_v32 }
 0x43d   :  { %v4167_v56 = vadd.f32 %v7378_v46, %v4148_v60  ;;  %v4171_v23 = vadd.f32 %v7378_v46, %v4152_v38  ;;  %v4169_v36 = vadd.f32 %v7378_v46, %v4150_v2  ;;  %v4168_v49 = vadd.f32 %v7378_v46, %v4149_v1 }
 0x43e   :  { %v4172_v48 = vadd.f32 %v7378_v46, %v4153_v59  ;;  %v4170_v35 = vadd.f32 %v7378_v46, %v4151_v53  ;;  %v4173_v17 = vadd.f32 %v7378_v46, %v4154_v26  ;;  %v7402_v52 = vadd.f32 %v7378_v46, %v4156_v14  ;;  %v4244_v14 = vpop.permute.xlu2 %4243 }
 0x43f   :  { %v4263_v39 = vadd.f32 %v4216_v9, %v4167_v56  ;;  %v4279_v61 = vmax.f32 %v4167_v56, 0.0  ;;  %v4267_v0 = vadd.f32 %v4224_v4, %v4171_v23  ;;  %v4283_v63 = vmax.f32 %v4171_v23, 0.0 }
 0x440   :  { %v4265_v12 = vadd.f32 %v4220_v10, %v4169_v36  ;;  %v4264_v37 = vadd.f32 %v4218_v25, %v4168_v49  ;;  %v4281_v28 = vmax.f32 %v4169_v36, 0.0  ;;  %v4268_v31 = vadd.f32 %v4226_v44, %v4172_v48  ;;  %v4242_v36 = vpop.permute.xlu1 %4241 }
 0x441   :  { %4295 = vst.msk [vmem:[#allocation3] sm:$0xff] %vm2682_vm4, %v4279_v61  ;;  %v4311_v27 = vmax.f32 %v4263_v39, 0.0  ;;  %v4315_v29 = vmax.f32 %v4267_v0, 0.0  ;;  %v4280_v8 = vmax.f32 %v4168_v49, 0.0  ;;  %v4266_v18 = vadd.f32 %v4222_v51, %v4170_v35 }
 0x442   :  { %4299 = vst.msk [vmem:[#allocation3 + $0x20] sm:$0xff] %vm2682_vm4, %v4283_v63  ;;  %v4313_v3 = vmax.f32 %v4265_v12, 0.0  ;;  %v4312_v9 = vmax.f32 %v4264_v37, 0.0  ;;  %v4174_v4 = vadd.f32 %v7378_v46, %v4155_v24  ;;  %v4176_v58 = vadd.f32 %v7378_v46, %v4157_v6 }
 0x443   :  { %4328 = vst.msk [vmem:[#allocation3] sm:$0xff] %vm4327_vm12, %v4311_v27  ;;  %v4284_v16 = vmax.f32 %v4172_v48, 0.0  ;;  %v4178_v41 = vadd.f32 %v7378_v46, %v4159_v42  ;;  %v4177_v10 = vadd.f32 %v7378_v46, %v4158_v13  ;;  %v4316_v50 = vmax.f32 %v4268_v31, 0.0 }
 0x444   :  { %4332 = vst.msk [vmem:[#allocation3 + $0x20] sm:$0xff] %vm4327_vm12, %v4315_v29  ;;  %v4269_v47 = vadd.f32 %v4228_v55, %v4173_v17  ;;  %v4282_v25 = vmax.f32 %v4170_v35, 0.0  ;;  %v4314_v11 = vmax.f32 %v4266_v18, 0.0  ;;  %v4271_v5 = vadd.f32 %v4232_v43, %v7402_v52  ;;  %v4246_v35 = vpop.permute.xlu0 %4245 }
 0x445   :  { %4297 = vst.msk [vmem:[#allocation3 + $0x10] sm:$0xff] %vm2682_vm4, %v4281_v28  ;;  %v4179_v33 = vadd.f32 %v7378_v46, %v4160_v54  ;;  %v4181_v44 = vadd.f32 %v7378_v46, %v4162_v30  ;;  %v4285_v15 = vmax.f32 %v4173_v17, 0.0  ;;  %v4161_v32 = vmul.f32 %v7372_v19, %v7336_v40 }
 0x446   :  { %4330 = vst.msk [vmem:[#allocation3 + $0x10] sm:$0xff] %vm4327_vm12, %v4313_v3  ;;  %v4163_v51 = vmul.f32 %v7372_v19, %v7359_v62  ;;  %v4317_v57 = vmax.f32 %v4269_v47, 0.0  ;;  %v4270_v45 = vadd.f32 %v4230_v21, %v4174_v4  ;;  %v4287_v55 = vmax.f32 %v7402_v52, 0.0 }
 0x447   :  { %4296 = vst.msk [vmem:[#allocation3 + $0x8] sm:$0xff] %vm2682_vm4, %v4280_v8  ;;  %v4180_v60 = vadd.f32 %v7378_v46, %v4161_v32  ;;  %v4319_v2 = vmax.f32 %v4271_v5, 0.0  ;;  %v4272_v40 = vadd.f32 %v4234_v20, %v4176_v58  ;;  %v4286_v62 = vmax.f32 %v4174_v4, 0.0 }
 0x448   :  { %4329 = vst.msk [vmem:[#allocation3 + $0x8] sm:$0xff] %vm4327_vm12, %v4312_v9  ;;  %v4182_v38 = vadd.f32 %v7378_v46, %v4163_v51  ;;  %v4318_v19 = vmax.f32 %v4270_v45, 0.0  ;;  %v4274_v1 = vadd.f32 %v4238_v34, %v4178_v41  ;;  %v4288_v59 = vmax.f32 %v4176_v58, 0.0 }
 0x449   :  { %4300 = vst.msk [vmem:[#allocation3 + $0x28] sm:$0xff] %vm2682_vm4, %v4284_v16  ;;  %v4320_v53 = vmax.f32 %v4272_v40, 0.0  ;;  %v4273_v26 = vadd.f32 %v4236_v22, %v4177_v10  ;;  %v4290_v46 = vmax.f32 %v4178_v41, 0.0  ;;  %v4275_v56 = vadd.f32 %v4240_v7, %v4179_v33 }
 0x44a   :  { %4333 = vst.msk [vmem:[#allocation3 + $0x28] sm:$0xff] %vm4327_vm12, %v4316_v50  ;;  %v4322_v30 = vmax.f32 %v4274_v1, 0.0  ;;  %v4289_v23 = vmax.f32 %v4177_v10, 0.0  ;;  %v4277_v43 = vadd.f32 %v4244_v14, %v4181_v44  ;;  %v4291_v48 = vmax.f32 %v4179_v33, 0.0 }
 0x44b   :  { %4298 = vst.msk [vmem:[#allocation3 + $0x18] sm:$0xff] %vm2682_vm4, %v4282_v25  ;;  %v4321_v49 = vmax.f32 %v4273_v26, 0.0  ;;  %v4323_v17 = vmax.f32 %v4275_v56, 0.0  ;;  %v4276_v52 = vadd.f32 %v4242_v36, %v4180_v60  ;;  %v4293_v39 = vmax.f32 %v4181_v44, 0.0 }
 0x44c   :  { %4331 = vst.msk [vmem:[#allocation3 + $0x18] sm:$0xff] %vm4327_vm12, %v4314_v11  ;;  %v4325_v61 = vmax.f32 %v4277_v43, 0.0  ;;  %v4278_v0 = vadd.f32 %v4246_v35, %v4182_v38  ;;  %v4292_v63 = vmax.f32 %v4180_v60, 0.0  ;;  %v4294_v12 = vmax.f32 %v4182_v38, 0.0 }
 0x44d   :  { %4301 = vst.msk [vmem:[#allocation3 + $0x30] sm:$0xff] %vm2682_vm4, %v4285_v15  ;;  %v4324_v21 = vmax.f32 %v4276_v52, 0.0 }
 0x44e   :  { %4334 = vst.msk [vmem:[#allocation3 + $0x30] sm:$0xff] %vm4327_vm12, %v4317_v57  ;;  %v4326_v37 = vmax.f32 %v4278_v0, 0.0 }
 0x44f   :  { %4303 = vst.msk [vmem:[#allocation3 + $0x40] sm:$0xff] %vm2682_vm4, %v4287_v55 }
 0x450   :  { %4336 = vst.msk [vmem:[#allocation3 + $0x40] sm:$0xff] %vm4327_vm12, %v4319_v2 }
 0x451   :  { %4302 = vst.msk [vmem:[#allocation3 + $0x38] sm:$0xff] %vm2682_vm4, %v4286_v62 }
 0x452   :  { %4335 = vst.msk [vmem:[#allocation3 + $0x38] sm:$0xff] %vm4327_vm12, %v4318_v19 }
 0x453   :  { %4304 = vst.msk [vmem:[#allocation3 + $0x48] sm:$0xff] %vm2682_vm4, %v4288_v59 }
 0x454   :  { %4337 = vst.msk [vmem:[#allocation3 + $0x48] sm:$0xff] %vm4327_vm12, %v4320_v53 }
 0x455   :  { %4306 = vst.msk [vmem:[#allocation3 + $0x58] sm:$0xff] %vm2682_vm4, %v4290_v46 }
 0x456   :  { %4339 = vst.msk [vmem:[#allocation3 + $0x58] sm:$0xff] %vm4327_vm12, %v4322_v30 }
 0x457   :  { %4305 = vst.msk [vmem:[#allocation3 + $0x50] sm:$0xff] %vm2682_vm4, %v4289_v23 }
 0x458   :  { %4338 = vst.msk [vmem:[#allocation3 + $0x50] sm:$0xff] %vm4327_vm12, %v4321_v49 }
 0x459   :  { %4307 = vst.msk [vmem:[#allocation3 + $0x60] sm:$0xff] %vm2682_vm4, %v4291_v48 }
 0x45a   :  { %4340 = vst.msk [vmem:[#allocation3 + $0x60] sm:$0xff] %vm4327_vm12, %v4323_v17 }
 0x45b   :  { %4309 = vst.msk [vmem:[#allocation3 + $0x70] sm:$0xff] %vm2682_vm4, %v4293_v39 }
 0x45c   :  { %4342 = vst.msk [vmem:[#allocation3 + $0x70] sm:$0xff] %vm4327_vm12, %v4325_v61 }
 0x45d   :  { %4308 = vst.msk [vmem:[#allocation3 + $0x68] sm:$0xff] %vm2682_vm4, %v4292_v63 }
 0x45e   :  { %4341 = vst.msk [vmem:[#allocation3 + $0x68] sm:$0xff] %vm4327_vm12, %v4324_v21 }
 0x45f   :  { %4310 = vst.msk [vmem:[#allocation3 + $0x78] sm:$0xff] %vm2682_vm4, %v4294_v12 }
 0x460   :  { %4343 = vst.msk [vmem:[#allocation3 + $0x78] sm:$0xff] %vm4327_vm12, %v4326_v37 }
 0x461   :  { %4356 = dma.vmem_to_hbm [thread:$0]  %s4349_s7, 2048, %s4351_s24, [#allocation4], %s4992_s0, %s4992_s0, %s4990_s16  }
 0x462   :  { %4987 = dma.done.wait [#allocation4], 2048  }
 0x463   :  { %4988 = vsyncadd [#allocation4], 4294965248 }
 0x464   :  { %4361 = vsyncpa [#allocation4], 1 }

</bundles_post_ra>
